<compile_context>
chip_gen: v6e
topology: v6e:2x2x1
jax: 0.10.0
libtpu: 0.0.40
codegen_flags: <defaults>
</compile_context>

<pallas_src>
import jax
import jax.numpy as jnp
import numpy as np
from jax.experimental import pallas as pl
from jax.experimental.pallas import tpu as pltpu


def _round_up(a, b):
    return (a + b - 1) // b * b


# ----------------------------------------------------------------------------
# Kernel 1: global min/max depth normalization   out = 2*(x-min)/(max-min) - 1
# Pass 1: row-tiled partial min/max per frame.  Combine to two scalars in plain
# JAX (tiny).  Pass 2: gridded elementwise apply reading (min, scale) from SMEM.
# Operates on the single depth channel (the torch .expand(-1,3,-1,-1) copies are
# identical data).
# ----------------------------------------------------------------------------
def _minmax_partial_kernel(x_ref, mn_ref, mx_ref):
    x = x_ref[...]
    mn_ref[...] = jnp.broadcast_to(jnp.min(x), mn_ref.shape)
    mx_ref[...] = jnp.broadcast_to(jnp.max(x), mx_ref.shape)


def _minmax_apply_kernel(stats_ref, x_ref, o_ref):
    mn = stats_ref[0]          # global min   (SMEM scalar)
    scale = stats_ref[1]       # 2 / (max - min), eps-guarded on the host side
    o_ref[...] = (x_ref[...] - mn) * scale - 1.0


def _pick_row_tile(hh, cap=256):
    """Largest multiple-of-8 divisor of hh that is <= cap (full frame if small)."""
    if hh <= cap:
        return hh
    divs = [r for r in range(8, cap + 1, 8) if hh % r == 0]
    return max(divs) if divs else hh


def minmax_normalize(midas_out):
    """midas_out: (S, 1, H, W) f32 -> normalized (S, 1, H, W) f32."""
    s, c, hh, ww = midas_out.shape
    assert c == 1
    x = midas_out.reshape(s, hh, ww).astype(jnp.float32)
    rt = _pick_row_tile(hh)
    nrt = hh // rt

    mins, maxes = pl.pallas_call(
        _minmax_partial_kernel,
        grid=(s, nrt),
        in_specs=[pl.BlockSpec((1, rt, ww), lambda i, j: (i, j, 0))],
        out_specs=[pl.BlockSpec((1, 8, 128), lambda i, j: (i, j, 0)),
                   pl.BlockSpec((1, 8, 128), lambda i, j: (i, j, 0))],
        out_shape=[jax.ShapeDtypeStruct((s, nrt * 8, 128), jnp.float32),
                   jax.ShapeDtypeStruct((s, nrt * 8, 128), jnp.float32)],
        compiler_params=pltpu.CompilerParams(
            dimension_semantics=("parallel", "parallel")),
    )(x)

    # tiny cross-frame combine (s * nrt * 1024 elements) in plain JAX
    mn = jnp.min(mins)
    mx = jnp.max(maxes)
    scale = 2.0 / jnp.maximum(mx - mn, 1e-12)   # eps guard: constant depth map
    stats = jnp.stack([mn, scale]).astype(jnp.float32)   # (2,) -> SMEM scalars

    out = pl.pallas_call(
        _minmax_apply_kernel,
        grid=(s, nrt),
        in_specs=[
            pl.BlockSpec(memory_space=pltpu.MemorySpace.SMEM),
            pl.BlockSpec((1, rt, ww), lambda i, j: (i, j, 0)),
        ],
        out_specs=pl.BlockSpec((1, rt, ww), lambda i, j: (i, j, 0)),
        out_shape=jax.ShapeDtypeStruct((s, hh, ww), jnp.float32),
        compiler_params=pltpu.CompilerParams(
            dimension_semantics=("parallel", "parallel")),
    )(stats, x)
    return out.reshape(s, 1, hh, ww)


# ----------------------------------------------------------------------------
# Kernel 2: fused raw+deep ConvLSTM cell, zero-initial-state fast path.
#   gates = Conv3x3(cat([x, 0])) + b ;  i,f,o,g = split(gates)
#   c' = f*0 + i*g ;  h' = o * tanh(c')
# With h=c=0 the h input channels and the f gate contribute nothing, so the
# packed weight keeps only the x input channels and the (i, o, g) gate columns.
# The 3x3 conv is lowered to per-gate bf16 MXU matmuls per row tile (wrapper-side
# bf16 im2col, K = 9*Cin lane-padded), f32 accumulation, f32 gate math, bf16 h out.
# The per-gate dots keep the live f32 accumulator small (no big-spill gate phase),
# and the leading "tower" grid axis (raw/deep) is parallel for megacore chips.
# ----------------------------------------------------------------------------
def _convlstm_zero_kernel(x_ref, w_ref, b_ref, h_ref):
    chid = h_ref.shape[-1]
    x = x_ref[0]

    def gate(g):
        acc = jnp.dot(x, w_ref[0, :, g * chid:(g + 1) * chid],
                      preferred_element_type=jnp.float32)
        return acc + b_ref[0, :, g * chid:(g + 1) * chid]

    # gate packing order in the weight is (i, o, g); sigmoid = 0.5*tanh(0.5x)+0.5
    gg = jnp.tanh(gate(2))                              # g gate
    gi = 0.5 * jnp.tanh(0.5 * gate(0)) + 0.5            # i gate
    c_next = gi * gg                                    # c_prev == 0 -> f gate drops
    go = 0.5 * jnp.tanh(0.5 * gate(1)) + 0.5            # o gate
    h_ref[0] = (go * jnp.tanh(c_next)).astype(h_ref.dtype)


def _im2col_3x3_bf16(x_nchw, kp, m_p):
    """(S, C, H, W) f32 -> (m_p, kp) bf16, K order (ky, kx, c); 3x3 conv, pad=1.
    Rows are padded to m_p and K lanes padded to kp with zeros."""
    s, c, hh, ww = x_nchw.shape
    x = jnp.transpose(x_nchw, (0, 2, 3, 1)).astype(jnp.bfloat16)     # NHWC bf16
    xp = jnp.pad(x, ((0, 0), (1, 1), (1, 1), (0, 0)))
    cols = [xp[:, ky:ky + hh, kx:kx + ww, :] for ky in range(3) for kx in range(3)]
    col = jnp.concatenate(cols, axis=-1).reshape(s * hh * ww, 9 * c)
    return jnp.pad(col, ((0, m_p - s * hh * ww), (0, kp - 9 * c)))


def convlstm_zero_both(x_both, w_both, b_both, chid_p, tm):
    """x_both: (2, m_p, 9*Cin padded) bf16; w_both: (2, kp, 3*chid_p) bf16;
    b_both: (2, 1, 3*chid_p) f32.  Returns h: (2, m_p, chid_p) bf16 (padded hidden
    channels are exactly zero; padded rows hold garbage and are sliced off)."""
    _, m_p, kp = x_both.shape
    g3 = w_both.shape[-1]
    return pl.pallas_call(
        _convlstm_zero_kernel,
        grid=(2, m_p // tm),
        in_specs=[
            pl.BlockSpec((1, tm, kp), lambda t, i: (t, i, 0)),
            pl.BlockSpec((1, kp, g3), lambda t, i: (t, 0, 0)),   # per-tower weight
            pl.BlockSpec((1, 1, g3), lambda t, i: (t, 0, 0)),
        ],
        out_specs=pl.BlockSpec((1, tm, chid_p), lambda t, i: (t, i, 0)),
        out_shape=jax.ShapeDtypeStruct((2, m_p, chid_p), jnp.bfloat16),
        compiler_params=pltpu.CompilerParams(
            dimension_semantics=("parallel", "parallel")),
    )(x_both, w_both, b_both)


# ----------------------------------------------------------------------------
# Kernel 3: fused wasd/x/y Linear heads.  The three weights are concatenated
# along N (lane-padded).  The raw and deep K streams are stacked on a leading
# "parallel" grid axis (one per TensorCore on v7x); each stream's reduction is
# K-gridded with a large tile so weight DMA is double-buffered and per-step grid
# overhead is amortized.  The partial outputs are accumulated directly into the
# resident output block; bias is added by a tiny JAX add after the partial sum.
# ----------------------------------------------------------------------------
def _fc_heads_kernel(x_ref, w_ref, out_ref):
    @pl.when(pl.program_id(1) == 0)
    def _():
        out_ref[...] = jnp.zeros_like(out_ref)
    out_ref[0] += jnp.dot(x_ref[0], w_ref[0], preferred_element_type=jnp.float32)


def fc_heads(x_both, w_both, *, target_tk=9600):
    """x_both: (2, S, F_p) bf16; w_both: (2, F_p, N_p) bf16.
    Returns (2, S, N_p) f32 partial products (raw / deep); caller sums + biases."""
    _, s, f_p = x_both.shape
    n_p = w_both.shape[-1]
    lanes = 128
    rows = f_p // lanes
    best = 1
    for r in range(1, rows + 1):               # K tile must divide F_p, multiple of 128
        if rows % r == 0 and abs(r * lanes - target_tk) < abs(best * lanes - target_tk):
            best = r
    tk = best * lanes
    kt = f_p // tk
    return pl.pallas_call(
        _fc_heads_kernel,
        grid=(2, kt),
        in_specs=[
            pl.BlockSpec((1, s, tk), lambda p, k: (p, 0, k)),
            pl.BlockSpec((1, tk, n_p), lambda p, k: (p, k, 0)),
        ],
        out_specs=pl.BlockSpec((1, s, n_p), lambda p, k: (p, 0, 0)),
        out_shape=jax.ShapeDtypeStruct((2, s, n_p), jnp.float32),
        compiler_params=pltpu.CompilerParams(
            dimension_semantics=("parallel", "arbitrary"),
            vmem_limit_bytes=32 * 1024 * 1024),
    )(x_both, w_both)


# ----------------------------------------------------------------------------
# One-time host-side parameter packing (torch layout -> kernel layout)
# ----------------------------------------------------------------------------
def prepare_params(tp, t, h, w):
    """bf16, lane-padded hidden channels (Chid -> multiple of 128), im2col conv
    weight layout, and NHWC-permuted + fused (wasd|x|y) FC weights.  Conv and FC
    weights are stacked along a leading tower axis (raw, deep)."""
    chid_p = _round_up(t, 128)
    kp = _round_up(9 * t, 128)
    n_wasd, n_x, n_y = tp["wasd_w"].shape[0], tp["x_w"].shape[0], tp["y_w"].shape[0]
    n_all = n_wasd + n_x + n_y
    n_p = _round_up(n_all, 128)

    def pack_conv(w_t, b_t):
        # torch Conv2d weight (4T, 2T, 3, 3); gate order (i, f, o, g); conv input
        # is cat([x, h]) with x first.  Zero-state path keeps only the x input
        # channels and the (i, o, g) gates; each gate is padded to chid_p lanes.
        w_x = w_t[:, :t, :, :]
        cols, bs = [], []
        for g0 in (0, 2, 3):                                    # i, o, g
            wg = w_x[g0 * t:(g0 + 1) * t]                       # (T, T, 3, 3)
            wg = jnp.transpose(wg, (2, 3, 1, 0)).reshape(9 * t, t)   # K=(ky,kx,cin)
            cols.append(jnp.pad(wg, ((0, kp - 9 * t), (0, chid_p - t))))
            bs.append(jnp.pad(b_t[g0 * t:(g0 + 1) * t], (0, chid_p - t)))
        w_col = jnp.concatenate(cols, axis=1).astype(jnp.bfloat16)     # (kp, 3*chid_p)
        b_col = jnp.concatenate(bs).reshape(1, 3 * chid_p).astype(jnp.float32)
        return w_col, b_col

    def pack_fc():
        w_all = jnp.concatenate([tp["wasd_w"], tp["x_w"], tp["y_w"]], axis=0)
        b_all = jnp.concatenate([tp["wasd_b"], tp["x_b"], tp["y_b"]])
        f_half = t * h * w

        def part(wp):
            # rows permuted from torch's NCHW flatten to the kernel's (y, x, c_p)
            # flatten, with zero rows for the padded hidden channels.
            wp = jnp.transpose(wp.reshape(n_all, t, h, w), (2, 3, 1, 0))  # (h,w,T,n)
            wp = jnp.pad(wp, ((0, 0), (0, 0), (0, chid_p - t), (0, n_p - n_all)))
            return wp.reshape(h * w * chid_p, n_p).astype(jnp.bfloat16)

        b = jnp.pad(b_all, (0, n_p - n_all)).reshape(1, n_p).astype(jnp.float32)
        return part(w_all[:, :f_half]), part(w_all[:, f_half:]), b

    raw_w, raw_b = pack_conv(tp["raw_w"], tp["raw_b"])
    deep_w, deep_b = pack_conv(tp["deep_w"], tp["deep_b"])
    fc_w_raw, fc_w_deep, fc_b = pack_fc()
    return {
        "conv_w": jnp.stack([raw_w, deep_w]),          # (2, kp, 3*chid_p) bf16
        "conv_b": jnp.stack([raw_b, deep_b]),          # (2, 1, 3*chid_p) f32
        "fc_w": jnp.stack([fc_w_raw, fc_w_deep]),      # (2, F_p, N_p) bf16
        "fc_b": fc_b,                                  # (1, N_p) f32
        "cfg": dict(t=t, h=h, w=w, chid_p=chid_p, kp=kp,
                    n_wasd=n_wasd, n_x=n_x, n_y=n_y),
    }


# ----------------------------------------------------------------------------
# DVNet3.forward (train=True path, hidden states start at zero)
# ----------------------------------------------------------------------------
def dvnet3_forward(raw_feat, deep_feat, midas_out, params, *, tm_max=512):
    """
    raw_feat / deep_feat: (S, T, h, w) NCHW stand-ins for self.raw_features(x) and
        self.deep_features(normalized midas).
    midas_out: (S, 1, H, W) stand-in for midas_scratch.output_conv + bilinear interp.
    Returns (logit_wasd, logit_x, logit_y) each (S, 1, n_*), plus the normalized
    depth map (the tensor that would feed self.deep_features).
    """
    # TODO(synk): MiDaS pretrained backbone (layer1..4 + refinenets + output_conv),
    # F.interpolate(bilinear) and the two EfficientNet-B0 towers are pretrained,
    # checkpoint-loaded convnets and are not translated to Pallas; raw_feat /
    # deep_feat stand in for their outputs.
    cfg = params["cfg"]
    s, t, h, w = raw_feat.shape
    chid_p, kp = cfg["chid_p"], cfg["kp"]

    # midas_out.expand(-1,3,-1,-1) -> global min/max normalization.  The 3 expanded
    # channels are identical, so the single channel is normalized (the channel
    # broadcast would happen when feeding self.deep_features).
    midas_norm = minmax_normalize(midas_out)

    # ConvLSTM towers: one timestep each, h = c = 0 (train=True / hs=None).
    # bf16 im2col, already row/lane padded; both towers fused into one pallas_call.
    m = s * h * w
    tm = min(tm_max, _round_up(m, 8))
    m_p = _round_up(m, tm)
    x_both = jnp.stack([_im2col_3x3_bf16(raw_feat, kp, m_p),
                        _im2col_3x3_bf16(deep_feat, kp, m_p)])     # (2, m_p, kp) bf16
    h_both = convlstm_zero_both(x_both, params["conv_w"], params["conv_b"],
                                chid_p, tm)                        # (2, m_p, chid_p)

    # (tower, S*h*w, chid_p) -> (tower, S, h*w*chid_p); the FC weight rows were
    # permuted at load time to match this NHWC flatten (padded channels zero on
    # both sides).  Padded rows of h_both are garbage and are sliced off here.
    f_p = h * w * chid_p
    raw_flat = h_both[0, :m].reshape(s, f_p)
    deep_flat = h_both[1, :m].reshape(s, f_p)
    x_fc = jnp.stack([raw_flat, deep_flat])                        # (2, S, F_p) bf16

    parts = fc_heads(x_fc, params["fc_w"])                         # (2, S, N_p) f32
    logits = parts[0] + parts[1] + params["fc_b"]                  # tiny JAX add

    n1, n2, n3 = cfg["n_wasd"], cfg["n_x"], cfg["n_y"]
    logit_wasd = logits[:, None, 0:n1]                 # combined.unsqueeze(1) -> (S,1,n)
    logit_x = logits[:, None, n1:n1 + n2]
    logit_y = logits[:, None, n1 + n2:n1 + n2 + n3]
    return logit_wasd, logit_x, logit_y, midas_norm


# ----------------------------------------------------------------------------
# Pure-JAX f32 reference (for correctness checking only)
# ----------------------------------------------------------------------------
def _reference_forward(raw_feat, deep_feat, midas_out, tp):
    s, t, h, w = raw_feat.shape

    def cell(x, w_t, b_t):
        comb = jnp.concatenate([x, jnp.zeros_like(x)], axis=1)       # cat([x, h=0])
        g = jax.lax.conv_general_dilated(
            comb, w_t, (1, 1), ((1, 1), (1, 1)),
            dimension_numbers=("NCHW", "OIHW", "NCHW"))
        g = g + b_t[None, :, None, None]
        i = jax.nn.sigmoid(g[:, 0 * t:1 * t])
        f = jax.nn.sigmoid(g[:, 1 * t:2 * t])
        o = jax.nn.sigmoid(g[:, 2 * t:3 * t])
        gg = jnp.tanh(g[:, 3 * t:4 * t])
        c = f * jnp.zeros_like(gg) + i * gg
        return o * jnp.tanh(c)

    raw_o = cell(raw_feat, tp["raw_w"], tp["raw_b"]).reshape(s, -1)
    deep_o = cell(deep_feat, tp["deep_w"], tp["deep_b"]).reshape(s, -1)
    comb = jnp.concatenate([raw_o, deep_o], axis=1)
    lw = comb @ tp["wasd_w"].T + tp["wasd_b"]
    lx = comb @ tp["x_w"].T + tp["x_b"]
    ly = comb @ tp["y_w"].T + tp["y_b"]
    mn, mx = midas_out.min(), midas_out.max()
    mnorm = 2 * (midas_out - mn) / (mx - mn) - 1
    return lw[:, None, :], lx[:, None, :], ly[:, None, :], mnorm


if __name__ == "__main__":
    key = jax.random.PRNGKey(0)
    # Small stand-in shapes (real model: T=112, h=12, w=25, ~256x256 midas map).
    S = 2             # seq_len
    T = 32            # feature channels (hidden dim of each ConvLSTM)
    h, w = 8, 10      # feature-map spatial
    Hin, Win = 32, 32
    n_wasd, n_x, n_y = 8, 16, 16
    F_all = 2 * T * h * w

    ks = jax.random.split(key, 12)
    raw_feat = jax.random.normal(ks[0], (S, T, h, w), jnp.float32)
    deep_feat = jax.random.normal(ks[1], (S, T, h, w), jnp.float32)
    midas_out = jax.random.normal(ks[2], (S, 1, Hin, Win), jnp.float32)

    torch_params = {
        # torch layouts: Conv2d weight (4T, 2T, 3, 3); Linear weight (n, F)
        "raw_w": 0.05 * jax.random.normal(ks[3], (4 * T, 2 * T, 3, 3), jnp.float32),
        "raw_b": 0.05 * jax.random.normal(ks[4], (4 * T,), jnp.float32),
        "deep_w": 0.05 * jax.random.normal(ks[5], (4 * T, 2 * T, 3, 3), jnp.float32),
        "deep_b": 0.05 * jax.random.normal(ks[6], (4 * T,), jnp.float32),
        "wasd_w": 0.02 * jax.random.normal(ks[7], (n_wasd, F_all), jnp.float32),
        "wasd_b": 0.02 * jax.random.normal(ks[8], (n_wasd,), jnp.float32),
        "x_w": 0.02 * jax.random.normal(ks[9], (n_x, F_all), jnp.float32),
        "x_b": 0.02 * jax.random.normal(ks[10], (n_x,), jnp.float32),
        "y_w": 0.02 * jax.random.normal(ks[11], (n_y, F_all), jnp.float32),
        "y_b": jnp.zeros((n_y,), jnp.float32),
    }
    params = prepare_params(torch_params, T, h, w)

    fwd = jax.jit(lambda r, d, m: dvnet3_forward(r, d, m, params))
    lw, lx, ly, mnorm = fwd(raw_feat, deep_feat, midas_out)
    jax.block_until_ready((lw, lx, ly, mnorm))

    assert lw.shape == (S, 1, n_wasd)
    assert lx.shape == (S, 1, n_x)
    assert ly.shape == (S, 1, n_y)
    assert mnorm.shape == (S, 1, Hin, Win)

    # correctness vs. a pure-JAX f32 reference (bf16 MXU path -> loose tolerance)
    rw, rx, ry, rm = _reference_forward(raw_feat, deep_feat, midas_out, torch_params)
    np.testing.assert_allclose(np.asarray(mnorm), np.asarray(rm), atol=1e-5, rtol=1e-5)
    np.testing.assert_allclose(np.asarray(lw), np.asarray(rw), atol=0.1, rtol=0.1)
    np.testing.assert_allclose(np.asarray(lx), np.asarray(rx), atol=0.1, rtol=0.1)
    np.testing.assert_allclose(np.asarray(ly), np.asarray(ry), atol=0.1, rtol=0.1)

    print("KERNEL_OK")
</pallas_src>

<mosaic_0001>
module attributes {stable_mosaic.version = 11 : i64} {
  func.func @_convlstm_zero_kernel(%arg0: i32, %arg1: i32, %arg2: memref<1x160x384xbf16, #tpu.memory_space<vmem>>, %arg3: memref<1x384x384xbf16, #tpu.memory_space<vmem>>, %arg4: memref<1x1x384xf32, #tpu.memory_space<vmem>>, %arg5: memref<1x160x128xbf16, #tpu.memory_space<vmem>>) attributes {dimension_semantics = [#tpu.dimension_semantics<parallel>, #tpu.dimension_semantics<parallel>], iteration_bounds = array<i64: 2, 1>, scalar_prefetch = 0 : i64, scratch_operands = 0 : i64, tpu.core_type = #tpu.core_type<tc>, window_params = [{transform_indices = @transform_0, window_bounds = array<i64: 1, 160, 384>}, {transform_indices = @transform_1, window_bounds = array<i64: 1, 384, 384>}, {transform_indices = @transform_2, window_bounds = array<i64: 1, 1, 384>}, {transform_indices = @transform_3, window_bounds = array<i64: 1, 160, 128>}]} {
    %c0 = arith.constant 0 : index
    %c0_0 = arith.constant 0 : index
    %c0_1 = arith.constant 0 : index
    %0 = vector.load %arg2[%c0, %c0_0, %c0_1] : memref<1x160x384xbf16, #tpu.memory_space<vmem>>, vector<1x160x384xbf16>
    %1 = vector.shape_cast %0 : vector<1x160x384xbf16> to vector<160x384xbf16>
    %c0_2 = arith.constant 0 : index
    %c0_3 = arith.constant 0 : index
    %c256 = arith.constant 256 : index
    %2 = vector.load %arg3[%c0_2, %c0_3, %c256] : memref<1x384x384xbf16, #tpu.memory_space<vmem>>, vector<1x384x128xbf16>
    %3 = vector.shape_cast %2 : vector<1x384x128xbf16> to vector<384x128xbf16>
    %cst = arith.constant dense<0.000000e+00> : vector<160x128xf32>
    %4 = tpu.matmul %1, %3, %cst {dimension_numbers = #tpu.dot_dimension_numbers<[1], [0], [0], [1], [0, 0, 1, 1], [], []>} : vector<160x384xbf16>, vector<384x128xbf16>, vector<160x128xf32> -> vector<160x128xf32>
    %c0_4 = arith.constant 0 : index
    %c0_5 = arith.constant 0 : index
    %c256_6 = arith.constant 256 : index
    %5 = vector.load %arg4[%c0_4, %c0_5, %c256_6] : memref<1x1x384xf32, #tpu.memory_space<vmem>>, vector<1x1x128xf32>
    %6 = vector.shape_cast %5 : vector<1x1x128xf32> to vector<1x128xf32>
    %7 = vector.broadcast %6 : vector<1x128xf32> to vector<160x128xf32>
    %8 = arith.addf %4, %7 : vector<160x128xf32>
    %9 = math.tanh %8 : vector<160x128xf32>
    %c0_7 = arith.constant 0 : index
    %c0_8 = arith.constant 0 : index
    %c0_9 = arith.constant 0 : index
    %10 = vector.load %arg3[%c0_7, %c0_8, %c0_9] : memref<1x384x384xbf16, #tpu.memory_space<vmem>>, vector<1x384x128xbf16>
    %11 = vector.shape_cast %10 : vector<1x384x128xbf16> to vector<384x128xbf16>
    %cst_10 = arith.constant dense<0.000000e+00> : vector<160x128xf32>
    %12 = tpu.matmul %1, %11, %cst_10 {dimension_numbers = #tpu.dot_dimension_numbers<[1], [0], [0], [1], [0, 0, 1, 1], [], []>} : vector<160x384xbf16>, vector<384x128xbf16>, vector<160x128xf32> -> vector<160x128xf32>
    %c0_11 = arith.constant 0 : index
    %c0_12 = arith.constant 0 : index
    %c0_13 = arith.constant 0 : index
    %13 = vector.load %arg4[%c0_11, %c0_12, %c0_13] : memref<1x1x384xf32, #tpu.memory_space<vmem>>, vector<1x1x128xf32>
    %14 = vector.shape_cast %13 : vector<1x1x128xf32> to vector<1x128xf32>
    %15 = vector.broadcast %14 : vector<1x128xf32> to vector<160x128xf32>
    %16 = arith.addf %12, %15 : vector<160x128xf32>
    %cst_14 = arith.constant 5.000000e-01 : f32
    %17 = vector.broadcast %cst_14 : f32 to vector<160x128xf32>
    %18 = arith.mulf %17, %16 : vector<160x128xf32>
    %19 = math.tanh %18 : vector<160x128xf32>
    %cst_15 = arith.constant 5.000000e-01 : f32
    %20 = vector.broadcast %cst_15 : f32 to vector<160x128xf32>
    %21 = arith.mulf %20, %19 : vector<160x128xf32>
    %cst_16 = arith.constant 5.000000e-01 : f32
    %22 = vector.broadcast %cst_16 : f32 to vector<160x128xf32>
    %23 = arith.addf %21, %22 : vector<160x128xf32>
    %24 = arith.mulf %23, %9 : vector<160x128xf32>
    %c0_17 = arith.constant 0 : index
    %c0_18 = arith.constant 0 : index
    %c128 = arith.constant 128 : index
    %25 = vector.load %arg3[%c0_17, %c0_18, %c128] : memref<1x384x384xbf16, #tpu.memory_space<vmem>>, vector<1x384x128xbf16>
    %26 = vector.shape_cast %25 : vector<1x384x128xbf16> to vector<384x128xbf16>
    %cst_19 = arith.constant dense<0.000000e+00> : vector<160x128xf32>
    %27 = tpu.matmul %1, %26, %cst_19 {dimension_numbers = #tpu.dot_dimension_numbers<[1], [0], [0], [1], [0, 0, 1, 1], [], []>} : vector<160x384xbf16>, vector<384x128xbf16>, vector<160x128xf32> -> vector<160x128xf32>
    %c0_20 = arith.constant 0 : index
    %c0_21 = arith.constant 0 : index
    %c128_22 = arith.constant 128 : index
    %28 = vector.load %arg4[%c0_20, %c0_21, %c128_22] : memref<1x1x384xf32, #tpu.memory_space<vmem>>, vector<1x1x128xf32>
    %29 = vector.shape_cast %28 : vector<1x1x128xf32> to vector<1x128xf32>
    %30 = vector.broadcast %29 : vector<1x128xf32> to vector<160x128xf32>
    %31 = arith.addf %27, %30 : vector<160x128xf32>
    %cst_23 = arith.constant 5.000000e-01 : f32
    %32 = vector.broadcast %cst_23 : f32 to vector<160x128xf32>
    %33 = arith.mulf %32, %31 : vector<160x128xf32>
    %34 = math.tanh %33 : vector<160x128xf32>
    %cst_24 = arith.constant 5.000000e-01 : f32
    %35 = vector.broadcast %cst_24 : f32 to vector<160x128xf32>
    %36 = arith.mulf %35, %34 : vector<160x128xf32>
    %cst_25 = arith.constant 5.000000e-01 : f32
    %37 = vector.broadcast %cst_25 : f32 to vector<160x128xf32>
    %38 = arith.addf %36, %37 : vector<160x128xf32>
    %39 = math.tanh %24 : vector<160x128xf32>
    %40 = arith.mulf %38, %39 : vector<160x128xf32>
    %41 = arith.truncf %40 : vector<160x128xf32> to vector<160x128xbf16>
    %c0_26 = arith.constant 0 : index
    %c0_27 = arith.constant 0 : index
    %c0_28 = arith.constant 0 : index
    %42 = vector.load %arg5[%c0_26, %c0_27, %c0_28] : memref<1x160x128xbf16, #tpu.memory_space<vmem>>, vector<1x160x128xbf16>
    %43 = vector.shape_cast %42 : vector<1x160x128xbf16> to vector<160x128xbf16>
    %44 = vector.shape_cast %41 : vector<160x128xbf16> to vector<1x160x128xbf16>
    tpu.vector_store %arg5[%c0_26, %c0_27, %c0_28], %44 {strides = array<i32>} : memref<1x160x128xbf16, #tpu.memory_space<vmem>>, vector<1x160x128xbf16>,
    return
  }
  func.func @transform_0(%arg0: i32, %arg1: i32) -> (i32, i32, i32) {
    %c0_i32 = arith.constant 0 : i32
    %c0_i32_0 = arith.constant 0 : i32
    return %arg0, %arg1, %c0_i32 : i32, i32, i32
  }
  func.func @transform_1(%arg0: i32, %arg1: i32) -> (i32, i32, i32) {
    %c0_i32 = arith.constant 0 : i32
    %c0_i32_0 = arith.constant 0 : i32
    %c0_i32_1 = arith.constant 0 : i32
    return %arg0, %c0_i32, %c0_i32_0 : i32, i32, i32
  }
  func.func @transform_2(%arg0: i32, %arg1: i32) -> (i32, i32, i32) {
    %c0_i32 = arith.constant 0 : i32
    %c0_i32_0 = arith.constant 0 : i32
    %c0_i32_1 = arith.constant 0 : i32
    return %arg0, %c0_i32, %c0_i32_0 : i32, i32, i32
  }
  func.func @transform_3(%arg0: i32, %arg1: i32) -> (i32, i32, i32) {
    %c0_i32 = arith.constant 0 : i32
    %c0_i32_0 = arith.constant 0 : i32
    return %arg0, %arg1, %c0_i32 : i32, i32, i32
  }
}

module attributes {stable_mosaic.version = 11 : i64} {
  func.func @_fc_heads_kernel(%arg0: i32, %arg1: i32, %arg2: memref<1x2x10240xbf16, #tpu.memory_space<vmem>>, %arg3: memref<1x10240x128xbf16, #tpu.memory_space<vmem>>, %arg4: memref<1x2x128xf32, #tpu.memory_space<vmem>>) attributes {dimension_semantics = [#tpu.dimension_semantics<parallel>, #tpu.dimension_semantics<arbitrary>], iteration_bounds = array<i64: 2, 1>, scalar_prefetch = 0 : i64, scratch_operands = 0 : i64, tpu.core_type = #tpu.core_type<tc>, window_params = [{transform_indices = @transform_0, window_bounds = array<i64: 1, 2, 10240>}, {transform_indices = @transform_1, window_bounds = array<i64: 1, 10240, 128>}, {transform_indices = @transform_2, window_bounds = array<i64: 1, 2, 128>}]} {
    %c0_i32 = arith.constant 0 : i32
    %0 = arith.cmpi eq, %arg1, %c0_i32 : i32
    %1 = arith.extui %0 : i1 to i32
    %c0_i32_0 = arith.constant 0 : i32
    %2 = arith.cmpi ne, %1, %c0_i32_0 : i32
    scf.if %2 {
      %cst_12 = arith.constant 0.000000e+00 : f32
      %14 = vector.broadcast %cst_12 : f32 to vector<1x2x128xf32>
      %c0_13 = arith.constant 0 : index
      %c0_14 = arith.constant 0 : index
      %c0_15 = arith.constant 0 : index
      %15 = vector.load %arg4[%c0_13, %c0_14, %c0_15] : memref<1x2x128xf32, #tpu.memory_space<vmem>>, vector<1x2x128xf32>
      tpu.vector_store %arg4[%c0_13, %c0_14, %c0_15], %14 {strides = array<i32>} : memref<1x2x128xf32, #tpu.memory_space<vmem>>, vector<1x2x128xf32>,
    } else {
    }
    %c0 = arith.constant 0 : index
    %c0_1 = arith.constant 0 : index
    %c0_2 = arith.constant 0 : index
    %3 = vector.load %arg4[%c0, %c0_1, %c0_2] : memref<1x2x128xf32, #tpu.memory_space<vmem>>, vector<1x2x128xf32>
    %4 = vector.shape_cast %3 : vector<1x2x128xf32> to vector<2x128xf32>
    %c0_3 = arith.constant 0 : index
    %c0_4 = arith.constant 0 : index
    %c0_5 = arith.constant 0 : index
    %5 = vector.load %arg2[%c0_3, %c0_4, %c0_5] : memref<1x2x10240xbf16, #tpu.memory_space<vmem>>, vector<1x2x10240xbf16>
    %6 = vector.shape_cast %5 : vector<1x2x10240xbf16> to vector<2x10240xbf16>
    %c0_6 = arith.constant 0 : index
    %c0_7 = arith.constant 0 : index
    %c0_8 = arith.constant 0 : index
    %7 = vector.load %arg3[%c0_6, %c0_7, %c0_8] : memref<1x10240x128xbf16, #tpu.memory_space<vmem>>, vector<1x10240x128xbf16>
    %8 = vector.shape_cast %7 : vector<1x10240x128xbf16> to vector<10240x128xbf16>
    %cst = arith.constant dense<0.000000e+00> : vector<2x128xf32>
    %9 = tpu.matmul %6, %8, %cst {dimension_numbers = #tpu.dot_dimension_numbers<[1], [0], [0], [1], [0, 0, 1, 1], [], []>} : vector<2x10240xbf16>, vector<10240x128xbf16>, vector<2x128xf32> -> vector<2x128xf32>
    %10 = arith.addf %4, %9 : vector<2x128xf32>
    %c0_9 = arith.constant 0 : index
    %c0_10 = arith.constant 0 : index
    %c0_11 = arith.constant 0 : index
    %11 = vector.load %arg4[%c0_9, %c0_10, %c0_11] : memref<1x2x128xf32, #tpu.memory_space<vmem>>, vector<1x2x128xf32>
    %12 = vector.shape_cast %11 : vector<1x2x128xf32> to vector<2x128xf32>
    %13 = vector.shape_cast %10 : vector<2x128xf32> to vector<1x2x128xf32>
    tpu.vector_store %arg4[%c0_9, %c0_10, %c0_11], %13 {strides = array<i32>} : memref<1x2x128xf32, #tpu.memory_space<vmem>>, vector<1x2x128xf32>,
    return
  }
  func.func @transform_0(%arg0: i32, %arg1: i32) -> (i32, i32, i32) {
    %c0_i32 = arith.constant 0 : i32
    %c0_i32_0 = arith.constant 0 : i32
    return %arg0, %c0_i32, %arg1 : i32, i32, i32
  }
  func.func @transform_1(%arg0: i32, %arg1: i32) -> (i32, i32, i32) {
    %c0_i32 = arith.constant 0 : i32
    %c0_i32_0 = arith.constant 0 : i32
    return %arg0, %arg1, %c0_i32 : i32, i32, i32
  }
  func.func @transform_2(%arg0: i32, %arg1: i32) -> (i32, i32, i32) {
    %c0_i32 = arith.constant 0 : i32
    %c0_i32_0 = arith.constant 0 : i32
    %c0_i32_1 = arith.constant 0 : i32
    return %arg0, %c0_i32, %c0_i32_0 : i32, i32, i32
  }
}

module attributes {stable_mosaic.version = 11 : i64} {
  func.func @_minmax_partial_kernel(%arg0: i32, %arg1: i32, %arg2: memref<1x32x32xf32, #tpu.memory_space<vmem>>, %arg3: memref<1x8x128xf32, #tpu.memory_space<vmem>>, %arg4: memref<1x8x128xf32, #tpu.memory_space<vmem>>) attributes {dimension_semantics = [#tpu.dimension_semantics<parallel>, #tpu.dimension_semantics<parallel>], iteration_bounds = array<i64: 2, 1>, scalar_prefetch = 0 : i64, scratch_operands = 0 : i64, tpu.core_type = #tpu.core_type<tc>, window_params = [{transform_indices = @transform_0, window_bounds = array<i64: 1, 32, 32>}, {transform_indices = @transform_1, window_bounds = array<i64: 1, 8, 128>}, {transform_indices = @transform_2, window_bounds = array<i64: 1, 8, 128>}]} {
    %c0 = arith.constant 0 : index
    %c0_0 = arith.constant 0 : index
    %c0_1 = arith.constant 0 : index
    %0 = vector.load %arg2[%c0, %c0_0, %c0_1] : memref<1x32x32xf32, #tpu.memory_space<vmem>>, vector<1x32x32xf32>
    %1 = vector.shape_cast %0 : vector<1x32x32xf32> to vector<1x1x32x32xf32>
    %cst = arith.constant dense<0x7F800000> : vector<1xf32>
    %2 = vector.multi_reduction <minimumf>, %1, %cst [1, 2, 3] : vector<1x1x32x32xf32> to vector<1xf32>
    %3 = vector.shape_cast %2 : vector<1xf32> to vector<1x1x1x1xf32>
    %4 = vector.extract %3[0, 0, 0, 0] : f32 from vector<1x1x1x1xf32>
    %5 = vector.broadcast %4 : f32 to vector<1x8x128xf32>
    %c0_2 = arith.constant 0 : index
    %c0_3 = arith.constant 0 : index
    %c0_4 = arith.constant 0 : index
    %6 = vector.load %arg3[%c0_2, %c0_3, %c0_4] : memref<1x8x128xf32, #tpu.memory_space<vmem>>, vector<1x8x128xf32>
    tpu.vector_store %arg3[%c0_2, %c0_3, %c0_4], %5 {strides = array<i32>} : memref<1x8x128xf32, #tpu.memory_space<vmem>>, vector<1x8x128xf32>,
    %7 = vector.shape_cast %0 : vector<1x32x32xf32> to vector<1x1x32x32xf32>
    %cst_5 = arith.constant dense<0xFF800000> : vector<1xf32>
    %8 = vector.multi_reduction <maximumf>, %7, %cst_5 [1, 2, 3] : vector<1x1x32x32xf32> to vector<1xf32>
    %9 = vector.shape_cast %8 : vector<1xf32> to vector<1x1x1x1xf32>
    %10 = vector.extract %9[0, 0, 0, 0] : f32 from vector<1x1x1x1xf32>
    %11 = vector.broadcast %10 : f32 to vector<1x8x128xf32>
    %c0_6 = arith.constant 0 : index
    %c0_7 = arith.constant 0 : index
    %c0_8 = arith.constant 0 : index
    %12 = vector.load %arg4[%c0_6, %c0_7, %c0_8] : memref<1x8x128xf32, #tpu.memory_space<vmem>>, vector<1x8x128xf32>
    tpu.vector_store %arg4[%c0_6, %c0_7, %c0_8], %11 {strides = array<i32>} : memref<1x8x128xf32, #tpu.memory_space<vmem>>, vector<1x8x128xf32>,
    return
  }
  func.func @transform_0(%arg0: i32, %arg1: i32) -> (i32, i32, i32) {
    %c0_i32 = arith.constant 0 : i32
    %c0_i32_0 = arith.constant 0 : i32
    return %arg0, %arg1, %c0_i32 : i32, i32, i32
  }
  func.func @transform_1(%arg0: i32, %arg1: i32) -> (i32, i32, i32) {
    %c0_i32 = arith.constant 0 : i32
    %c0_i32_0 = arith.constant 0 : i32
    return %arg0, %arg1, %c0_i32 : i32, i32, i32
  }
  func.func @transform_2(%arg0: i32, %arg1: i32) -> (i32, i32, i32) {
    %c0_i32 = arith.constant 0 : i32
    %c0_i32_0 = arith.constant 0 : i32
    return %arg0, %arg1, %c0_i32 : i32, i32, i32
  }
}

module attributes {stable_mosaic.version = 11 : i64} {
  func.func @_minmax_apply_kernel(%arg0: i32, %arg1: i32, %arg2: memref<2xf32, #tpu.memory_space<smem>>, %arg3: memref<1x32x32xf32, #tpu.memory_space<vmem>>, %arg4: memref<1x32x32xf32, #tpu.memory_space<vmem>>) attributes {dimension_semantics = [#tpu.dimension_semantics<parallel>, #tpu.dimension_semantics<parallel>], iteration_bounds = array<i64: 2, 1>, scalar_prefetch = 0 : i64, scratch_operands = 0 : i64, tpu.core_type = #tpu.core_type<tc>, window_params = [{transform_indices = @transform_0, window_bounds = array<i64: 2>}, {transform_indices = @transform_1, window_bounds = array<i64: 1, 32, 32>}, {transform_indices = @transform_2, window_bounds = array<i64: 1, 32, 32>}]} {
    %c0 = arith.constant 0 : index
    %0 = memref.load %arg2[%c0] : memref<2xf32, #tpu.memory_space<smem>>
    %c1 = arith.constant 1 : index
    %1 = memref.load %arg2[%c1] : memref<2xf32, #tpu.memory_space<smem>>
    %c0_0 = arith.constant 0 : index
    %c0_1 = arith.constant 0 : index
    %c0_2 = arith.constant 0 : index
    %2 = vector.load %arg3[%c0_0, %c0_1, %c0_2] : memref<1x32x32xf32, #tpu.memory_space<vmem>>, vector<1x32x32xf32>
    %3 = vector.broadcast %0 : f32 to vector<1x32x32xf32>
    %4 = arith.subf %2, %3 : vector<1x32x32xf32>
    %5 = vector.broadcast %1 : f32 to vector<1x32x32xf32>
    %6 = arith.mulf %4, %5 : vector<1x32x32xf32>
    %cst = arith.constant 1.000000e+00 : f32
    %7 = vector.broadcast %cst : f32 to vector<1x32x32xf32>
    %8 = arith.subf %6, %7 : vector<1x32x32xf32>
    %c0_3 = arith.constant 0 : index
    %c0_4 = arith.constant 0 : index
    %c0_5 = arith.constant 0 : index
    %9 = vector.load %arg4[%c0_3, %c0_4, %c0_5] : memref<1x32x32xf32, #tpu.memory_space<vmem>>, vector<1x32x32xf32>
    tpu.vector_store %arg4[%c0_3, %c0_4, %c0_5], %8 {strides = array<i32>} : memref<1x32x32xf32, #tpu.memory_space<vmem>>, vector<1x32x32xf32>,
    return
  }
  func.func @transform_0(%arg0: i32, %arg1: i32) -> i32 {
    %c0_i32 = arith.constant 0 : i32
    %c0_i32_0 = arith.constant 0 : i32
    return %c0_i32 : i32
  }
  func.func @transform_1(%arg0: i32, %arg1: i32) -> (i32, i32, i32) {
    %c0_i32 = arith.constant 0 : i32
    %c0_i32_0 = arith.constant 0 : i32
    return %arg0, %arg1, %c0_i32 : i32, i32, i32
  }
  func.func @transform_2(%arg0: i32, %arg1: i32) -> (i32, i32, i32) {
    %c0_i32 = arith.constant 0 : i32
    %c0_i32_0 = arith.constant 0 : i32
    return %arg0, %arg1, %c0_i32 : i32, i32, i32
  }
}

</mosaic_0001>

<bundles_post_ra>
// kernel: squeeze.4
= control target key start
LH: loop header
LB: loop body
LE: loop exit
PB: predicated region body
PF: predicated region fallthrough
CT: control target
= control target key end

     0   :  { %v1324_v36 = vmov 0.0   ;;  %s1685_s0 = inlined_call_operand.vmem [shape: bf16[1,160,128], index: 0, kind: input, shape index: {}]   ;;  %s1686_s1 = inlined_call_operand.vmem [shape: bf16[1,2,10240], index: 1, kind: output, shape index: {}]  }
   0x1   :  { %v1314_v0 = vld [vmem:[%s1685_s0 + $0x48] sm:$0xff]   ;;  %v1315_v1 = vld [vmem:[%s1685_s0 + $0x40] sm:$0xff]   ;;  %v1316_v2 = vld [vmem:[%s1685_s0 + $0x38] sm:$0xff]  }
   0x2   :  { %v1276_v3 = vunpack.c.l.bf16 %v1314_v0  ;;  %v1277_v4 = vunpack.c.h.bf16 %v1314_v0  ;;  %v1280_v5 = vunpack.c.l.bf16 %v1315_v1  ;;  %v1281_v6 = vunpack.c.h.bf16 %v1315_v1  ;;  %v1317_v7 = vld [vmem:[%s1685_s0 + $0x30] sm:$0xff]   ;;  %v1318_v8 = vld [vmem:[%s1685_s0 + $0x28] sm:$0xff]   ;;  %v1319_v9 = vld [vmem:[%s1685_s0 + $0x20] sm:$0xff]  }
   0x3   :  { %v1284_v10 = vunpack.c.l.bf16 %v1316_v2  ;;  %v1285_v11 = vunpack.c.h.bf16 %v1316_v2  ;;  %v1288_v12 = vunpack.c.l.bf16 %v1317_v7  ;;  %v1289_v13 = vunpack.c.h.bf16 %v1317_v7  ;;  %v1320_v14 = vld [vmem:[%s1685_s0 + $0x18] sm:$0xff]   ;;  %v1321_v15 = vld [vmem:[%s1685_s0 + $0x10] sm:$0xff]   ;;  %v1322_v16 = vld [vmem:[%s1685_s0 + $0x8] sm:$0xff]  }
   0x4   :  { %v1292_v17 = vunpack.c.l.bf16 %v1318_v8  ;;  %v1293_v18 = vunpack.c.h.bf16 %v1318_v8  ;;  %v1296_v19 = vunpack.c.l.bf16 %v1319_v9  ;;  %v1297_v20 = vunpack.c.h.bf16 %v1319_v9  ;;  %v1311_v21 = vld [vmem:[%s1685_s0] sm:$0xff]   ;;  %418 = vst [vmem:[#allocation0 + $0x181] ss:$8 sm:$0xf] %v1280_v5  }
   0x5   :  { %420 = vst [vmem:[#allocation0 + $0x181] ss:$8 sm:$0xf0] %v1280_v5   ;;  %424 = vst [vmem:[#allocation0 + $0x1c1] ss:$8 sm:$0xf] %v1281_v6   ;;  %v1300_v22 = vunpack.c.l.bf16 %v1320_v14  ;;  %v1301_v23 = vunpack.c.h.bf16 %v1320_v14  ;;  %v1304_v24 = vunpack.c.l.bf16 %v1321_v15  ;;  %v1305_v25 = vunpack.c.h.bf16 %v1321_v15 }
   0x6   :  { %426 = vst [vmem:[#allocation0 + $0x1c1] ss:$8 sm:$0xf0] %v1281_v6   ;;  %430 = vst [vmem:[#allocation0 + $0x201] ss:$8 sm:$0xf] %v1276_v3   ;;  %v1308_v26 = vunpack.c.l.bf16 %v1322_v16  ;;  %v1309_v27 = vunpack.c.h.bf16 %v1322_v16  ;;  %v1312_v28 = vunpack.c.l.bf16 %v1311_v21  ;;  %v1313_v29 = vunpack.c.h.bf16 %v1311_v21 }
   0x7   :  { %432 = vst [vmem:[#allocation0 + $0x201] ss:$8 sm:$0xf0] %v1276_v3   ;;  %436 = vst [vmem:[#allocation0 + $0x241] ss:$8 sm:$0xf] %v1277_v4  }
   0x8   :  { %438 = vst [vmem:[#allocation0 + $0x241] ss:$8 sm:$0xf0] %v1277_v4   ;;  %394 = vst [vmem:[#allocation0 + $0x81] ss:$8 sm:$0xf] %v1288_v12  }
   0x9   :  { %396 = vst [vmem:[#allocation0 + $0x81] ss:$8 sm:$0xf0] %v1288_v12   ;;  %400 = vst [vmem:[#allocation0 + $0xc1] ss:$8 sm:$0xf] %v1289_v13  }
   0xa   :  { %402 = vst [vmem:[#allocation0 + $0xc1] ss:$8 sm:$0xf0] %v1289_v13   ;;  %406 = vst [vmem:[#allocation0 + $0x101] ss:$8 sm:$0xf] %v1284_v10  }
   0xb   :  { %408 = vst [vmem:[#allocation0 + $0x101] ss:$8 sm:$0xf0] %v1284_v10   ;;  %412 = vst [vmem:[#allocation0 + $0x141] ss:$8 sm:$0xf] %v1285_v11  }
   0xc   :  { %414 = vst [vmem:[#allocation0 + $0x141] ss:$8 sm:$0xf0] %v1285_v11   ;;  %370 = vst [vmem:[#allocation0 + $0x200] ss:$8 sm:$0xf] %v1296_v19  }
   0xd   :  { %372 = vst [vmem:[#allocation0 + $0x200] ss:$8 sm:$0xf0] %v1296_v19   ;;  %376 = vst [vmem:[#allocation0 + $0x240] ss:$8 sm:$0xf] %v1297_v20  }
   0xe   :  { %378 = vst [vmem:[#allocation0 + $0x240] ss:$8 sm:$0xf0] %v1297_v20   ;;  %382 = vst [vmem:[#allocation0 + $0x1] ss:$8 sm:$0xf] %v1292_v17  }
   0xf   :  { %384 = vst [vmem:[#allocation0 + $0x1] ss:$8 sm:$0xf0] %v1292_v17   ;;  %388 = vst [vmem:[#allocation0 + $0x41] ss:$8 sm:$0xf] %v1293_v18  }
  0x10   :  { %390 = vst [vmem:[#allocation0 + $0x41] ss:$8 sm:$0xf0] %v1293_v18   ;;  %346 = vst [vmem:[#allocation0 + $0x100] ss:$8 sm:$0xf] %v1304_v24  }
  0x11   :  { %348 = vst [vmem:[#allocation0 + $0x100] ss:$8 sm:$0xf0] %v1304_v24   ;;  %352 = vst [vmem:[#allocation0 + $0x140] ss:$8 sm:$0xf] %v1305_v25  }
  0x12   :  { %354 = vst [vmem:[#allocation0 + $0x140] ss:$8 sm:$0xf0] %v1305_v25   ;;  %358 = vst [vmem:[#allocation0 + $0x180] ss:$8 sm:$0xf] %v1300_v22  }
  0x13   :  { %360 = vst [vmem:[#allocation0 + $0x180] ss:$8 sm:$0xf0] %v1300_v22   ;;  %364 = vst [vmem:[#allocation0 + $0x1c0] ss:$8 sm:$0xf] %v1301_v23  }
  0x14   :  { %366 = vst [vmem:[#allocation0 + $0x1c0] ss:$8 sm:$0xf0] %v1301_v23   ;;  %323 = vst [vmem:[#allocation0] ss:$8 sm:$0xf] %v1312_v28  }
  0x15   :  { %324 = vst [vmem:[#allocation0] ss:$8 sm:$0xf0] %v1312_v28   ;;  %328 = vst [vmem:[#allocation0 + $0x40] ss:$8 sm:$0xf] %v1313_v29  }
  0x16   :  { %330 = vst [vmem:[#allocation0 + $0x40] ss:$8 sm:$0xf0] %v1313_v29   ;;  %334 = vst [vmem:[#allocation0 + $0x80] ss:$8 sm:$0xf] %v1308_v26  }
  0x17   :  { %336 = vst [vmem:[#allocation0 + $0x80] ss:$8 sm:$0xf0] %v1308_v26   ;;  %340 = vst [vmem:[#allocation0 + $0xc0] ss:$8 sm:$0xf] %v1309_v27  }
  0x18   :  { %342 = vst [vmem:[#allocation0 + $0xc0] ss:$8 sm:$0xf0] %v1309_v27   ;;  %v953_v30 = vld [vmem:[#allocation0 + $0x200] sm:$0x3] }
  0x19   :  { %v961_v31 = vld [vmem:[#allocation0 + $0x208] sm:$0x3]  ;;  %v969_v32 = vld [vmem:[#allocation0 + $0x210] sm:$0x3]  ;;  %v697_v33 = vld [vmem:[#allocation0 + $0x100] sm:$0x3]  ;;  %v954_v37 = vpack.c.bf16 %v1324_v36, %v953_v30 }
  0x1a   :  { %v705_v34 = vld [vmem:[#allocation0 + $0x108] sm:$0x3]  ;;  %v713_v35 = vld [vmem:[#allocation0 + $0x110] sm:$0x3]  ;;  %v962_v38 = vpack.c.bf16 %v1324_v36, %v961_v31  ;;  %v970_v39 = vpack.c.bf16 %v1324_v36, %v969_v32  ;;  %v698_v43 = vpack.c.bf16 %v1324_v36, %v697_v33 }
  0x1b   :  { %v444_v40 = vld [vmem:[#allocation0] sm:$0x3]  ;;  %v450_v41 = vld [vmem:[#allocation0 + $0x8] sm:$0x3]  ;;  %v457_v42 = vld [vmem:[#allocation0 + $0x10] sm:$0x3]  ;;  %v706_v44 = vpack.c.bf16 %v1324_v36, %v705_v34  ;;  %v714_v45 = vpack.c.bf16 %v1324_v36, %v713_v35 }
  0x1c   :  { %v445_v46 = vpack.c.bf16 %v1324_v36, %v444_v40  ;;  %v451_v47 = vpack.c.bf16 %v1324_v36, %v450_v41  ;;  %v458_v48 = vpack.c.bf16 %v1324_v36, %v457_v42  ;;  %v465_v49 = vld [vmem:[#allocation0 + $0x18] sm:$0x3]  ;;  %v473_v50 = vld [vmem:[#allocation0 + $0x20] sm:$0x3]  ;;  %v481_v51 = vld [vmem:[#allocation0 + $0x28] sm:$0x3] }
  0x1d   :  { %1258 = vst [vmem:[%s1686_s1 + $0x40] sm:$0x1] %v954_v37  ;;  %1259 = vst [vmem:[%s1686_s1 + $0x41] sm:$0x1] %v962_v38  ;;  %v466_v52 = vpack.c.bf16 %v1324_v36, %v465_v49  ;;  %v474_v53 = vpack.c.bf16 %v1324_v36, %v473_v50  ;;  %v482_v54 = vpack.c.bf16 %v1324_v36, %v481_v51  ;;  %v489_v55 = vld [vmem:[#allocation0 + $0x30] sm:$0x3] }
  0x1e   :  { %1260 = vst [vmem:[%s1686_s1 + $0x42] sm:$0x1] %v970_v39  ;;  %v497_v56 = vld [vmem:[#allocation0 + $0x38] sm:$0x3]  ;;  %v505_v57 = vld [vmem:[#allocation0 + $0x40] sm:$0x3]  ;;  %v490_v58 = vpack.c.bf16 %v1324_v36, %v489_v55 }
  0x1f   :  { %1226 = vst [vmem:[%s1686_s1 + $0x20] sm:$0x1] %v698_v43  ;;  %1227 = vst [vmem:[%s1686_s1 + $0x21] sm:$0x1] %v706_v44  ;;  %v498_v59 = vpack.c.bf16 %v1324_v36, %v497_v56  ;;  %v506_v60 = vpack.c.bf16 %v1324_v36, %v505_v57  ;;  %v513_v61 = vld [vmem:[#allocation0 + $0x48] sm:$0x3] }
  0x20   :  { %1228 = vst [vmem:[%s1686_s1 + $0x22] sm:$0x1] %v714_v45  ;;  %448 = vst [vmem:[%s1686_s1] sm:$0x1] %v445_v46  ;;  %v521_v62 = vld [vmem:[#allocation0 + $0x50] sm:$0x3]  ;;  %v514_v0 = vpack.c.bf16 %v1324_v36, %v513_v61 }
  0x21   :  { %1195 = vst [vmem:[%s1686_s1 + $0x1] sm:$0x1] %v451_v47  ;;  %1196 = vst [vmem:[%s1686_s1 + $0x2] sm:$0x1] %v458_v48  ;;  %v529_v63 = vld [vmem:[#allocation0 + $0x58] sm:$0x3]  ;;  %v522_v1 = vpack.c.bf16 %v1324_v36, %v521_v62 }
  0x22   :  { %1197 = vst [vmem:[%s1686_s1 + $0x3] sm:$0x1] %v466_v52  ;;  %1198 = vst [vmem:[%s1686_s1 + $0x4] sm:$0x1] %v474_v53  ;;  %v530_v2 = vpack.c.bf16 %v1324_v36, %v529_v63  ;;  %v537_v3 = vld [vmem:[#allocation0 + $0x60] sm:$0x3] }
  0x23   :  { %1199 = vst [vmem:[%s1686_s1 + $0x5] sm:$0x1] %v482_v54  ;;  %v545_v4 = vld [vmem:[#allocation0 + $0x68] sm:$0x3]  ;;  %v553_v5 = vld [vmem:[#allocation0 + $0x70] sm:$0x3]  ;;  %v538_v6 = vpack.c.bf16 %v1324_v36, %v537_v3 }
  0x24   :  { %1200 = vst [vmem:[%s1686_s1 + $0x6] sm:$0x1] %v490_v58  ;;  %1201 = vst [vmem:[%s1686_s1 + $0x7] sm:$0x1] %v498_v59  ;;  %v546_v7 = vpack.c.bf16 %v1324_v36, %v545_v4  ;;  %v554_v8 = vpack.c.bf16 %v1324_v36, %v553_v5  ;;  %v561_v9 = vld [vmem:[#allocation0 + $0x78] sm:$0x3] }
  0x25   :  { %1202 = vst [vmem:[%s1686_s1 + $0x8] sm:$0x1] %v506_v60  ;;  %v569_v10 = vld [vmem:[#allocation0 + $0x80] sm:$0x3]  ;;  %v577_v11 = vld [vmem:[#allocation0 + $0x88] sm:$0x3]  ;;  %v562_v12 = vpack.c.bf16 %v1324_v36, %v561_v9 }
  0x26   :  { %1203 = vst [vmem:[%s1686_s1 + $0x9] sm:$0x1] %v514_v0  ;;  %1204 = vst [vmem:[%s1686_s1 + $0xa] sm:$0x1] %v522_v1  ;;  %v570_v13 = vpack.c.bf16 %v1324_v36, %v569_v10  ;;  %v578_v14 = vpack.c.bf16 %v1324_v36, %v577_v11  ;;  %v585_v15 = vld [vmem:[#allocation0 + $0x90] sm:$0x3] }
  0x27   :  { %1205 = vst [vmem:[%s1686_s1 + $0xb] sm:$0x1] %v530_v2  ;;  %v593_v16 = vld [vmem:[#allocation0 + $0x98] sm:$0x3]  ;;  %v601_v17 = vld [vmem:[#allocation0 + $0xa0] sm:$0x3]  ;;  %v586_v18 = vpack.c.bf16 %v1324_v36, %v585_v15 }
  0x28   :  { %1206 = vst [vmem:[%s1686_s1 + $0xc] sm:$0x1] %v538_v6  ;;  %1207 = vst [vmem:[%s1686_s1 + $0xd] sm:$0x1] %v546_v7  ;;  %v594_v19 = vpack.c.bf16 %v1324_v36, %v593_v16  ;;  %v602_v20 = vpack.c.bf16 %v1324_v36, %v601_v17  ;;  %v609_v21 = vld [vmem:[#allocation0 + $0xa8] sm:$0x3] }
  0x29   :  { %1208 = vst [vmem:[%s1686_s1 + $0xe] sm:$0x1] %v554_v8  ;;  %v617_v22 = vld [vmem:[#allocation0 + $0xb0] sm:$0x3]  ;;  %v625_v23 = vld [vmem:[#allocation0 + $0xb8] sm:$0x3]  ;;  %v610_v24 = vpack.c.bf16 %v1324_v36, %v609_v21 }
  0x2a   :  { %1209 = vst [vmem:[%s1686_s1 + $0xf] sm:$0x1] %v562_v12  ;;  %1210 = vst [vmem:[%s1686_s1 + $0x10] sm:$0x1] %v570_v13  ;;  %v618_v25 = vpack.c.bf16 %v1324_v36, %v617_v22  ;;  %v626_v26 = vpack.c.bf16 %v1324_v36, %v625_v23  ;;  %v633_v27 = vld [vmem:[#allocation0 + $0xc0] sm:$0x3] }
  0x2b   :  { %1211 = vst [vmem:[%s1686_s1 + $0x11] sm:$0x1] %v578_v14  ;;  %v641_v28 = vld [vmem:[#allocation0 + $0xc8] sm:$0x3]  ;;  %v649_v29 = vld [vmem:[#allocation0 + $0xd0] sm:$0x3]  ;;  %v634_v30 = vpack.c.bf16 %v1324_v36, %v633_v27 }
  0x2c   :  { %1212 = vst [vmem:[%s1686_s1 + $0x12] sm:$0x1] %v586_v18  ;;  %1213 = vst [vmem:[%s1686_s1 + $0x13] sm:$0x1] %v594_v19  ;;  %v642_v31 = vpack.c.bf16 %v1324_v36, %v641_v28  ;;  %v650_v32 = vpack.c.bf16 %v1324_v36, %v649_v29  ;;  %v657_v33 = vld [vmem:[#allocation0 + $0xd8] sm:$0x3] }
  0x2d   :  { %1214 = vst [vmem:[%s1686_s1 + $0x14] sm:$0x1] %v602_v20  ;;  %v665_v34 = vld [vmem:[#allocation0 + $0xe0] sm:$0x3]  ;;  %v673_v35 = vld [vmem:[#allocation0 + $0xe8] sm:$0x3]  ;;  %v658_v37 = vpack.c.bf16 %v1324_v36, %v657_v33 }
  0x2e   :  { %1215 = vst [vmem:[%s1686_s1 + $0x15] sm:$0x1] %v610_v24  ;;  %1216 = vst [vmem:[%s1686_s1 + $0x16] sm:$0x1] %v618_v25  ;;  %v666_v38 = vpack.c.bf16 %v1324_v36, %v665_v34  ;;  %v674_v39 = vpack.c.bf16 %v1324_v36, %v673_v35  ;;  %v681_v40 = vld [vmem:[#allocation0 + $0xf0] sm:$0x3] }
  0x2f   :  { %1217 = vst [vmem:[%s1686_s1 + $0x17] sm:$0x1] %v626_v26  ;;  %v689_v41 = vld [vmem:[#allocation0 + $0xf8] sm:$0x3]  ;;  %1218 = vst [vmem:[%s1686_s1 + $0x18] sm:$0x1] %v634_v30  ;;  %v682_v43 = vpack.c.bf16 %v1324_v36, %v681_v40 }
  0x30   :  { %v721_v42 = vld [vmem:[#allocation0 + $0x118] sm:$0x3]  ;;  %1219 = vst [vmem:[%s1686_s1 + $0x19] sm:$0x1] %v642_v31  ;;  %1220 = vst [vmem:[%s1686_s1 + $0x1a] sm:$0x1] %v650_v32  ;;  %v690_v44 = vpack.c.bf16 %v1324_v36, %v689_v41 }
  0x31   :  { %v722_v45 = vpack.c.bf16 %v1324_v36, %v721_v42  ;;  %v729_v46 = vld [vmem:[#allocation0 + $0x120] sm:$0x3]  ;;  %v737_v47 = vld [vmem:[#allocation0 + $0x128] sm:$0x3]  ;;  %v745_v48 = vld [vmem:[#allocation0 + $0x130] sm:$0x3] }
  0x32   :  { %1221 = vst [vmem:[%s1686_s1 + $0x1b] sm:$0x1] %v658_v37  ;;  %1222 = vst [vmem:[%s1686_s1 + $0x1c] sm:$0x1] %v666_v38  ;;  %v730_v49 = vpack.c.bf16 %v1324_v36, %v729_v46  ;;  %v738_v50 = vpack.c.bf16 %v1324_v36, %v737_v47  ;;  %v746_v51 = vpack.c.bf16 %v1324_v36, %v745_v48  ;;  %v753_v52 = vld [vmem:[#allocation0 + $0x138] sm:$0x3] }
  0x33   :  { %1223 = vst [vmem:[%s1686_s1 + $0x1d] sm:$0x1] %v674_v39  ;;  %v761_v53 = vld [vmem:[#allocation0 + $0x140] sm:$0x3]  ;;  %v769_v54 = vld [vmem:[#allocation0 + $0x148] sm:$0x3]  ;;  %v754_v55 = vpack.c.bf16 %v1324_v36, %v753_v52 }
  0x34   :  { %1224 = vst [vmem:[%s1686_s1 + $0x1e] sm:$0x1] %v682_v43  ;;  %1225 = vst [vmem:[%s1686_s1 + $0x1f] sm:$0x1] %v690_v44  ;;  %v762_v56 = vpack.c.bf16 %v1324_v36, %v761_v53  ;;  %v770_v57 = vpack.c.bf16 %v1324_v36, %v769_v54  ;;  %v777_v58 = vld [vmem:[#allocation0 + $0x150] sm:$0x3] }
  0x35   :  { %1229 = vst [vmem:[%s1686_s1 + $0x23] sm:$0x1] %v722_v45  ;;  %v785_v59 = vld [vmem:[#allocation0 + $0x158] sm:$0x3]  ;;  %v793_v60 = vld [vmem:[#allocation0 + $0x160] sm:$0x3]  ;;  %v778_v61 = vpack.c.bf16 %v1324_v36, %v777_v58 }
  0x36   :  { %1230 = vst [vmem:[%s1686_s1 + $0x24] sm:$0x1] %v730_v49  ;;  %1231 = vst [vmem:[%s1686_s1 + $0x25] sm:$0x1] %v738_v50  ;;  %v786_v62 = vpack.c.bf16 %v1324_v36, %v785_v59  ;;  %v794_v63 = vpack.c.bf16 %v1324_v36, %v793_v60  ;;  %v801_v0 = vld [vmem:[#allocation0 + $0x168] sm:$0x3] }
  0x37   :  { %1232 = vst [vmem:[%s1686_s1 + $0x26] sm:$0x1] %v746_v51  ;;  %v809_v1 = vld [vmem:[#allocation0 + $0x170] sm:$0x3]  ;;  %v817_v2 = vld [vmem:[#allocation0 + $0x178] sm:$0x3]  ;;  %v802_v3 = vpack.c.bf16 %v1324_v36, %v801_v0 }
  0x38   :  { %1233 = vst [vmem:[%s1686_s1 + $0x27] sm:$0x1] %v754_v55  ;;  %1234 = vst [vmem:[%s1686_s1 + $0x28] sm:$0x1] %v762_v56  ;;  %v810_v4 = vpack.c.bf16 %v1324_v36, %v809_v1  ;;  %v818_v5 = vpack.c.bf16 %v1324_v36, %v817_v2  ;;  %v825_v6 = vld [vmem:[#allocation0 + $0x180] sm:$0x3] }
  0x39   :  { %1235 = vst [vmem:[%s1686_s1 + $0x29] sm:$0x1] %v770_v57  ;;  %v833_v7 = vld [vmem:[#allocation0 + $0x188] sm:$0x3]  ;;  %v841_v8 = vld [vmem:[#allocation0 + $0x190] sm:$0x3]  ;;  %v826_v9 = vpack.c.bf16 %v1324_v36, %v825_v6 }
  0x3a   :  { %1236 = vst [vmem:[%s1686_s1 + $0x2a] sm:$0x1] %v778_v61  ;;  %1237 = vst [vmem:[%s1686_s1 + $0x2b] sm:$0x1] %v786_v62  ;;  %v834_v10 = vpack.c.bf16 %v1324_v36, %v833_v7  ;;  %v842_v11 = vpack.c.bf16 %v1324_v36, %v841_v8  ;;  %v849_v12 = vld [vmem:[#allocation0 + $0x198] sm:$0x3] }
  0x3b   :  { %1238 = vst [vmem:[%s1686_s1 + $0x2c] sm:$0x1] %v794_v63  ;;  %v857_v13 = vld [vmem:[#allocation0 + $0x1a0] sm:$0x3]  ;;  %v865_v14 = vld [vmem:[#allocation0 + $0x1a8] sm:$0x3]  ;;  %v850_v15 = vpack.c.bf16 %v1324_v36, %v849_v12 }
  0x3c   :  { %1239 = vst [vmem:[%s1686_s1 + $0x2d] sm:$0x1] %v802_v3  ;;  %1240 = vst [vmem:[%s1686_s1 + $0x2e] sm:$0x1] %v810_v4  ;;  %v858_v16 = vpack.c.bf16 %v1324_v36, %v857_v13  ;;  %v866_v17 = vpack.c.bf16 %v1324_v36, %v865_v14  ;;  %v873_v18 = vld [vmem:[#allocation0 + $0x1b0] sm:$0x3] }
  0x3d   :  { %1241 = vst [vmem:[%s1686_s1 + $0x2f] sm:$0x1] %v818_v5  ;;  %v881_v19 = vld [vmem:[#allocation0 + $0x1b8] sm:$0x3]  ;;  %v889_v20 = vld [vmem:[#allocation0 + $0x1c0] sm:$0x3]  ;;  %v874_v21 = vpack.c.bf16 %v1324_v36, %v873_v18 }
  0x3e   :  { %1242 = vst [vmem:[%s1686_s1 + $0x30] sm:$0x1] %v826_v9  ;;  %1243 = vst [vmem:[%s1686_s1 + $0x31] sm:$0x1] %v834_v10  ;;  %v882_v22 = vpack.c.bf16 %v1324_v36, %v881_v19  ;;  %v890_v23 = vpack.c.bf16 %v1324_v36, %v889_v20  ;;  %v897_v24 = vld [vmem:[#allocation0 + $0x1c8] sm:$0x3] }
  0x3f   :  { %1244 = vst [vmem:[%s1686_s1 + $0x32] sm:$0x1] %v842_v11  ;;  %v905_v25 = vld [vmem:[#allocation0 + $0x1d0] sm:$0x3]  ;;  %v913_v26 = vld [vmem:[#allocation0 + $0x1d8] sm:$0x3]  ;;  %v898_v27 = vpack.c.bf16 %v1324_v36, %v897_v24 }
  0x40   :  { %1245 = vst [vmem:[%s1686_s1 + $0x33] sm:$0x1] %v850_v15  ;;  %1246 = vst [vmem:[%s1686_s1 + $0x34] sm:$0x1] %v858_v16  ;;  %v906_v28 = vpack.c.bf16 %v1324_v36, %v905_v25  ;;  %v914_v29 = vpack.c.bf16 %v1324_v36, %v913_v26  ;;  %v921_v30 = vld [vmem:[#allocation0 + $0x1e0] sm:$0x3] }
  0x41   :  { %1247 = vst [vmem:[%s1686_s1 + $0x35] sm:$0x1] %v866_v17  ;;  %v929_v31 = vld [vmem:[#allocation0 + $0x1e8] sm:$0x3]  ;;  %v937_v32 = vld [vmem:[#allocation0 + $0x1f0] sm:$0x3]  ;;  %v922_v33 = vpack.c.bf16 %v1324_v36, %v921_v30 }
  0x42   :  { %1248 = vst [vmem:[%s1686_s1 + $0x36] sm:$0x1] %v874_v21  ;;  %1249 = vst [vmem:[%s1686_s1 + $0x37] sm:$0x1] %v882_v22  ;;  %v930_v34 = vpack.c.bf16 %v1324_v36, %v929_v31  ;;  %v938_v35 = vpack.c.bf16 %v1324_v36, %v937_v32  ;;  %v945_v37 = vld [vmem:[#allocation0 + $0x1f8] sm:$0x3] }
  0x43   :  { %1250 = vst [vmem:[%s1686_s1 + $0x38] sm:$0x1] %v890_v23  ;;  %v977_v38 = vld [vmem:[#allocation0 + $0x218] sm:$0x3]  ;;  %v985_v39 = vld [vmem:[#allocation0 + $0x220] sm:$0x3]  ;;  %v946_v40 = vpack.c.bf16 %v1324_v36, %v945_v37 }
  0x44   :  { %1251 = vst [vmem:[%s1686_s1 + $0x39] sm:$0x1] %v898_v27  ;;  %1252 = vst [vmem:[%s1686_s1 + $0x3a] sm:$0x1] %v906_v28  ;;  %v978_v41 = vpack.c.bf16 %v1324_v36, %v977_v38  ;;  %v986_v42 = vpack.c.bf16 %v1324_v36, %v985_v39  ;;  %v993_v43 = vld [vmem:[#allocation0 + $0x228] sm:$0x3] }
  0x45   :  { %1253 = vst [vmem:[%s1686_s1 + $0x3b] sm:$0x1] %v914_v29  ;;  %v1001_v44 = vld [vmem:[#allocation0 + $0x230] sm:$0x3]  ;;  %v1009_v45 = vld [vmem:[#allocation0 + $0x238] sm:$0x3]  ;;  %v994_v46 = vpack.c.bf16 %v1324_v36, %v993_v43 }
  0x46   :  { %1254 = vst [vmem:[%s1686_s1 + $0x3c] sm:$0x1] %v922_v33  ;;  %1255 = vst [vmem:[%s1686_s1 + $0x3d] sm:$0x1] %v930_v34  ;;  %v1002_v47 = vpack.c.bf16 %v1324_v36, %v1001_v44  ;;  %v1010_v48 = vpack.c.bf16 %v1324_v36, %v1009_v45  ;;  %v1017_v49 = vld [vmem:[#allocation0 + $0x240] sm:$0x3] }
  0x47   :  { %1256 = vst [vmem:[%s1686_s1 + $0x3e] sm:$0x1] %v938_v35  ;;  %v1025_v50 = vld [vmem:[#allocation0 + $0x248] sm:$0x3]  ;;  %v1033_v51 = vld [vmem:[#allocation0 + $0x250] sm:$0x3]  ;;  %v1018_v52 = vpack.c.bf16 %v1324_v36, %v1017_v49 }
  0x48   :  { %1257 = vst [vmem:[%s1686_s1 + $0x3f] sm:$0x1] %v946_v40  ;;  %1261 = vst [vmem:[%s1686_s1 + $0x43] sm:$0x1] %v978_v41  ;;  %v1026_v53 = vpack.c.bf16 %v1324_v36, %v1025_v50  ;;  %v1034_v54 = vpack.c.bf16 %v1324_v36, %v1033_v51  ;;  %v1041_v55 = vld [vmem:[#allocation0 + $0x258] sm:$0x3] }
  0x49   :  { %1262 = vst [vmem:[%s1686_s1 + $0x44] sm:$0x1] %v986_v42  ;;  %v1049_v56 = vld [vmem:[#allocation0 + $0x260] sm:$0x3]  ;;  %v1057_v57 = vld [vmem:[#allocation0 + $0x268] sm:$0x3]  ;;  %v1042_v58 = vpack.c.bf16 %v1324_v36, %v1041_v55 }
  0x4a   :  { %1263 = vst [vmem:[%s1686_s1 + $0x45] sm:$0x1] %v994_v46  ;;  %1264 = vst [vmem:[%s1686_s1 + $0x46] sm:$0x1] %v1002_v47  ;;  %v1050_v59 = vpack.c.bf16 %v1324_v36, %v1049_v56  ;;  %v1058_v60 = vpack.c.bf16 %v1324_v36, %v1057_v57  ;;  %v1065_v61 = vld [vmem:[#allocation0 + $0x270] sm:$0x3] }
  0x4b   :  { %1265 = vst [vmem:[%s1686_s1 + $0x47] sm:$0x1] %v1010_v48  ;;  %v1073_v62 = vld [vmem:[#allocation0 + $0x278] sm:$0x3]  ;;  %1266 = vst [vmem:[%s1686_s1 + $0x48] sm:$0x1] %v1018_v52  ;;  %v1066_v63 = vpack.c.bf16 %v1324_v36, %v1065_v61 }
  0x4c   :  { %1267 = vst [vmem:[%s1686_s1 + $0x49] sm:$0x1] %v1026_v53  ;;  %1268 = vst [vmem:[%s1686_s1 + $0x4a] sm:$0x1] %v1034_v54  ;;  %v1074_v36 = vpack.c.bf16 %v1324_v36, %v1073_v62 }
  0x4d   :  { %1269 = vst [vmem:[%s1686_s1 + $0x4b] sm:$0x1] %v1042_v58  ;;  %1270 = vst [vmem:[%s1686_s1 + $0x4c] sm:$0x1] %v1050_v59 }
  0x4e   :  { %1271 = vst [vmem:[%s1686_s1 + $0x4d] sm:$0x1] %v1058_v60  ;;  %1272 = vst [vmem:[%s1686_s1 + $0x4e] sm:$0x1] %v1066_v63 }
  0x4f   :  { %1273 = vst [vmem:[%s1686_s1 + $0x4f] sm:$0x1] %v1074_v36 }

// kernel: _lambda_.4
= control target key start
LH: loop header
LB: loop body
LE: loop exit
PB: predicated region body
PF: predicated region fallthrough
CT: control target
= control target key end

     0   :  { %s435_s9 = smov 0   ;;  %s437_s10 = smov 0   ;;  %s475_s0 = inlined_call_operand.vmem [shape: f32[2,32,32], index: 0, kind: input, shape index: {}]   ;;  %s476_s1 = inlined_call_operand.vmem [shape: f32[2,8,128], index: 1, kind: output, shape index: {0}]   ;;  %s477_s2 = inlined_call_operand.vmem [shape: f32[2,8,128], index: 2, kind: output, shape index: {1}]  }
   0x1   :  { %s439_s11 = smov 0  }
   0x2 LB: > { %s25_s12 = sadd.s32 1, %s414_s10  ;;  %p360_p0 = scmp.ge.s32.totalorder %s418_s11, 1  ;;  %s418_s11 = sphi %s439_s11, %s13_s11   ;;  %s414_s10 = sphi %s437_s10, %s479_s10   ;;  %s410_s9 = sphi %s435_s9, %s478_s9  }
   0x3   : > { %p27_p1 = scmp.ge.s32.totalorder %s25_s12, 2  ;;  %p138_p2 = scmp.lt.s32.totalorder %s418_s11, 3 }
   0x5   : > { %s481_s12 = smov (%p27_p1, %s25_s12), 0  ;;  %p139_p3 = pnand %p360_p0, %p138_p2 }
   0x6   : > { %p174_p4 = scmp.lt.s32.totalorder (!%p139_p3), %s410_s9, 1 }
   0x7   : > { %142 = sbr.rel (%p139_p3) target bundleno = 228 (0xe4), region = 24 }
   0xc   : > { %s483_s9 = smov (!%p174_p4, %s410_s9), 1  ;;  %vm201_vm0 = vcmask 261120  }
   0xd   : > { %s367_s13 = sshll.u32 %s483_s9, 5  ;;  %s363_s17 = sshll.u32 %s483_s9, 3 }
   0xe   : > { %s181_s16 = scalar_lea.vmem %s475_s0, %s367_s13  ;;  %s189_s20 = scalar_lea.vmem %s476_s1, %s363_s17 }
   0xf   : > { %v197_v0 = vld [vmem:[%s181_s16] sm:$0xff]  ;;  %v198_v1 = vld [vmem:[%s181_s16 + $0x8] sm:$0xff]  ;;  %v199_v2 = vld [vmem:[%s181_s16 + $0x10] sm:$0xff]  ;;  %s196_s24 = scalar_lea.vmem %s477_s2, %s363_s17 }
  0x10   : > { %v200_v3 = vld [vmem:[%s181_s16 + $0x18] sm:$0xff]  ;;  %v202_v4 = vsel %vm201_vm0, %v197_v0, inf  ;;  %v203_v5 = vsel %vm201_vm0, %v198_v1, inf  ;;  %v204_v6 = vsel %vm201_vm0, %v199_v2, inf  ;;  %v220_v7 = vsel %vm201_vm0, %v197_v0, -inf }
  0x11   : > { %v205_v8 = vsel %vm201_vm0, %v200_v3, inf  ;;  %v206_v9 = vmin.f32 %v202_v4, %v203_v5  ;;  %v221_v10 = vsel %vm201_vm0, %v198_v1, -inf  ;;  %v222_v11 = vsel %vm201_vm0, %v199_v2, -inf }
  0x12   : > { %v207_v12 = vmin.f32 %v204_v6, %v205_v8  ;;  %v223_v13 = vsel %vm201_vm0, %v200_v3, -inf  ;;  %v224_v14 = vmax.f32 %v220_v7, %v221_v10 }
  0x13   : > { %v225_v15 = vmax.f32 %v222_v11, %v223_v13 }
  0x14   : > { %v208_v16 = vmin.f32 %v206_v9, %v207_v12 }
  0x15   : > { %v226_v17 = vmax.f32 %v224_v14, %v225_v15 }
  0x16   : > { %209 = vmin.xlane.f32.xlu0 %v208_v16 }
  0x1a   : > { %227 = vmax.xlane.f32.xlu0 %v226_v17 }
  0x9f   : > { %v210_v18 = vpop.xlane.xlu0 %209 }
  0xa0   : > { %v211_v19 = vrot.slane %v210_v18, 4 }
  0xa2   : > { %v212_v20 = vmin.f32 %v210_v18, %v211_v19 }
  0xa3   : > { %v228_v21 = vpop.xlane.xlu0 %227 }
  0xa4   : > { %v213_v22 = vrot.slane %v212_v20, 2  ;;  %v229_v23 = vrot.slane %v228_v21, 4 }
  0xa6   : > { %v230_v24 = vmax.f32 %v228_v21, %v229_v23  ;;  %v214_v25 = vmin.f32 %v212_v20, %v213_v22 }
  0xa8   : > { %v231_v26 = vrot.slane %v230_v24, 2  ;;  %v215_v27 = vrot.slane %v214_v25, 1 }
  0xaa   : > { %v232_v28 = vmax.f32 %v230_v24, %v231_v26  ;;  %v216_v29 = vmin.f32 %v214_v25, %v215_v27 }
  0xac   : > { %368 = vpush %v216_v29  ;;  %v233_v30 = vrot.slane %v232_v28, 1 }
  0xae   : > { %v234_v31 = vmax.f32 %v232_v28, %v233_v30 }
  0xb0   : > { %370 = vpush %v234_v31 }
  0xdd   : > { %s369_s21 = spop %368 }
  0xde   : > { %v218_v32 = vstv %s369_s21 }
  0xdf   : > { %219 = vst [vmem:[%s189_s20] sm:$0xff] %v218_v32 }
  0xe1   : > { %s371_s25 = spop %370 }
  0xe2   : > { %v236_v33 = vstv %s371_s25 }
  0xe3   : > { %237 = vst [vmem:[%s196_s24] sm:$0xff] %v236_v33 }
  0xe4 PF: > { %s13_s11 = sadd.s32 1, %s418_s11   ;;  %s478_s9 = smov %s414_s10 }
  0xe5   : > { %p10_p5 = scmp.ge.s32.totalorder %s13_s11, 4   ;;  %s479_s10 = smov %s481_s12 }
  0xe7   :  { %12 = sbr.rel (!%p10_p5) target bundleno = 2 (0x2), region = 66 }

// kernel: _lambda_.6
= control target key start
LH: loop header
LB: loop body
LE: loop exit
PB: predicated region body
PF: predicated region fallthrough
CT: control target
= control target key end

     0   :  { %8 = vsyncpa [#allocation3], 0  ;;  %s4184_s0 = inlined_call_operand.vmem [shape: bf16[2,160,384], index: 0, kind: input, shape index: {}]   ;;  %s4185_s1 = inlined_call_operand.hbm [shape: bf16[2,384,384], index: 1, kind: input, shape index: {}]   ;;  %s4186_s2 = inlined_call_operand.hbm [shape: f32[2,1,384], index: 2, kind: input, shape index: {}]   ;;  %s4187_s3 = inlined_call_operand.vmem [shape: bf16[2,160,128], index: 3, kind: output, shape index: {}]  }
   0x1   :  { %10 = vsyncpa [#allocation3 + $0x1], 0 }
   0x2   :  { %11 = vsyncpa [#allocation5], 0 }
   0x3   :  { %13 = vsyncpa [#allocation5 + $0x1], 0  ;;  %s3342_s12 = smov 0   ;;  %s3344_s13 = smov 0  }
   0x4   :  { %s3346_s14 = smov 0   ;;  %s3348_s15 = smov 0  }
   0x5   :  { %s3350_s16 = smov 0   ;;  %s3352_s17 = smov 0  }
   0x6 LB: > { %s2243_s18 = sadd.s32 4294967295, %s3316_s17   ;;  %s31_s19 = sadd.s32 1, %s3312_s16  ;;  %s3316_s17 = sphi %s3352_s17, %s19_s17   ;;  %s3312_s16 = sphi %s3350_s16, %s4199_s16   ;;  %s3308_s15 = sphi %s3348_s15, %s4198_s15   ;;  %s3304_s14 = sphi %s3346_s14, %s4197_s14   ;;  %s3300_s13 = sphi %s3344_s13, %s4196_s13   ;;  %s3296_s12 = sphi %s3342_s12, %s4195_s12  }
   0x7   : > { %p33_p0 = scmp.ge.s32.totalorder %s31_s19, 2  ;;  %s66_s20 = sadd.s32 1, %s3304_s14 }
   0x8   : > { %p73_p1 = scmp.ne.s32.totalorder %s3304_s14, %s3300_s13  ;;  %p74_p2 = scmp.eq.s32.totalorder %s3316_s17, 0 }
   0x9   : > { %s4201_s19 = smov (%p33_p0, %s31_s19), 0  ;;  %p79_p4 = scmp.ne.s32.totalorder %s3300_s13, %s3296_s12 }
   0xa   : > { %p75_p3 = por %p74_p2, %p73_p1  ;;  %s63_s21 = ssub.s32 %s3312_s16, %s4201_s19 }
   0xb   : > { %p80_p5 = scmp.eq.s32.totalorder %s2243_s18, 0  ;;  %p64_p6 = scmp.eq.s32.totalorder %s63_s21, 0 }
   0xc   : > { %p2883_p8 = scmp.lt.s32.totalorder %s3316_s17, 2  ;;  %s3390_s24 = sand.u32 1, %s3304_s14  }
   0xd   : > { %p3381_p7 = por %p80_p5, %p79_p4  ;;  %s2865_s25 = smul.u32 9216, %s3312_s16 }
   0xe   : > { %s3387_s23 = scalar_select %p64_p6, %s3304_s14, %s66_s20  }
   0xf   : > { %s2864_s26 = smul.u32 576, %s3390_s24  ;;  %s181_s29 = scalar_lea.hbm %s4185_s1, %s2865_s25 }
  0x10   : > { %p3397_p9 = pnand %p2883_p8, %p75_p3  ;;  %s172_s6 = scalar_lea.sflag [#allocation3], %s3390_s24 }
  0x11   : > { %s175_s4 = scalar_lea.vmem [#allocation2], %s2864_s26  ;;  %s3318_s8 = smov [#allocation2]  }
  0x12   : > { %s182_s5 = sshll.u32 %s175_s4, 4  ;;  %p3208_p10 = pneg %p3397_p9  ;;  %s183_s5 = int_to_ptr.vmem [resolvable:$true] %s182_s5 }
  0x13   : > { %s3219_s7 = scalar_lea.vmem %s183_s5, 9216  ;;  %s3224_s9 = sshll.u32 %s3318_s8, 4  ;;  %s3225_s9 = int_to_ptr.vmem [resolvable:$false] %s3224_s9 }
  0x14   : > { %p3220_p11 = scmp.ne.s32.totalorder %s183_s5, %s3219_s7  ;;  %s3226_s10 = scalar_lea.vmem %s3225_s9, 18432 }
  0x15   : > { %p3227_p0 = scmp.lt.s32.totalorder %s183_s5, %s3225_s9  ;;  %p3228_p1 = scmp.lt.s32.totalorder %s3226_s10, %s3219_s7 }
  0x16   : > { %p3222_p12 = pnand %p3220_p11, %p3208_p10 }
  0x17   : > { %p3229_p2 = por %p3228_p1, %p3227_p0 }
  0x18   : > { %p3223_p13 = pneg %p3222_p12 }
  0x1a   : > { %p3230_p3 = pnand %p3229_p2, %p3223_p13 }
  0x1c   : > { %3233 = shalt.err (!%p3230_p3)
}
  0x1d   : > { %s3319_s11 = smov 192   ;;  %s3320_s12 = smov 12  }
  0x1e   : > { %2879 = dma.hbm_to_vmem [thread:$0]  (!%p3397_p9), %s181_s29, 9216, %s183_s5, %s172_s6, %s3319_s11, %s3319_s11, %s3320_s12  }
  0x1f   : > { %p2249_p4 = scmp.ge.s32.totalorder %s3316_s17, 1  ;;  %p209_p5 = scmp.lt.s32.totalorder %s3316_s17, 3 }
  0x20   : > { %s2866_s18 = smul.u32 3, %s3390_s24  ;;  %s193_s7 = scalar_lea.sflag [#allocation5], %s3390_s24 }
  0x21   : > { %p3412_p6 = pnand %p2249_p4, %p209_p5  ;;  %s2867_s21 = smul.u32 48, %s3312_s16 }
  0x22   : > { %s196_s28 = scalar_lea.vmem [#allocation4], %s2866_s18  ;;  %s3321_s29 = smov [#allocation4]  }
  0x23   : > { %s202_s27 = scalar_lea.hbm %s4186_s2, %s2867_s21  ;;  %s204_s4 = sshll.u32 %s196_s28, 4  ;;  %s205_s4 = int_to_ptr.vmem [resolvable:$true] %s204_s4 }
  0x24   : > { %s3247_s8 = scalar_lea.vmem %s205_s4, 48  ;;  %s3252_s5 = sshll.u32 %s3321_s29, 4  ;;  %s3253_s5 = int_to_ptr.vmem [resolvable:$false] %s3252_s5 }
  0x25   : > { %p3248_p8 = scmp.ne.s32.totalorder %s205_s4, %s3247_s8  ;;  %s3254_s6 = scalar_lea.vmem %s3253_s5, 96 }
  0x26   : > { %p3255_p13 = scmp.lt.s32.totalorder %s205_s4, %s3253_s5  ;;  %p3256_p0 = scmp.lt.s32.totalorder %s3254_s6, %s3247_s8 }
  0x27   : > { %p3250_p11 = pnand %p3248_p8, %p3208_p10 }
  0x28   : > { %p3257_p1 = por %p3256_p0, %p3255_p13 }
  0x29   : > { %p3251_p12 = pneg %p3250_p11 }
  0x2b   : > { %p3258_p2 = pnand %p3257_p1, %p3251_p12 }
  0x2d   : > { %3261 = shalt.err (!%p3258_p2)
}
  0x2e   : > { %2882 = dma.hbm_to_vmem [thread:$0]  (!%p3397_p9), %s202_s27, 48, %s205_s4, %s193_s7  }
  0x2f   : > { %213 = sbr.rel (%p3412_p6) target bundleno = 511 (0x1ff), region = 32 }
  0x34   : > { %s215_s24 = sand.u32 1, %s3300_s13  }
  0x35   : > { %s2868_s9 = smul.u32 576, %s215_s24  ;;  %s216_s10 = scalar_lea.sflag [#allocation3], %s215_s24 }
  0x37   : > { %s3429_s11 = scalar_lea.vmem [#allocation2], %s2868_s9 }
  0x38   : > { %3287 = dma.done.wait (%p3381_p7), %s216_s10, 9216  }
  0x39   : > { %3289 = vsyncadd (%p3381_p7), %s216_s10, 4294958080  ;;  %s2869_s12 = smul.u32 3, %s215_s24  ;;  %s225_s18 = scalar_lea.sflag [#allocation5], %s215_s24 }
  0x3b   : > { %s3435_s30 = scalar_lea.vmem [#allocation4], %s2869_s12 }
  0x3c   : > { %3291 = dma.done.wait (%p3381_p7), %s225_s18, 48  }
  0x3d   : > { %3293 = vsyncadd (%p3381_p7), %s225_s18, 4294967248  ;;  %p271_p9 = scmp.lt.s32.totalorder %s3308_s15, 1  ;;  %v2934_v0 = vld [vmem:[%s3429_s11 + $0x170] ss:$12 sps:$4 sm:$0xff]   ;;  %v2937_v3 = vld [vmem:[%s3429_s11 + $0x158] ss:$12 sps:$4 sm:$0xff]  }
  0x3e   : > { %v2935_v1 = vld [vmem:[%s3429_s11 + $0x230] ss:$12 sps:$4 sm:$0xff]   ;;  %2458 = vmatprep.subr.bf16.mxu0 %v2934_v0  ;;  %v2938_v4 = vld [vmem:[%s3429_s11 + $0x218] ss:$12 sps:$4 sm:$0xff]   ;;  %v2940_v6 = vld [vmem:[%s3429_s11 + $0x140] ss:$12 sps:$4 sm:$0xff]  }
  0x3f   : > { %s4203_s15 = smov (!%p271_p9, %s3308_s15), 1  ;;  %v2936_v2 = vld [vmem:[%s3429_s11 + $0xb0] ss:$12 sps:$4 sm:$0xff]   ;;  %2740 = vmatprep.subr.bf16.mxu1 %v2935_v1  ;;  %v2939_v5 = vld [vmem:[%s3429_s11 + $0x98] ss:$12 sps:$4 sm:$0xff]  }
  0x40   : > { %2459 = vmatpush3.bf16.msra.mxu0 %v2936_v2  ;;  %2741 = vmatpush3.bf16.msra.mxu1 %v2935_v1  ;;  %v2941_v7 = vld [vmem:[%s3429_s11 + $0x200] ss:$12 sps:$4 sm:$0xff]   ;;  %v2943_v9 = vld [vmem:[%s3429_s11 + $0x128] ss:$12 sps:$4 sm:$0xff]   ;;  %v2946_v12 = vld [vmem:[%s3429_s11 + $0x110] ss:$12 sps:$4 sm:$0xff]  }
  0x41   : > { %2460 = vmatprep.subr.bf16.mxu0 %v2937_v3  ;;  %2742 = vmatprep.subr.bf16.mxu1 %v2938_v4  ;;  %v2942_v8 = vld [vmem:[%s3429_s11 + $0x80] ss:$12 sps:$4 sm:$0xff]   ;;  %v2944_v10 = vld [vmem:[%s3429_s11 + $0x1e8] ss:$12 sps:$4 sm:$0xff]   ;;  %v2947_v13 = vld [vmem:[%s3429_s11 + $0x1d0] ss:$12 sps:$4 sm:$0xff]  }
  0x42   : > { %v2945_v11 = vld [vmem:[%s3429_s11 + $0x68] ss:$12 sps:$4 sm:$0xff]   ;;  %s2870_s22 = smul.u32 240, %s4203_s15  ;;  %v2948_v14 = vld [vmem:[%s3429_s11 + $0x50] ss:$12 sps:$4 sm:$0xff]  }
  0x43   : > { %v2949_v15 = vld [vmem:[%s3429_s11 + $0xf8] ss:$12 sps:$4 sm:$0xff]   ;;  %v2952_v18 = vld [vmem:[%s3429_s11 + $0xe0] ss:$12 sps:$4 sm:$0xff]   ;;  %v2955_v21 = vld [vmem:[%s3429_s11 + $0xc8] ss:$12 sps:$4 sm:$0xff]  }
  0x44   : > { %2461 = vmatpush3.bf16.msra.mxu0 %v2939_v5  ;;  %2743 = vmatpush3.bf16.msra.mxu1 %v2938_v4  ;;  %v2950_v16 = vld [vmem:[%s3429_s11 + $0x1b8] ss:$12 sps:$4 sm:$0xff]   ;;  %v2953_v19 = vld [vmem:[%s3429_s11 + $0x1a0] ss:$12 sps:$4 sm:$0xff]   ;;  %s3469_s25 = scalar_lea.vmem %s4184_s0, %s2870_s22  ;;  %v2956_v22 = vld [vmem:[%s3429_s11 + $0x188] ss:$12 sps:$4 sm:$0xff]  }
  0x45   : > { %2462 = vmatprep.subr.bf16.mxu0 %v2940_v6  ;;  %2744 = vmatprep.subr.bf16.mxu1 %v2941_v7  ;;  %v2951_v17 = vld [vmem:[%s3429_s11 + $0x38] ss:$12 sps:$4 sm:$0xff]   ;;  %v2954_v20 = vld [vmem:[%s3429_s11 + $0x20] ss:$12 sps:$4 sm:$0xff]   ;;  %v3478_v24 = vld [vmem:[%s3469_s25 + $0x8] ss:$12 sps:$4 sm:$0xff]  }
  0x46   : > { %v3475_v23 = vld [vmem:[%s3469_s25 + $0x4] ss:$12 sps:$4 sm:$0xff]   ;;  %v2957_v25 = vld [vmem:[%s3429_s11 + $0x8] ss:$12 sps:$4 sm:$0xff]   ;;  %2756 = vmatprep.mubr.bf16.mxu1 %v3478_v24  ;;  %v3488_v28 = vld [vmem:[%s3469_s25] ss:$12 sps:$4 sm:$0xff]  }
  0x47   : > { %723 = vmatprep.mubr.bf16.mxu0 %v3475_v23  ;;  %v3484_v26 = vld [vmem:[%s3429_s11 + $0x228] ss:$12 sps:$4 sm:$0xff]   ;;  %v3491_v29 = vld [vmem:[%s3469_s25 + $0x20] ss:$12 sps:$4 sm:$0xff]   ;;  %v3499_v32 = vld [vmem:[%s3469_s25 + $0x38] ss:$12 sps:$4 sm:$0xff]  }
  0x48   : > { %2463 = vmatpush3.bf16.msra.mxu0 %v2942_v8  ;;  %2745 = vmatpush3.bf16.msra.mxu1 %v2941_v7  ;;  %v2964_v27 = vld [vmem:[%s3429_s11 + $0x168] ss:$12 sps:$4 sm:$0xff]   ;;  %v2971_v33 = vld [vmem:[%s3429_s11 + $0x150] ss:$12 sps:$4 sm:$0xff]   ;;  %v3512_v36 = vld [vmem:[%s3469_s25 + $0x18] ss:$12 sps:$4 sm:$0xff]  }
  0x49   : > { %2464 = vmatprep.subr.bf16.mxu0 %v2943_v9  ;;  %2746 = vmatprep.subr.bf16.mxu1 %v2944_v10  ;;  %v2965_v30 = vld [vmem:[%s3429_s11 + $0xa8] ss:$12 sps:$4 sm:$0xff]   ;;  %v3505_v34 = vld [vmem:[%s3429_s11 + $0x210] ss:$12 sps:$4 sm:$0xff]   ;;  %v2977_v39 = vld [vmem:[%s3429_s11 + $0x138] ss:$12 sps:$4 sm:$0xff]  }
  0x4a   : > { %v3495_v31 = vld [vmem:[%s3469_s25 + $0x1c] ss:$12 sps:$4 sm:$0xff]   ;;  %v3519_v38 = vld [vmem:[%s3469_s25 + $0x34] ss:$12 sps:$4 sm:$0xff]   ;;  %v2980_v41 = vld [vmem:[%s3429_s11 + $0x78] ss:$12 sps:$4 sm:$0xff]  }
  0x4b   : > { %v2973_v35 = vld [vmem:[%s3429_s11 + $0x90] ss:$12 sps:$4 sm:$0xff]   ;;  %v3524_v40 = vld [vmem:[%s3469_s25 + $0x68] ss:$12 sps:$4 sm:$0xff]   ;;  %v2981_v42 = vld [vmem:[%s3429_s11 + $0x120] ss:$12 sps:$4 sm:$0xff]  }
  0x4c   : > { %2465 = vmatpush3.bf16.msra.mxu0 %v2945_v11  ;;  %2747 = vmatpush3.bf16.msra.mxu1 %v2944_v10  ;;  %v3515_v37 = vld [vmem:[%s3469_s25 + $0x50] ss:$12 sps:$4 sm:$0xff]   ;;  %v3531_v43 = vld [vmem:[%s3429_s11 + $0x1f8] ss:$12 sps:$4 sm:$0xff]   ;;  %v2983_v45 = vld [vmem:[%s3429_s11 + $0x60] ss:$12 sps:$4 sm:$0xff]  }
  0x4d   : > { %2466 = vmatprep.subr.bf16.mxu0 %v2946_v12  ;;  %2748 = vmatprep.subr.bf16.mxu1 %v2947_v13  ;;  %v3536_v44 = vld [vmem:[%s3469_s25 + $0x30] ss:$12 sps:$4 sm:$0xff]   ;;  %v3541_v46 = vld [vmem:[%s3469_s25 + $0x80] ss:$12 sps:$4 sm:$0xff]   ;;  %v3548_v48 = vld [vmem:[%s3469_s25 + $0x98] ss:$12 sps:$4 sm:$0xff]  }
  0x4e   : > { %v3545_v47 = vld [vmem:[%s3469_s25 + $0x4c] ss:$12 sps:$4 sm:$0xff]   ;;  %v2989_v49 = vld [vmem:[%s3429_s11 + $0x108] ss:$12 sps:$4 sm:$0xff]   ;;  %v2991_v51 = vld [vmem:[%s3429_s11 + $0xf0] ss:$12 sps:$4 sm:$0xff]  }
  0x4f   : > { %v2990_v50 = vld [vmem:[%s3429_s11 + $0x48] ss:$12 sps:$4 sm:$0xff]   ;;  %v3561_v53 = vld [vmem:[%s3429_s11 + $0x1e0] ss:$12 sps:$4 sm:$0xff]   ;;  %v2992_v54 = vld [vmem:[%s3429_s11 + $0x30] ss:$12 sps:$4 sm:$0xff]  }
  0x50   : > { %2467 = vmatpush3.bf16.msra.mxu0 %v2948_v14  ;;  %2749 = vmatpush3.bf16.msra.mxu1 %v2947_v13  ;;  %v3558_v52 = vld [vmem:[%s3469_s25 + $0x48] ss:$12 sps:$4 sm:$0xff]   ;;  %v3565_v55 = vld [vmem:[%s3469_s25 + $0xb0] ss:$12 sps:$4 sm:$0xff]   ;;  %v2999_v58 = vld [vmem:[%s3429_s11 + $0xd8] ss:$12 sps:$4 sm:$0xff]  }
  0x51   : > { %2468 = vmatprep.subr.bf16.mxu0 %v2949_v15  ;;  %2750 = vmatprep.subr.bf16.mxu1 %v2950_v16  ;;  %v3569_v56 = vld [vmem:[%s3469_s25 + $0x64] ss:$12 sps:$4 sm:$0xff]   ;;  %v3572_v57 = vld [vmem:[%s3469_s25 + $0xc8] ss:$12 sps:$4 sm:$0xff]   ;;  %v3001_v60 = vld [vmem:[%s3429_s11 + $0xc0] ss:$12 sps:$4 sm:$0xff]  }
  0x52   : > { %v3000_v59 = vld [vmem:[%s3429_s11 + $0x18] ss:$12 sps:$4 sm:$0xff]   ;;  %v3583_v61 = vld [vmem:[%s3469_s25 + $0x60] ss:$12 sps:$4 sm:$0xff]   ;;  %v3006_v63 = vld [vmem:[%s3429_s11 + $0x1c8] ss:$12 sps:$4 sm:$0xff]  }
  0x53   : > { %v3002_v62 = vld [vmem:[%s3429_s11] ss:$12 sps:$4 sm:$0xff]   ;;  %v3591_v1 = vld [vmem:[%s3469_s25 + $0x7c] ss:$12 sps:$4 sm:$0xff]   ;;  %v3014_v3 = vld [vmem:[%s3429_s11 + $0x198] ss:$12 sps:$4 sm:$0xff]  }
  0x54   : > { %2469 = vmatpush3.bf16.msra.mxu0 %v2951_v17  ;;  %2751 = vmatpush3.bf16.msra.mxu1 %v2950_v16  ;;  %v3588_v0 = vld [vmem:[%s3469_s25 + $0xe0] ss:$12 sps:$4 sm:$0xff]   ;;  %v3010_v2 = vld [vmem:[%s3429_s11 + $0x1b0] ss:$12 sps:$4 sm:$0xff]   ;;  %v3601_v4 = vld [vmem:[%s3469_s25 + $0x78] ss:$12 sps:$4 sm:$0xff]  }
  0x55   : > { %2470 = vmatprep.subr.bf16.mxu0 %v2952_v18  ;;  %2752 = vmatprep.subr.bf16.mxu1 %v2953_v19  ;;  %v3604_v5 = vld [vmem:[%s3469_s25 + $0x94] ss:$12 sps:$4 sm:$0xff]   ;;  %v3022_v7 = vld [vmem:[%s3429_s11 + $0x16c] ss:$12 sps:$4 sm:$0xff]   ;;  %v3615_v8 = vld [vmem:[%s3469_s25 + $0x90] ss:$12 sps:$4 sm:$0xff]  }
  0x56   : > { %v3018_v6 = vld [vmem:[%s3429_s11 + $0x180] ss:$12 sps:$4 sm:$0xff]   ;;  %v3629_v10 = vld [vmem:[%s3469_s25 + $0xa8] ss:$12 sps:$4 sm:$0xff]   ;;  %v3632_v11 = vld [vmem:[%s3469_s25 + $0xc4] ss:$12 sps:$4 sm:$0xff]  }
  0x57   : > { %v3618_v9 = vld [vmem:[%s3469_s25 + $0xac] ss:$12 sps:$4 sm:$0xff]   ;;  %v3643_v13 = vld [vmem:[%s3469_s25 + $0xdc] ss:$12 sps:$4 sm:$0xff]   ;;  %v3024_v17 = vld [vmem:[%s3429_s11 + $0x154] ss:$12 sps:$4 sm:$0xff]  }
  0x58   : > { %2471 = vmatpush3.bf16.msra.mxu0 %v2954_v20  ;;  %2753 = vmatpush3.bf16.msra.mxu1 %v2953_v19  ;;  %v3640_v12 = vld [vmem:[%s3469_s25 + $0xc0] ss:$12 sps:$4 sm:$0xff]   ;;  %v3651_v15 = vld [vmem:[%s3469_s25 + $0xd8] ss:$12 sps:$4 sm:$0xff]   ;;  %v3026_v19 = vld [vmem:[%s3429_s11 + $0x13c] ss:$12 sps:$4 sm:$0xff]  }
  0x59   : > { %2472 = vmatprep.subr.bf16.mxu0 %v2955_v21  ;;  %2754 = vmatprep.subr.bf16.mxu1 %v2956_v22  ;;  %v3038_v14 = vld [vmem:[%s3429_s11 + $0x22c] ss:$12 sps:$4 sm:$0xff]   ;;  %v3025_v18 = vld [vmem:[%s3429_s11 + $0x94] ss:$12 sps:$4 sm:$0xff]   ;;  %v3027_v20 = vld [vmem:[%s3429_s11 + $0x7c] ss:$12 sps:$4 sm:$0xff]  }
  0x5a   : > { %v3023_v16 = vld [vmem:[%s3429_s11 + $0xac] ss:$12 sps:$4 sm:$0xff]   ;;  %v3028_v21 = vld [vmem:[%s3429_s11 + $0x124] ss:$12 sps:$4 sm:$0xff]   ;;  %s2871_s26 = smul.u32 80, %s4203_s15 }
  0x5c   : > { %2473 = vmatpush3.bf16.msra.mxu0 %v2957_v25  ;;  %2755 = vmatpush3.bf16.msra.mxu1 %v2956_v22  ;;  %v3029_v22 = vld [vmem:[%s3429_s11 + $0x64] ss:$12 sps:$4 sm:$0xff]   ;;  %v3030_v25 = vld [vmem:[%s3429_s11 + $0x10c] ss:$12 sps:$4 sm:$0xff]   ;;  %s4125_s28 = scalar_lea.vmem %s4187_s3, %s2871_s26 }
  0x5d   : > { %2776 = vmatprep.subr.bf16.mxu0 %v3484_v26  ;;  %2552 = vmatprep.subr.bf16.mxu1 %v2964_v27  ;;  %v3032_v27 = vld [vmem:[%s3429_s11 + $0xf4] ss:$12 sps:$4 sm:$0xff]  }
  0x5f   : > { %724 = vmatmul.mubr.bf16.vlgmr.msra.gmra.mxu0 %v3488_v28  ;;  %2757 = vmatmul.mubr.bf16.vlgmr.msra.gmra.mxu1 %v3491_v29 }
  0x60   : > { %2777 = vmatpush3.bf16.msra.mxu0 %v3484_v26  ;;  %2553 = vmatpush3.bf16.msra.mxu1 %v2965_v30  ;;  %v3033_v30 = vld [vmem:[%s3429_s11 + $0x34] ss:$12 sps:$4 sm:$0xff]  }
  0x61   : > { %731 = vmatprep.mubr.bf16.mxu0 %v3495_v31  ;;  %2760 = vmatprep.mubr.bf16.mxu1 %v3499_v32 }
  0x62   : > { %2554 = vmatprep.subr.bf16.mxu1 %v2971_v33  ;;  %2778 = vmatprep.subr.bf16.mxu0 %v3505_v34  ;;  %v3034_v33 = vld [vmem:[%s3429_s11 + $0xdc] ss:$12 sps:$4 sm:$0xff]  }
  0x64   : > { %2555 = vmatpush3.bf16.msra.mxu1 %v2973_v35  ;;  %2779 = vmatpush3.bf16.msra.mxu0 %v3505_v34  ;;  %v3036_v35 = vld [vmem:[%s3429_s11 + $0xc4] ss:$12 sps:$4 sm:$0xff]  }
  0x65   : > { %2556 = vmatprep.subr.bf16.mxu1 %v2977_v39  ;;  %2780 = vmatprep.subr.bf16.mxu0 %v3531_v43  ;;  %v3037_v39 = vld [vmem:[%s3429_s11 + $0x4] ss:$12 sps:$4 sm:$0xff]  }
  0x67   : > { %732 = vmatmul.mubr.bf16.gmra.mxu0 %v3512_v36  ;;  %2761 = vmatmul.mubr.bf16.gmra.mxu1 %v3515_v37 }
  0x68   : > { %739 = vmatprep.mubr.bf16.mxu0 %v3519_v38  ;;  %2764 = vmatprep.mubr.bf16.mxu1 %v3524_v40 }
  0x69   : > { %2557 = vmatpush3.bf16.msra.mxu1 %v2980_v41  ;;  %2781 = vmatpush3.bf16.msra.mxu0 %v3531_v43  ;;  %v3039_v41 = vld [vmem:[%s3429_s11 + $0x214] ss:$12 sps:$4 sm:$0xff]  }
  0x6a   : > { %2558 = vmatprep.subr.bf16.mxu1 %v2981_v42  ;;  %2782 = vmatprep.subr.bf16.mxu0 %v3561_v53 }
  0x6d   : > { %2559 = vmatpush3.bf16.msra.mxu1 %v2983_v45  ;;  %2783 = vmatpush3.bf16.msra.mxu0 %v3561_v53 }
  0x6e   : > { %2560 = vmatprep.subr.bf16.mxu1 %v2989_v49  ;;  %2784 = vmatprep.subr.bf16.mxu0 %v3006_v63 }
  0x6f   : > { %740 = vmatmul.mubr.bf16.gmra.mxu0 %v3536_v44  ;;  %2765 = vmatmul.mubr.bf16.gmra.mxu1 %v3541_v46 }
  0x70   : > { %747 = vmatprep.mubr.bf16.mxu0 %v3545_v47  ;;  %2768 = vmatprep.mubr.bf16.mxu1 %v3548_v48 }
  0x71   : > { %2561 = vmatpush3.bf16.msra.mxu1 %v2990_v50  ;;  %2785 = vmatpush3.bf16.msra.mxu0 %v3006_v63 }
  0x72   : > { %2562 = vmatprep.subr.bf16.mxu1 %v2991_v51  ;;  %2786 = vmatprep.subr.bf16.mxu0 %v3010_v2 }
  0x75   : > { %2563 = vmatpush3.bf16.msra.mxu1 %v2992_v54  ;;  %2787 = vmatpush3.bf16.msra.mxu0 %v3010_v2 }
  0x76   : > { %2564 = vmatprep.subr.bf16.mxu1 %v2999_v58  ;;  %2788 = vmatprep.subr.bf16.mxu0 %v3014_v3 }
  0x77   : > { %748 = vmatmul.mubr.bf16.gmra.mxu0 %v3558_v52  ;;  %2769 = vmatmul.mubr.bf16.gmra.mxu1 %v3565_v55 }
  0x78   : > { %755 = vmatprep.mubr.bf16.mxu0 %v3569_v56  ;;  %2772 = vmatprep.mubr.bf16.mxu1 %v3572_v57 }
  0x79   : > { %2565 = vmatpush3.bf16.msra.mxu1 %v3000_v59  ;;  %2789 = vmatpush3.bf16.msra.mxu0 %v3014_v3 }
  0x7a   : > { %2566 = vmatprep.subr.bf16.mxu1 %v3001_v60  ;;  %2790 = vmatprep.subr.bf16.mxu0 %v3018_v6 }
  0x7d   : > { %2567 = vmatpush3.bf16.msra.mxu1 %v3002_v62  ;;  %2791 = vmatpush3.bf16.msra.mxu0 %v3018_v6 }
  0x7e   : > { %2848 = vmatprep.subr.bf16.mxu1 %v3484_v26  ;;  %2646 = vmatprep.subr.bf16.mxu0 %v3022_v7 }
  0x7f   : > { %756 = vmatmul.mubr.bf16.gmra.mxu0 %v3583_v61  ;;  %2773 = vmatmul.mubr.bf16.gmra.mxu1 %v3588_v0 }
  0x80   : > { %763 = vmatprep.mubr.bf16.mxu0 %v3591_v1  ;;  %1168 = vmatprep.mubr.bf16.mxu1 %v3475_v23 }
  0x87   : > { %764 = vmatmul.mubr.bf16.gmra.mxu0 %v3601_v4  ;;  %1169 = vmatmul.mubr.bf16.vlgmr.msra.gmra.mxu1 %v3488_v28 }
  0x88   : > { %2856 = vmatpush3.bf16.msra.mxu1 %v3484_v26  ;;  %771 = vmatprep.mubr.bf16.mxu0 %v3604_v5  ;;  %v3031_v26 = vld [vmem:[%s3429_s11 + $0x4c] ss:$12 sps:$4 sm:$0xff]  }
  0x89   : > { %1176 = vmatprep.mubr.bf16.mxu1 %v3495_v31  ;;  %2849 = vmatprep.subr.bf16.mxu1 %v3505_v34 }
  0x8c   : > { %2857 = vmatpush3.bf16.msra.mxu1 %v3505_v34  ;;  %v3035_v34 = vld [vmem:[%s3429_s11 + $0x1c] ss:$12 sps:$4 sm:$0xff]  }
  0x8d   : > { %2850 = vmatprep.subr.bf16.mxu1 %v3531_v43 }
  0x8f   : > { %772 = vmatmul.mubr.bf16.gmra.mxu0 %v3615_v8  ;;  %1177 = vmatmul.mubr.bf16.gmra.mxu1 %v3512_v36 }
  0x90   : > { %779 = vmatprep.mubr.bf16.mxu0 %v3618_v9  ;;  %1184 = vmatprep.mubr.bf16.mxu1 %v3519_v38 }
  0x91   : > { %2858 = vmatpush3.bf16.msra.mxu1 %v3531_v43 }
  0x92   : > { %2851 = vmatprep.subr.bf16.mxu1 %v3561_v53 }
  0x95   : > { %2859 = vmatpush3.bf16.msra.mxu1 %v3561_v53 }
  0x96   : > { %2852 = vmatprep.subr.bf16.mxu1 %v3006_v63 }
  0x97   : > { %780 = vmatmul.mubr.bf16.gmra.mxu0 %v3629_v10  ;;  %1185 = vmatmul.mubr.bf16.gmra.mxu1 %v3536_v44 }
  0x98   : > { %787 = vmatprep.mubr.bf16.mxu0 %v3632_v11  ;;  %1192 = vmatprep.mubr.bf16.mxu1 %v3545_v47 }
  0x99   : > { %2860 = vmatpush3.bf16.msra.mxu1 %v3006_v63 }
  0x9a   : > { %2853 = vmatprep.subr.bf16.mxu1 %v3010_v2 }
  0x9d   : > { %2861 = vmatpush3.bf16.msra.mxu1 %v3010_v2 }
  0x9e   : > { %2854 = vmatprep.subr.bf16.mxu1 %v3014_v3 }
  0x9f   : > { %788 = vmatmul.mubr.bf16.gmra.mxu0 %v3640_v12  ;;  %1193 = vmatmul.mubr.bf16.gmra.mxu1 %v3558_v52 }
  0xa0   : > { %795 = vmatprep.mubr.bf16.mxu0 %v3643_v13  ;;  %1200 = vmatprep.mubr.bf16.mxu1 %v3569_v56 }
  0xa1   : > { %2862 = vmatpush3.bf16.msra.mxu1 %v3014_v3 }
  0xa2   : > { %2855 = vmatprep.subr.bf16.mxu1 %v3018_v6 }
  0xa5   : > { %2863 = vmatpush3.bf16.msra.mxu1 %v3018_v6 }
  0xa6   : > { %2812 = vmatprep.subr.bf16.mxu1 %v3038_v14 }
  0xa7   : > { %796 = vmatmul.mubr.bf16.gmra.mxu0 %v3651_v15  ;;  %1201 = vmatmul.mubr.bf16.gmra.mxu1 %v3583_v61 }
  0xa8   : > { %1208 = vmatprep.mubr.bf16.mxu1 %v3591_v1  ;;  %2792 = vmatprep.mubr.bf16.mxu0 %v3478_v24 }
  0xaf   : > { %1209 = vmatmul.mubr.bf16.gmra.mxu1 %v3601_v4  ;;  %2793 = vmatmul.mubr.bf16.vlgmr.msra.gmra.mxu0 %v3491_v29 }
  0xb0   : > { %2647 = vmatpush3.bf16.msra.mxu0 %v3023_v16  ;;  %1216 = vmatprep.mubr.bf16.mxu1 %v3604_v5 }
  0xb1   : > { %2648 = vmatprep.subr.bf16.mxu0 %v3024_v17  ;;  %2796 = vmatprep.mubr.bf16.mxu0 %v3499_v32 }
  0xb4   : > { %2649 = vmatpush3.bf16.msra.mxu0 %v3025_v18 }
  0xb5   : > { %2650 = vmatprep.subr.bf16.mxu0 %v3026_v19 }
  0xb7   : > { %1217 = vmatmul.mubr.bf16.gmra.mxu1 %v3615_v8  ;;  %2797 = vmatmul.mubr.bf16.gmra.mxu0 %v3515_v37 }
  0xb8   : > { %2651 = vmatpush3.bf16.msra.mxu0 %v3027_v20  ;;  %1224 = vmatprep.mubr.bf16.mxu1 %v3618_v9 }
  0xb9   : > { %2652 = vmatprep.subr.bf16.mxu0 %v3028_v21  ;;  %2800 = vmatprep.mubr.bf16.mxu0 %v3524_v40 }
  0xbc   : > { %2653 = vmatpush3.bf16.msra.mxu0 %v3029_v22 }
  0xbd   : > { %2654 = vmatprep.subr.bf16.mxu0 %v3030_v25 }
  0xbf   : > { %1225 = vmatmul.mubr.bf16.gmra.mxu1 %v3629_v10  ;;  %2801 = vmatmul.mubr.bf16.gmra.mxu0 %v3541_v46 }
  0xc0   : > { %2655 = vmatpush3.bf16.msra.mxu0 %v3031_v26  ;;  %1232 = vmatprep.mubr.bf16.mxu1 %v3632_v11 }
  0xc1   : > { %2656 = vmatprep.subr.bf16.mxu0 %v3032_v27  ;;  %2804 = vmatprep.mubr.bf16.mxu0 %v3548_v48 }
  0xc4   : > { %2657 = vmatpush3.bf16.msra.mxu0 %v3033_v30 }
  0xc5   : > { %2658 = vmatprep.subr.bf16.mxu0 %v3034_v33 }
  0xc7   : > { %1233 = vmatmul.mubr.bf16.gmra.mxu1 %v3640_v12  ;;  %2805 = vmatmul.mubr.bf16.gmra.mxu0 %v3565_v55 }
  0xc8   : > { %2659 = vmatpush3.bf16.msra.mxu0 %v3035_v34  ;;  %1240 = vmatprep.mubr.bf16.mxu1 %v3643_v13 }
  0xc9   : > { %2660 = vmatprep.subr.bf16.mxu0 %v3036_v35  ;;  %1693 = vmatprep.mubr.bf16.mxu0 %v3475_v23  ;;  %v3040_v23 = vld [vmem:[%s3429_s11 + $0x1fc] ss:$12 sps:$4 sm:$0xff]  }
  0xcc   : > { %2661 = vmatpush3.bf16.msra.mxu0 %v3037_v39 }
  0xcf   : > { %1241 = vmatmul.mubr.bf16.gmra.mxu1 %v3651_v15  ;;  %1694 = vmatmul.mubr.bf16.vlgmr.msra.gmra.mxu0 %v3488_v28  ;;  %v3041_v28 = vld [vmem:[%s3429_s11 + $0x1e4] ss:$12 sps:$4 sm:$0xff]  }
  0xd0   : > { %2808 = vmatprep.mubr.bf16.mxu1 %v3572_v57  ;;  %1701 = vmatprep.mubr.bf16.mxu0 %v3495_v31  ;;  %v3042_v31 = vld [vmem:[%s3429_s11 + $0x1cc] ss:$12 sps:$4 sm:$0xff]  }
  0xd7   : > { %2809 = vmatmul.mubr.bf16.vlgmr.msra.gmra.mxu1 %v3588_v0  ;;  %1702 = vmatmul.mubr.bf16.gmra.mxu0 %v3512_v36  ;;  %v3043_v36 = vld [vmem:[%s3429_s11 + $0x1b4] ss:$12 sps:$4 sm:$0xff]  }
  0xd8   : > { %2813 = vmatpush3.bf16.msra.mxu1 %v3038_v14  ;;  %1709 = vmatprep.mubr.bf16.mxu0 %v3519_v38  ;;  %v3045_v38 = vld [vmem:[%s3429_s11 + $0x184] ss:$12 sps:$4 sm:$0xff]  }
  0xd9   : > { %2814 = vmatprep.subr.bf16.mxu1 %v3039_v41  ;;  %2828 = vmatprep.mubr.bf16.mxu1 %v3478_v24  ;;  %v3044_v24 = vld [vmem:[%s3429_s11 + $0x19c] ss:$12 sps:$4 sm:$0xff]  }
  0xdc   : > { %2815 = vmatpush3.bf16.msra.mxu1 %v3039_v41 }
  0xdd   : > { %2816 = vmatprep.subr.bf16.mxu1 %v3040_v23 }
  0xdf   : > { %1710 = vmatmul.mubr.bf16.gmra.mxu0 %v3536_v44 }
  0xe0   : > { %2817 = vmatpush3.bf16.msra.mxu1 %v3040_v23  ;;  %1717 = vmatprep.mubr.bf16.mxu0 %v3545_v47 }
  0xe1   : > { %2818 = vmatprep.subr.bf16.mxu1 %v3041_v28 }
  0xe4   : > { %2819 = vmatpush3.bf16.msra.mxu1 %v3041_v28 }
  0xe5   : > { %2820 = vmatprep.subr.bf16.mxu1 %v3042_v31 }
  0xe7   : > { %1718 = vmatmul.mubr.bf16.gmra.mxu0 %v3558_v52 }
  0xe8   : > { %2821 = vmatpush3.bf16.msra.mxu1 %v3042_v31  ;;  %1725 = vmatprep.mubr.bf16.mxu0 %v3569_v56 }
  0xe9   : > { %2822 = vmatprep.subr.bf16.mxu1 %v3043_v36 }
  0xec   : > { %2823 = vmatpush3.bf16.msra.mxu1 %v3043_v36 }
  0xed   : > { %2824 = vmatprep.subr.bf16.mxu1 %v3044_v24 }
  0xef   : > { %1726 = vmatmul.mubr.bf16.gmra.mxu0 %v3583_v61 }
  0xf0   : > { %2825 = vmatpush3.bf16.msra.mxu1 %v3044_v24  ;;  %1733 = vmatprep.mubr.bf16.mxu0 %v3591_v1 }
  0xf1   : > { %2826 = vmatprep.subr.bf16.mxu1 %v3045_v38 }
  0xf4   : > { %2827 = vmatpush3.bf16.msra.mxu1 %v3045_v38 }
  0xf7   : > { %2829 = vmatmul.mubr.bf16.vlgmr.msra.gmra.mxu1 %v3491_v29  ;;  %1734 = vmatmul.mubr.bf16.gmra.mxu0 %v3601_v4 }
  0xf8   : > { %2832 = vmatprep.mubr.bf16.mxu1 %v3499_v32  ;;  %1741 = vmatprep.mubr.bf16.mxu0 %v3604_v5 }
  0xff   : > { %2833 = vmatmul.mubr.bf16.gmra.mxu1 %v3515_v37  ;;  %1742 = vmatmul.mubr.bf16.gmra.mxu0 %v3615_v8 }
 0x100   : > { %2836 = vmatprep.mubr.bf16.mxu1 %v3524_v40  ;;  %1749 = vmatprep.mubr.bf16.mxu0 %v3618_v9  ;;  %v3728_v40 = vld [vmem:[%s3435_s30 + $0x2] ss:$0 sm:$0xff] }
 0x107   : > { %2837 = vmatmul.mubr.bf16.gmra.mxu1 %v3541_v46  ;;  %1750 = vmatmul.mubr.bf16.gmra.mxu0 %v3629_v10 }
 0x108   : > { %2840 = vmatprep.mubr.bf16.mxu1 %v3548_v48  ;;  %1757 = vmatprep.mubr.bf16.mxu0 %v3632_v11 }
 0x10f   : > { %2841 = vmatmul.mubr.bf16.gmra.mxu1 %v3565_v55  ;;  %1758 = vmatmul.mubr.bf16.gmra.mxu0 %v3640_v12 }
 0x110   : > { %2844 = vmatprep.mubr.bf16.mxu1 %v3572_v57  ;;  %1765 = vmatprep.mubr.bf16.mxu0 %v3643_v13 }
 0x117   : > { %2845 = vmatmul.mubr.bf16.gmra.mxu1 %v3588_v0  ;;  %1766 = vmatmul.mubr.bf16.gmra.mxu0 %v3651_v15 }
 0x11f   : > { %v2474_v29 = vpop.f32.mrf.mxu0  ;;  %v2758_v32 = vpop.f32.mrf.mxu1 }
 0x121   : > { %v2475_v37 = vpop.f32.mrf.mxu0  ;;  %v838_v42 = vpop.f32.mrf.mxu1 }
 0x122   : > { %v2476_v43 = vadd.f32 %v2475_v37, %v2474_v29 }
 0x123   : > { %v2477_v44 = vpop.f32.mrf.mxu0  ;;  %v2759_v45 = vpop.f32.mrf.mxu1 }
 0x124   : > { %v726_v46 = vadd.f32 %v2476_v43, %v3728_v40 }
 0x125   : > { %v2478_v47 = vpop.f32.mrf.mxu0  ;;  %v841_v48 = vpop.f32.mrf.mxu1 }
 0x126   : > { %v3731_v49 = vadd.f32 %v838_v42, %v726_v46  ;;  %v2479_v50 = vadd.f32 %v2478_v47, %v2477_v44 }
 0x127   : > { %v2480_v51 = vpop.f32.mrf.mxu0  ;;  %v2762_v52 = vpop.f32.mrf.mxu1 }
 0x128   : > { %v729_v53 = vadd.f32 %v2479_v50, %v3728_v40 }
 0x129   : > { %v2481_v54 = vpop.f32.mrf.mxu0  ;;  %v854_v55 = vpop.f32.mrf.mxu1 }
 0x12a   : > { %v3734_v56 = vadd.f32 %v841_v48, %v729_v53  ;;  %v2482_v57 = vadd.f32 %v2481_v54, %v2480_v51 }
 0x12b   : > { %v2483_v58 = vpop.f32.mrf.mxu0  ;;  %v2763_v59 = vpop.f32.mrf.mxu1 }
 0x12c   : > { %v734_v60 = vadd.f32 %v2482_v57, %v3728_v40 }
 0x12d   : > { %v2484_v61 = vpop.f32.mrf.mxu0  ;;  %v857_v62 = vpop.f32.mrf.mxu1 }
 0x12e   : > { %v3737_v63 = vadd.f32 %v2758_v32, %v734_v60  ;;  %v2485_v0 = vadd.f32 %v2484_v61, %v2483_v58 }
 0x12f   : > { %v2486_v1 = vpop.f32.mrf.mxu0  ;;  %v2766_v2 = vpop.f32.mrf.mxu1 }
 0x130   : > { %v737_v3 = vadd.f32 %v2485_v0, %v3728_v40 }
 0x131   : > { %v2487_v4 = vpop.f32.mrf.mxu0  ;;  %v870_v5 = vpop.f32.mrf.mxu1 }
 0x132   : > { %v3740_v6 = vadd.f32 %v2759_v45, %v737_v3  ;;  %v2488_v7 = vadd.f32 %v2487_v4, %v2486_v1 }
 0x133   : > { %v2489_v8 = vpop.f32.mrf.mxu0  ;;  %v2767_v9 = vpop.f32.mrf.mxu1 }
 0x134   : > { %v742_v10 = vadd.f32 %v2488_v7, %v3728_v40 }
 0x135   : > { %v2490_v11 = vpop.f32.mrf.mxu0  ;;  %v873_v12 = vpop.f32.mrf.mxu1 }
 0x136   : > { %v3743_v13 = vadd.f32 %v854_v55, %v742_v10  ;;  %v2491_v14 = vadd.f32 %v2490_v11, %v2489_v8 }
 0x137   : > { %v2492_v15 = vpop.f32.mrf.mxu0  ;;  %v3745_v16 = vpop.f32.mrf.mxu1 }
 0x138   : > { %v745_v17 = vadd.f32 %v2491_v14, %v3728_v40 }
 0x139   : > { %v2493_v18 = vpop.f32.mrf.mxu0  ;;  %v886_v19 = vpop.f32.mrf.mxu1 }
 0x13a   : > { %v3748_v20 = vadd.f32 %v857_v62, %v745_v17  ;;  %v2494_v21 = vadd.f32 %v2493_v18, %v2492_v15 }
 0x13b   : > { %v2495_v22 = vpop.f32.mrf.mxu0  ;;  %v3750_v25 = vpop.f32.mrf.mxu1 }
 0x13c   : > { %v750_v26 = vadd.f32 %v2494_v21, %v3728_v40 }
 0x13d   : > { %v2496_v27 = vpop.f32.mrf.mxu0  ;;  %v889_v30 = vpop.f32.mrf.mxu1 }
 0x13e   : > { %v3753_v33 = vadd.f32 %v2762_v52, %v750_v26  ;;  %v2497_v34 = vadd.f32 %v2496_v27, %v2495_v22 }
 0x13f   : > { %v2498_v35 = vpop.f32.mrf.mxu0  ;;  %v3755_v39 = vpop.f32.mrf.mxu1 }
 0x140   : > { %v753_v41 = vadd.f32 %v2497_v34, %v3728_v40 }
 0x141   : > { %v2499_v23 = vpop.f32.mrf.mxu0  ;;  %v3758_v28 = vpop.f32.mrf.mxu1 }
 0x142   : > { %v3760_v31 = vadd.f32 %v2763_v59, %v753_v41  ;;  %v2500_v36 = vadd.f32 %v2499_v23, %v2498_v35 }
 0x143   : > { %v2501_v24 = vpop.f32.mrf.mxu0  ;;  %v3762_v38 = vpop.f32.mrf.mxu1 }
 0x144   : > { %v758_v29 = vadd.f32 %v2500_v36, %v3728_v40 }
 0x145   : > { %v2502_v32 = vpop.f32.mrf.mxu0  ;;  %v3765_v37 = vpop.f32.mrf.mxu1 }
 0x146   : > { %v3767_v42 = vadd.f32 %v870_v5, %v758_v29  ;;  %v2503_v43 = vadd.f32 %v2502_v32, %v2501_v24 }
 0x147   : > { %v2504_v44 = vpop.f32.mrf.mxu0  ;;  %v2568_v45 = vpop.f32.mrf.mxu1 }
 0x148   : > { %v761_v46 = vadd.f32 %v2503_v43, %v3728_v40 }
 0x149   : > { %v2505_v47 = vpop.f32.mrf.mxu0  ;;  %v2569_v48 = vpop.f32.mrf.mxu1 }
 0x14a   : > { %v3770_v50 = vadd.f32 %v873_v12, %v761_v46  ;;  %v2506_v51 = vadd.f32 %v2505_v47, %v2504_v44  ;;  %v3772_v52 = vadd.f32 %v2569_v48, %v2568_v45 }
 0x14b   : > { %v2507_v53 = vpop.f32.mrf.mxu0  ;;  %v2571_v54 = vpop.f32.mrf.mxu1 }
 0x14c   : > { %v766_v55 = vadd.f32 %v2506_v51, %v3728_v40 }
 0x14d   : > { %v2508_v57 = vpop.f32.mrf.mxu0  ;;  %v2572_v58 = vpop.f32.mrf.mxu1 }
 0x14e   : > { %v3775_v59 = vadd.f32 %v2766_v2, %v766_v55  ;;  %v2509_v60 = vadd.f32 %v2508_v57, %v2507_v53  ;;  %v3777_v61 = vadd.f32 %v2572_v58, %v2571_v54 }
 0x14f   : > { %v2510_v62 = vpop.f32.mrf.mxu0  ;;  %v2574_v0 = vpop.f32.mrf.mxu1 }
 0x150   : > { %v769_v1 = vadd.f32 %v2509_v60, %v3728_v40 }
 0x151   : > { %v2511_v3 = vpop.f32.mrf.mxu0  ;;  %v2575_v4 = vpop.f32.mrf.mxu1 }
 0x152   : > { %v3780_v5 = vadd.f32 %v2767_v9, %v769_v1  ;;  %v2512_v7 = vadd.f32 %v2511_v3, %v2510_v62  ;;  %v2576_v3 = vadd.f32 %v2575_v4, %v2574_v0 }
 0x153   : > { %v2513_v8 = vpop.f32.mrf.mxu0  ;;  %v3782_v10 = vpop.f32.mrf.mxu1 }
 0x154   : > { %v774_v11 = vadd.f32 %v2512_v7, %v3728_v40 }
 0x155   : > { %v2514_v12 = vpop.f32.mrf.mxu0  ;;  %v3785_v2 = vpop.f32.mrf.mxu1 }
 0x156   : > { %v3787_v14 = vadd.f32 %v886_v19, %v774_v11  ;;  %v2515_v15 = vadd.f32 %v2514_v12, %v2513_v8 }
 0x157   : > { %v2516_v17 = vpop.f32.mrf.mxu0  ;;  %v2580_v18 = vpop.f32.mrf.mxu1 }
 0x158   : > { %v777_v21 = vadd.f32 %v2515_v15, %v3728_v40 }
 0x159   : > { %v2517_v22 = vpop.f32.mrf.mxu0  ;;  %v2581_v26 = vpop.f32.mrf.mxu1 }
 0x15a   : > { %v3790_v9 = vadd.f32 %v889_v30, %v777_v21  ;;  %v2518_v27 = vadd.f32 %v2517_v22, %v2516_v17  ;;  %v2582_v34 = vadd.f32 %v2581_v26, %v2580_v18  ;;  %v3830_v18 = vld [vmem:[%s3435_s30] ss:$0 sm:$0xff] }
 0x15b   : > { %v2519_v35 = vpop.f32.mrf.mxu0  ;;  %v3792_v41 = vpop.f32.mrf.mxu1  ;;  %v1179_v0 = vadd.f32 %v2576_v3, %v3830_v18 }
 0x15c   : > { %v782_v23 = vadd.f32 %v2518_v27, %v3728_v40 }
 0x15d   : > { %v2520_v36 = vpop.f32.mrf.mxu0  ;;  %v3795_v24 = vpop.f32.mrf.mxu1 }
 0x15e   : > { %v3798_v19 = vadd.f32 %v3745_v16, %v782_v23  ;;  %v2521_v29 = vadd.f32 %v2520_v36, %v2519_v35  ;;  %v1171_v35 = vadd.f32 %v3772_v52, %v3830_v18 }
 0x15f   : > { %v2522_v32 = vpop.f32.mrf.mxu0  ;;  %v3800_v43 = vpop.f32.mrf.mxu1 }
 0x160   : > { %v785_v30 = vadd.f32 %v2521_v29, %v3728_v40 }
 0x161   : > { %v2523_v44 = vpop.f32.mrf.mxu0  ;;  %v3803_v45 = vpop.f32.mrf.mxu1 }
 0x162   : > { %v3806_v46 = vadd.f32 %v3750_v25, %v785_v30  ;;  %v2524_v47 = vadd.f32 %v2523_v44, %v2522_v32 }
 0x163   : > { %v2525_v48 = vpop.f32.mrf.mxu0  ;;  %v3808_v51 = vpop.f32.mrf.mxu1 }
 0x164   : > { %v790_v53 = vadd.f32 %v2524_v47, %v3728_v40 }
 0x165   : > { %v2526_v16 = vpop.f32.mrf.mxu0  ;;  %v3811_v54 = vpop.f32.mrf.mxu1 }
 0x166   : > { %v3814_v55 = vadd.f32 %v3758_v28, %v790_v53  ;;  %v2527_v57 = vadd.f32 %v2526_v16, %v2525_v48  ;;  %v1174_v48 = vadd.f32 %v3777_v61, %v3830_v18 }
 0x167   : > { %v2528_v58 = vpop.f32.mrf.mxu0  ;;  %v3816_v60 = vpop.f32.mrf.mxu1 }
 0x168   : > { %v793_v25 = vadd.f32 %v2527_v57, %v3728_v40 }
 0x169   : > { %v2529_v62 = vpop.f32.mrf.mxu0  ;;  %v3819_v1 = vpop.f32.mrf.mxu1 }
 0x16a   : > { %v3822_v7 = vadd.f32 %v3765_v37, %v793_v25  ;;  %v2530_v8 = vadd.f32 %v2529_v62, %v2528_v58  ;;  %v1187_v58 = vadd.f32 %v2582_v34, %v3830_v18 }
 0x16b   : > { %v2531_v11 = vpop.f32.mrf.mxu0  ;;  %v3824_v12 = vpop.f32.mrf.mxu1 }
 0x16c   : > { %v798_v28 = vadd.f32 %v2530_v8, %v3728_v40 }
 0x16d   : > { %v2532_v15 = vpop.f32.mrf.mxu0  ;;  %v3827_v17 = vpop.f32.mrf.mxu1 }
 0x16e   : > { %v3833_v21 = vadd.f32 %v3755_v39, %v798_v28  ;;  %v2533_v22 = vadd.f32 %v2532_v15, %v2531_v11 }
 0x16f   : > { %v3836_v4 = vpop.f32.mrf.mxu1  ;;  %v2794_v37 = vpop.f32.mrf.mxu0 }
 0x170   : > { %v801_v26 = vadd.f32 %v2533_v22, %v3728_v40  ;;  %v1292_v27 = vadd.f32 %v2794_v37, %v1179_v0 }
 0x171   : > { %v3841_v23 = vpop.f32.mrf.mxu1  ;;  %v1283_v36 = vpop.f32.mrf.mxu0 }
 0x172   : > { %v3844_v29 = vadd.f32 %v3762_v38, %v801_v26  ;;  %v1364_v39 = vmul.f32 0.5, %v1292_v27  ;;  %v1284_v32 = vadd.f32 %v1283_v36, %v1171_v35 }
 0x173   : > { %v3846_v30 = vpop.f32.mrf.mxu1  ;;  %v2795_v44 = vpop.f32.mrf.mxu0 }
 0x174   : > { %4191 = vst [vmem:[#allocation8_spill] sm:$0xff] %v3844_v29  ;;  %v1362_v47 = vmul.f32 0.5, %v1284_v32  ;;  %3046 = vtanh.f32 %v1364_v39 }
 0x175   : > { %v3850_v40 = vpop.f32.mrf.mxu1  ;;  %v1286_v53 = vpop.f32.mrf.mxu0 }
 0x176   : > { %3048 = vtanh.f32 %v1362_v47  ;;  %v1287_v52 = vadd.f32 %v1286_v53, %v1174_v48  ;;  %v2579_v53 = vadd.f32 %v3785_v2, %v3782_v10 }
 0x177   : > { %v3852_v16 = vpop.f32.mrf.mxu1  ;;  %v2798_v57 = vpop.f32.mrf.mxu0  ;;  %3050 = vtanh.f32 %v3731_v49 }
 0x178   : > { %v1363_v38 = vmul.f32 0.5, %v1287_v52  ;;  %3052 = vtanh.f32 %v3737_v63  ;;  %v1182_v29 = vadd.f32 %v2579_v53, %v3830_v18 }
 0x179   : > { %v3857_v25 = vpop.f32.mrf.mxu1  ;;  %v1299_v62 = vpop.f32.mrf.mxu0 }
 0x17a   : > { %3054 = vtanh.f32 %v1363_v38  ;;  %v1300_v61 = vadd.f32 %v1299_v62, %v1187_v58  ;;  %v2588_v62 = vadd.f32 %v3803_v45, %v3800_v43  ;;  %v1295_v43 = vadd.f32 %v2795_v44, %v1182_v29 }
 0x17b   : > { %v3859_v3 = vpop.f32.mrf.mxu1  ;;  %v2799_v8 = vpop.f32.mrf.mxu0  ;;  %3056 = vtanh.f32 %v3734_v56  ;;  %v2603_v29 = vadd.f32 %v3850_v40, %v3846_v30 }
 0x17c   : > { %v1366_v11 = vmul.f32 0.5, %v1300_v61 }
 0x17d   : > { %v3862_v28 = vpop.f32.mrf.mxu1  ;;  %v1302_v15 = vpop.f32.mrf.mxu0 }
 0x17e   : > { %3058 = vtanh.f32 %v1366_v11 }
 0x17f   : > { %v3864_v49 = vpop.f32.mrf.mxu1  ;;  %v2802_v34 = vpop.f32.mrf.mxu0  ;;  %3060 = vtanh.f32 %v3743_v13 }
 0x180   : > { %3062 = vtanh.f32 %v3740_v6 }
 0x181   : > { %v3866_v22 = vpop.f32.mrf.mxu1  ;;  %v1315_v63 = vpop.f32.mrf.mxu0 }
 0x182   : > { %v3047_v0 = vpop.eup %3046 }
 0x183   : > { %v3049_v37 = vpop.eup %3048  ;;  %v1404_v26 = vmul.f32 0.5, %v3047_v0  ;;  %v3869_v27 = vpop.f32.mrf.mxu1 }
 0x184   : > { %v2803_v35 = vpop.f32.mrf.mxu0  ;;  %v1402_v36 = vmul.f32 0.5, %v3049_v37  ;;  %v3051_v56 = vpop.eup %3050 }
 0x185   : > { %v1424_v39 = vadd.f32 0.5, %v1404_v26  ;;  %v3871_v32 = vpop.f32.mrf.mxu1  ;;  %v3053_v48 = vpop.eup %3052 }
 0x186   : > { %v3873_v47 = vpop.f32.mrf.mxu0  ;;  %v1422_v52 = vadd.f32 0.5, %v1402_v36  ;;  %v2585_v36 = vadd.f32 %v3795_v24, %v3792_v41  ;;  %v2594_v41 = vadd.f32 %v3819_v1, %v3816_v60 }
 0x187   : > { %v3055_v38 = vpop.eup %3054  ;;  %v3877_v58 = vmul.f32 %v3053_v48, %v1424_v39  ;;  %v3885_v0 = vpop.f32.mrf.mxu1  ;;  %v2591_v39 = vadd.f32 %v3811_v54, %v3808_v51 }
 0x188   : > { %v3879_v13 = vpop.f32.mrf.mxu0  ;;  %v3883_v61 = vmul.f32 %v3051_v56, %v1422_v52  ;;  %v1403_v11 = vmul.f32 0.5, %v3055_v38  ;;  %v3057_v26 = vpop.eup %3056  ;;  %v1195_v56 = vadd.f32 %v2588_v62, %v3830_v18  ;;  %v2600_v38 = vadd.f32 %v3841_v23, %v3836_v4 }
 0x189   : > { %v3901_v53 = vpop.f32.mrf.mxu1  ;;  %v1198_v44 = vadd.f32 %v2591_v39, %v3830_v18  ;;  %v1190_v4 = vadd.f32 %v2585_v36, %v3830_v18  ;;  %v1203_v30 = vadd.f32 %v2594_v41, %v3830_v18  ;;  %v1214_v39 = vadd.f32 %v2603_v29, %v3830_v18 }
 0x18a   : > { %v3887_v37 = vpop.f32.mrf.mxu0  ;;  %v1423_v10 = vadd.f32 0.5, %v1403_v11  ;;  %v1308_v24 = vadd.f32 %v2798_v57, %v1195_v56 }
 0x18b   : > { %v3059_v2 = vpop.eup %3058  ;;  %v1311_v23 = vadd.f32 %v2799_v8, %v1198_v44  ;;  %v1303_v57 = vadd.f32 %v1302_v15, %v1190_v4  ;;  %v1316_v36 = vadd.f32 %v1315_v63, %v1203_v30  ;;  %v2597_v8 = vadd.f32 %v3827_v17, %v3824_v12 }
 0x18c   : > { %v3894_v48 = vpop.f32.mrf.mxu0  ;;  %v3896_v45 = vmul.f32 %v3057_v26, %v1423_v10  ;;  %v1406_v52 = vmul.f32 0.5, %v3059_v2  ;;  %v3061_v54 = vpop.eup %3060  ;;  %v1365_v26 = vmul.f32 0.5, %v1295_v43  ;;  %v1211_v2 = vadd.f32 %v2600_v38, %v3830_v18 }
 0x18d   : > { %v1368_v1 = vmul.f32 0.5, %v1308_v24  ;;  %v1369_v56 = vmul.f32 0.5, %v1311_v23  ;;  %v1367_v6 = vmul.f32 0.5, %v1303_v57  ;;  %v1370_v63 = vmul.f32 0.5, %v1316_v36 }
 0x18e   : > { %4192 = vst [vmem:[#allocation9_spill] sm:$0xff] %v3896_v45  ;;  %v3903_v11 = vpop.f32.mrf.mxu0  ;;  %v1426_v51 = vadd.f32 0.5, %v1406_v52  ;;  %v3916_v45 = vpop.f32.mrf.mxu1  ;;  %v1324_v40 = vadd.f32 %v2802_v34, %v1211_v2  ;;  %3064 = vtanh.f32 %v1365_v26  ;;  %v1327_v52 = vadd.f32 %v2803_v35, %v1214_v39 }
 0x18f   : > { %3066 = vtanh.f32 %v3748_v20  ;;  %v2612_v20 = vadd.f32 %v3866_v22, %v3864_v49  ;;  %v1206_v17 = vadd.f32 %v2597_v8, %v3830_v18  ;;  %v2606_v49 = vadd.f32 %v3857_v25, %v3852_v16 }
 0x190   : > { %v3910_v62 = vpop.f32.mrf.mxu0  ;;  %v3912_v10 = vmul.f32 %v3061_v54, %v1426_v51  ;;  %v3928_v38 = vpop.f32.mrf.mxu1  ;;  %3068 = vtanh.f32 %v1368_v1  ;;  %v1372_v34 = vmul.f32 0.5, %v1324_v40  ;;  %v1373_v12 = vmul.f32 0.5, %v1327_v52 }
 0x191   : > { %3070 = vtanh.f32 %v3753_v33  ;;  %v1319_v33 = vadd.f32 %v3873_v47, %v1206_v17  ;;  %v3063_v47 = vpop.eup %3062  ;;  %v2615_v4 = vadd.f32 %v3871_v32, %v3869_v27 }
 0x192   : > { %v3918_v60 = vpop.f32.mrf.mxu0  ;;  %3072 = vtanh.f32 %v3760_v31  ;;  %v3939_v35 = vpop.f32.mrf.mxu1  ;;  %v1227_v31 = vadd.f32 %v2612_v20, %v3830_v18 }
 0x193   : > { %3074 = vtanh.f32 %v1369_v56  ;;  %v1371_v22 = vmul.f32 0.5, %v1319_v33  ;;  %v1230_v57 = vadd.f32 %v2615_v4, %v3830_v18 }
 0x194   : > { %v3923_v43 = vpop.f32.mrf.mxu0  ;;  %3076 = vtanh.f32 %v1367_v6  ;;  %v2623_v54 = vpop.f32.mrf.mxu1  ;;  %v1340_v23 = vadd.f32 %v3879_v13, %v1227_v31 }
 0x195   : > { %3078 = vtanh.f32 %v1372_v34  ;;  %v2624_v33 = vadd.f32 %v2623_v54, %v3939_v35 }
 0x196   : > { %v3930_v15 = vpop.f32.mrf.mxu0  ;;  %3080 = vtanh.f32 %v1370_v63  ;;  %v1376_v13 = vmul.f32 0.5, %v1340_v23 }
 0x197   : > { %3082 = vtanh.f32 %v1373_v12  ;;  %v4193_v12 = vld [vmem:[#allocation8_spill] sm:$0xff] }
 0x198   : > { %v3933_v41 = vpop.f32.mrf.mxu0  ;;  %3084 = vtanh.f32 %v3767_v42  ;;  %v3960_v42 = vpop.f32.mrf.mxu1 }
 0x199   : > { %3086 = vtanh.f32 %v3770_v50 }
 0x19a   : > { %v3941_v24 = vpop.f32.mrf.mxu0  ;;  %3088 = vtanh.f32 %v3775_v59  ;;  %v1219_v59 = vadd.f32 %v2606_v49, %v3830_v18  ;;  %v3974_v30 = vpop.f32.mrf.mxu1 }
 0x19b   : > { %v3065_v26 = vpop.eup %3064  ;;  %3090 = vtanh.f32 %v3780_v5 }
 0x19c   : > { %v3944_v51 = vpop.f32.mrf.mxu0  ;;  %v3964_v2 = vpop.eup %3066  ;;  %3092 = vtanh.f32 %v3787_v14  ;;  %v1405_v27 = vmul.f32 0.5, %v3065_v26  ;;  %v1332_v1 = vadd.f32 %v3887_v37, %v1219_v59 }
 0x19d   : > { %v3069_v16 = vpop.eup %3068  ;;  %3094 = vtanh.f32 %v1371_v22 }
 0x19e   : > { %v3947_v29 = vpop.f32.mrf.mxu0  ;;  %v3071_v5 = vpop.eup %3070  ;;  %3096 = vtanh.f32 %v3790_v9  ;;  %v1408_v39 = vmul.f32 0.5, %v3069_v16  ;;  %v2609_v9 = vadd.f32 %v3862_v28, %v3859_v3  ;;  %v1425_v56 = vadd.f32 0.5, %v1405_v27 }
 0x19f   : > { %v3073_v32 = vpop.eup %3072  ;;  %3098 = vtanh.f32 %v3798_v19  ;;  %v1343_v19 = vadd.f32 %v3894_v48, %v1230_v57  ;;  %v1374_v34 = vmul.f32 0.5, %v1332_v1  ;;  %v2618_v1 = vadd.f32 %v3901_v53, %v3885_v0 }
 0x1a0   : > { %v3953_v44 = vpop.f32.mrf.mxu0  ;;  %v3075_v40 = vpop.eup %3074  ;;  %3100 = vtanh.f32 %v3806_v46  ;;  %v1428_v3 = vadd.f32 0.5, %v1408_v39  ;;  %v1222_v28 = vadd.f32 %v2609_v9, %v3830_v18  ;;  %v1445_v22 = vmul.f32 %v3063_v47, %v1425_v56 }
 0x1a1   : > { %v3077_v36 = vpop.eup %3076  ;;  %3102 = vtanh.f32 %v3814_v55  ;;  %v1409_v6 = vmul.f32 0.5, %v3075_v40  ;;  %v2810_v46 = vpop.f32.mrf.mxu1 }
 0x1a2   : > { %v3962_v50 = vpop.f32.mrf.mxu0  ;;  %v3079_v37 = vpop.eup %3078  ;;  %3104 = vtanh.f32 %v3822_v7  ;;  %v1407_v55 = vmul.f32 0.5, %v3077_v36  ;;  %v1377_v7 = vmul.f32 0.5, %v1343_v19  ;;  %v1448_v35 = vmul.f32 %v3071_v5, %v1428_v3 }
 0x1a3   : > { %v3081_v52 = vpop.eup %3080  ;;  %3106 = vtanh.f32 %v1376_v13  ;;  %v1412_v17 = vmul.f32 0.5, %v3079_v37  ;;  %v1429_v23 = vadd.f32 0.5, %v1409_v6  ;;  %v1347_v59 = vpop.f32.mrf.mxu1  ;;  %v2670_v6 = vadd.f32 %v3941_v24, %v3933_v41 }
 0x1a4   : > { %v3968_v25 = vpop.f32.mrf.mxu0  ;;  %v3083_v20 = vpop.eup %3082  ;;  %3108 = vtanh.f32 %v3833_v21  ;;  %v1410_v26 = vmul.f32 0.5, %v3081_v52  ;;  %v1335_v21 = vadd.f32 %v3903_v11, %v1222_v28  ;;  %v1427_v54 = vadd.f32 0.5, %v1407_v55 }
 0x1a5   : > { %v3085_v48 = vpop.eup %3084  ;;  %3110 = vtanh.f32 %v4193_v12  ;;  %v1413_v16 = vmul.f32 0.5, %v3083_v20  ;;  %v1432_v47 = vadd.f32 0.5, %v1412_v17  ;;  %v1243_v11 = vadd.f32 %v2624_v33, %v3830_v18  ;;  %v2811_v37 = vpop.f32.mrf.mxu1 }
 0x1a6   : > { %v3976_v14 = vpop.f32.mrf.mxu0  ;;  %v3994_v49 = vpop.eup %3086  ;;  %3112 = vtanh.f32 %v3877_v58  ;;  %v1430_v39 = vadd.f32 0.5, %v1410_v26  ;;  %v1375_v9 = vmul.f32 0.5, %v1335_v21  ;;  %v1449_v5 = vmul.f32 %v3073_v32, %v1429_v23 }
 0x1a7   : > { %v3089_v4 = vpop.eup %3088  ;;  %3114 = vtanh.f32 %v1374_v34  ;;  %v1433_v19 = vadd.f32 0.5, %v1413_v16  ;;  %v1447_v56 = vmul.f32 %v3964_v2, %v1427_v54  ;;  %v1235_v52 = vadd.f32 %v2618_v1, %v3830_v18 }
 0x1a8   : > { %v3983_v8 = vpop.f32.mrf.mxu0  ;;  %v3091_v13 = vpop.eup %3090  ;;  %3116 = vtanh.f32 %v3883_v61  ;;  %v4194_v61 = vld [vmem:[#allocation9_spill] sm:$0xff]  ;;  %v1452_v20 = vmul.f32 %v3089_v4, %v1432_v47  ;;  %v1356_v3 = vadd.f32 %v2810_v46, %v1243_v11  ;;  %v1450_v12 = vmul.f32 %v3085_v48, %v1430_v39 }
 0x1a9   : > { %v4003_v58 = vpop.eup %3092  ;;  %3118 = vtanh.f32 %v1377_v7  ;;  %v2621_v2 = vadd.f32 %v3928_v38, %v3916_v45  ;;  %v2664_v41 = vadd.f32 %v3918_v60, %v3910_v62  ;;  %v2627_v17 = vadd.f32 %v3974_v30, %v3960_v42  ;;  %v1350_v7 = vpop.f32.mrf.mxu1 }
 0x1aa   : > { %v3986_v63 = vpop.f32.mrf.mxu0  ;;  %v3095_v40 = vpop.eup %3094  ;;  %3120 = vtanh.f32 %v1445_v22  ;;  %v1348_v46 = vadd.f32 %v1347_v59, %v1235_v52  ;;  %v4037_v22 = vld [vmem:[%s3435_s30 + $0x1] ss:$0 sm:$0xff]  ;;  %v2673_v45 = vadd.f32 %v3947_v29, %v3944_v51  ;;  %v2667_v42 = vadd.f32 %v3930_v15, %v3923_v43 }
 0x1ab   : > { %v4008_v36 = vpop.eup %3096  ;;  %3122 = vtanh.f32 %v4194_v61  ;;  %v1411_v32 = vmul.f32 0.5, %v3095_v40  ;;  %v1704_v62 = vadd.f32 %v2670_v6, %v4037_v22  ;;  %v1380_v30 = vmul.f32 0.5, %v1356_v3 }
 0x1ac   : > { %v3992_v31 = vpop.f32.mrf.mxu0  ;;  %v4013_v53 = vpop.eup %3098  ;;  %3124 = vtanh.f32 %v1448_v35  ;;  %v1238_v23 = vadd.f32 %v2621_v2, %v3830_v18  ;;  %v1696_v51 = vadd.f32 %v2664_v41, %v4037_v22  ;;  %v1246_v35 = vadd.f32 %v2627_v17, %v3830_v18 }
 0x1ad   : > { %v4019_v34 = vpop.eup %3100  ;;  %3126 = vtanh.f32 %v3912_v10  ;;  %v1453_v10 = vmul.f32 %v3091_v13, %v1433_v19  ;;  %v1431_v38 = vadd.f32 0.5, %v1411_v32  ;;  %v1378_v13 = vmul.f32 0.5, %v1348_v46 }
 0x1ae   : > { %v3998_v27 = vpop.f32.mrf.mxu0  ;;  %v4024_v28 = vpop.eup %3102  ;;  %3128 = vtanh.f32 %v1375_v9  ;;  %v2682_v1 = vadd.f32 %v3986_v63, %v3983_v8  ;;  %v1707_v40 = vadd.f32 %v2673_v45, %v4037_v22  ;;  %v1359_v61 = vadd.f32 %v2811_v37, %v1246_v35 }
 0x1af   : > { %v4030_v24 = vpop.eup %3104  ;;  %3130 = vtanh.f32 %v1449_v5  ;;  %v1451_v9 = vmul.f32 %v3994_v49, %v1431_v38  ;;  %v1699_v18 = vadd.f32 %v2667_v42, %v4037_v22  ;;  %v2676_v52 = vadd.f32 %v3962_v50, %v3953_v44 }
 0x1b0   : > { %v4006_v57 = vpop.f32.mrf.mxu0  ;;  %v3107_v48 = vpop.eup %3106  ;;  %3132 = vtanh.f32 %v1447_v56  ;;  %v2685_v49 = vadd.f32 %v3998_v27, %v3992_v31  ;;  %v1720_v44 = vadd.f32 %v2682_v1, %v4037_v22  ;;  %v1381_v17 = vmul.f32 0.5, %v1359_v61 }
 0x1b1   : > { %v4042_v60 = vpop.eup %3108  ;;  %3134 = vtanh.f32 %v1452_v20  ;;  %v1416_v59 = vmul.f32 0.5, %v3107_v48  ;;  %v1351_v46 = vadd.f32 %v1350_v7, %v1238_v23  ;;  %v2679_v48 = vadd.f32 %v3976_v14, %v3968_v25 }
 0x1b2   : > { %v4011_v0 = vpop.f32.mrf.mxu0  ;;  %v4046_v4 = vpop.eup %3110  ;;  %3136 = vtanh.f32 %v1450_v12  ;;  %v1712_v42 = vadd.f32 %v2676_v52, %v4037_v22  ;;  %v1723_v23 = vadd.f32 %v2685_v49, %v4037_v22 }
 0x1b3   : > { %v4050_v29 = vpop.eup %3112  ;;  %3138 = vtanh.f32 %v1453_v10  ;;  %v1436_v20 = vadd.f32 0.5, %v1416_v59 }
 0x1b4   : > { %v4022_v55 = vpop.f32.mrf.mxu0  ;;  %v3115_v15 = vpop.eup %3114  ;;  %3140 = vtanh.f32 %v1380_v30 }
 0x1b5   : > { %v4056_v39 = vpop.eup %3116  ;;  %v1414_v32 = vmul.f32 0.5, %v3115_v15  ;;  %v1379_v15 = vmul.f32 0.5, %v1351_v46 }
 0x1b6   : > { %v4034_v33 = vpop.f32.mrf.mxu0  ;;  %v3119_v56 = vpop.eup %3118 }
 0x1b7   : > { %v2830_v26 = vpop.f32.mrf.mxu1  ;;  %v4064_v6 = vpop.eup %3120  ;;  %v1417_v10 = vmul.f32 0.5, %v3119_v56 }
 0x1b8   : > { %v2692_v21 = vpop.f32.mrf.mxu0  ;;  %v1817_v16 = vadd.f32 %v2830_v26, %v1704_v62  ;;  %v4068_v12 = vpop.eup %3122  ;;  %v1456_v26 = vmul.f32 %v4013_v53, %v1436_v20  ;;  %v1715_v53 = vadd.f32 %v2679_v48, %v4037_v22 }
 0x1b9   : > { %v1808_v54 = vpop.f32.mrf.mxu1  ;;  %v4071_v50 = vpop.eup %3124 }
 0x1ba   : > { %v2693_v43 = vpop.f32.mrf.mxu0  ;;  %v1889_v47 = vmul.f32 0.5, %v1817_v16  ;;  %v1809_v11 = vadd.f32 %v1808_v54, %v1696_v51  ;;  %v4077_v31 = vpop.eup %3126  ;;  %v1434_v16 = vadd.f32 0.5, %v1414_v32  ;;  %v1437_v54 = vadd.f32 0.5, %v1417_v10 }
 0x1bb   : > { %v2831_v5 = vpop.f32.mrf.mxu1  ;;  %v3129_v30 = vpop.eup %3128  ;;  %v2694_v14 = vadd.f32 %v2693_v43, %v2692_v21  ;;  %v2691_v10 = vadd.f32 %v4034_v33, %v4022_v55 }
 0x1bc   : > { %v4059_v19 = vpop.f32.mrf.mxu0  ;;  %3142 = vtanh.f32 %v1889_v47  ;;  %v1887_v8 = vmul.f32 0.5, %v1809_v11  ;;  %v1820_v63 = vadd.f32 %v2831_v5, %v1707_v40  ;;  %v4082_v25 = vpop.eup %3130  ;;  %v2688_v40 = vadd.f32 %v4011_v0, %v4006_v57 }
 0x1bd   : > { %3144 = vtanh.f32 %v1378_v13  ;;  %v1811_v37 = vpop.f32.mrf.mxu1  ;;  %v4084_v35 = vpop.eup %3132  ;;  %v1454_v61 = vmul.f32 %v4003_v58, %v1434_v16  ;;  %v1457_v20 = vmul.f32 %v4019_v34, %v1437_v54 }
 0x1be   : > { %v2696_v3 = vpop.f32.mrf.mxu0  ;;  %3146 = vtanh.f32 %v1887_v8  ;;  %v1890_v2 = vmul.f32 0.5, %v1820_v63  ;;  %v1812_v41 = vadd.f32 %v1811_v37, %v1699_v18  ;;  %v4087_v11 = vpop.eup %3134  ;;  %v1736_v63 = vadd.f32 %v2694_v14, %v4037_v22 }
 0x1bf   : > { %v2834_v45 = vpop.f32.mrf.mxu1  ;;  %v4091_v43 = vpop.eup %3136  ;;  %v2697_v57 = vadd.f32 %v2696_v3, %v4059_v19  ;;  %v1731_v14 = vadd.f32 %v2691_v10, %v4037_v22 }
 0x1c0   : > { %v4075_v62 = vpop.f32.mrf.mxu0  ;;  %3148 = vtanh.f32 %v1890_v2  ;;  %v1888_v27 = vmul.f32 0.5, %v1812_v41  ;;  %v1833_v38 = vadd.f32 %v2834_v45, %v1720_v44  ;;  %v4094_v56 = vpop.eup %3138  ;;  %v1728_v2 = vadd.f32 %v2688_v40, %v4037_v22 }
 0x1c1   : > { %3150 = vtanh.f32 %v1451_v9  ;;  %v1824_v51 = vpop.f32.mrf.mxu1  ;;  %v4099_v49 = vpop.eup %3140  ;;  %v1415_v44 = vmul.f32 0.5, %v3129_v30 }
 0x1c2   : > { %v2699_v7 = vpop.f32.mrf.mxu0  ;;  %3152 = vtanh.f32 %v1888_v27  ;;  %v1893_v59 = vmul.f32 0.5, %v1833_v38  ;;  %v1825_v13 = vadd.f32 %v1824_v51, %v1712_v42  ;;  %v1739_v38 = vadd.f32 %v2697_v57, %v4037_v22 }
 0x1c3   : > { %3154 = vtanh.f32 %v1381_v17  ;;  %v2835_v1 = vpop.f32.mrf.mxu1  ;;  %v2700_v30 = vadd.f32 %v2699_v7, %v4075_v62 }
 0x1c4   : > { %v2701_v47 = vpop.f32.mrf.mxu0  ;;  %3156 = vtanh.f32 %v1893_v59  ;;  %v1891_v9 = vmul.f32 0.5, %v1825_v13  ;;  %v1836_v21 = vadd.f32 %v2835_v1, %v1723_v23  ;;  %v1435_v1 = vadd.f32 0.5, %v1415_v44 }
 0x1c5   : > { %3158 = vtanh.f32 %v1456_v26  ;;  %v1827_v5 = vpop.f32.mrf.mxu1 }
 0x1c6   : > { %v2702_v18 = vpop.f32.mrf.mxu0  ;;  %3160 = vtanh.f32 %v1891_v9  ;;  %v1894_v52 = vmul.f32 0.5, %v1836_v21  ;;  %v1828_v8 = vadd.f32 %v1827_v5, %v1715_v53 }
 0x1c7   : > { %3162 = vtanh.f32 %v1379_v15  ;;  %v2838_v0 = vpop.f32.mrf.mxu1  ;;  %v2703_v40 = vadd.f32 %v2702_v18, %v2701_v47 }
 0x1c8   : > { %v2704_v32 = vpop.f32.mrf.mxu0  ;;  %3164 = vtanh.f32 %v1894_v52  ;;  %v1892_v58 = vmul.f32 0.5, %v1828_v8  ;;  %v1849_v37 = vadd.f32 %v2838_v0, %v1736_v63  ;;  %v1744_v0 = vadd.f32 %v2700_v30, %v4037_v22 }
 0x1c9   : > { %v3143_v41 = vpop.eup %3142  ;;  %3166 = vtanh.f32 %v1454_v61  ;;  %v1840_v17 = vpop.f32.mrf.mxu1 }
 0x1ca   : > { %v2705_v34 = vpop.f32.mrf.mxu0  ;;  %v4104_v46 = vpop.eup %3144  ;;  %v1929_v19 = vmul.f32 0.5, %v3143_v41  ;;  %3168 = vtanh.f32 %v1892_v58  ;;  %v1897_v3 = vmul.f32 0.5, %v1849_v37  ;;  %v1841_v48 = vadd.f32 %v1840_v17, %v1728_v2 }
 0x1cb   : > { %v3147_v45 = vpop.eup %3146  ;;  %3170 = vtanh.f32 %v1457_v20  ;;  %v2706_v27 = vadd.f32 %v2705_v34, %v2704_v32  ;;  %v2839_v42 = vpop.f32.mrf.mxu1 }
 0x1cc   : > { %v2707_v26 = vpop.f32.mrf.mxu0  ;;  %v1927_v16 = vmul.f32 0.5, %v3147_v45  ;;  %3172 = vtanh.f32 %v1897_v3  ;;  %v1895_v55 = vmul.f32 0.5, %v1841_v48  ;;  %v1949_v51 = vadd.f32 0.5, %v1929_v19 }
 0x1cd   : > { %v3149_v33 = vpop.eup %3148  ;;  %v1852_v23 = vadd.f32 %v2839_v42, %v1739_v38  ;;  %v1843_v59 = vpop.f32.mrf.mxu1  ;;  %v1752_v54 = vadd.f32 %v2706_v27, %v4037_v22  ;;  %v1747_v27 = vadd.f32 %v2703_v40, %v4037_v22 }
 0x1ce   : > { %v2708_v13 = vpop.f32.mrf.mxu0  ;;  %v4110_v15 = vpop.eup %3150  ;;  %v1930_v53 = vmul.f32 0.5, %v3149_v33  ;;  %3174 = vtanh.f32 %v1895_v55  ;;  %v1947_v62 = vadd.f32 0.5, %v1927_v16  ;;  %v1844_v21 = vadd.f32 %v1843_v59, %v1731_v14 }
 0x1cf   : > { %v3153_v9 = vpop.eup %3152  ;;  %v1898_v7 = vmul.f32 0.5, %v1852_v23  ;;  %v2709_v61 = vadd.f32 %v2708_v13, %v2707_v26  ;;  %v2842_v5 = vpop.f32.mrf.mxu1  ;;  %v1989_v58 = vmul.f32 %v4050_v29, %v1949_v51  ;;  %v1455_v59 = vmul.f32 %v4008_v36, %v1435_v1 }
 0x1d0   : > { %v2710_v52 = vpop.f32.mrf.mxu0  ;;  %v4113_v8 = vpop.eup %3154  ;;  %v1950_v63 = vadd.f32 0.5, %v1930_v53  ;;  %v1928_v20 = vmul.f32 0.5, %v3153_v9  ;;  %v1865_v57 = vadd.f32 %v2842_v5, %v1752_v54  ;;  %v1896_v47 = vmul.f32 0.5, %v1844_v21 }
 0x1d1   : > { %v3157_v32 = vpop.eup %3156  ;;  %3176 = vtanh.f32 %v1898_v7  ;;  %v1856_v18 = vpop.f32.mrf.mxu1  ;;  %v1755_v2 = vadd.f32 %v2709_v61, %v4037_v22  ;;  %v1987_v3 = vmul.f32 %v4056_v39, %v1947_v62  ;;  %v1418_v13 = vmul.f32 0.5, %v4104_v46 }
 0x1d2   : > { %v2711_v37 = vpop.f32.mrf.mxu0  ;;  %v4118_v41 = vpop.eup %3158  ;;  %v1990_v44 = vmul.f32 %v4064_v6, %v1950_v63  ;;  %v1948_v10 = vadd.f32 0.5, %v1928_v20  ;;  %v1933_v17 = vmul.f32 0.5, %v3157_v32  ;;  %v1901_v34 = vmul.f32 0.5, %v1865_v57 }
 0x1d3   : > { %v3161_v19 = vpop.eup %3160  ;;  %3178 = vtanh.f32 %v1896_v47  ;;  %v1857_v29 = vadd.f32 %v1856_v18, %v1744_v0  ;;  %v2843_v48 = vpop.f32.mrf.mxu1  ;;  %v2712_v16 = vadd.f32 %v2711_v37, %v2710_v52 }
 0x1d4   : > { %v2713_v45 = vpop.f32.mrf.mxu0  ;;  %v3163_v38 = vpop.eup %3162  ;;  %v2407_v6 = vpack.c.bf16 %v1990_v44, %v1989_v58  ;;  %v1988_v42 = vmul.f32 %v4068_v12, %v1948_v10  ;;  %v1931_v26 = vmul.f32 0.5, %v3161_v19  ;;  %v1953_v39 = vadd.f32 0.5, %v1933_v17 }
 0x1d5   : > { %v3165_v30 = vpop.eup %3164  ;;  %3180 = vtanh.f32 %v1901_v34  ;;  %v1899_v55 = vmul.f32 0.5, %v1857_v29  ;;  %v1868_v33 = vadd.f32 %v2843_v48, %v1755_v2  ;;  %v1859_v51 = vpop.f32.mrf.mxu1  ;;  %v1760_v36 = vadd.f32 %v2712_v16, %v4037_v22 }
 0x1d6   : > { %v2714_v23 = vpop.f32.mrf.mxu0  ;;  %v4129_v14 = vpop.eup %3166  ;;  %2449 = vst [vmem:[%s4125_s28 + $0x8] sm:$0xff] %v2407_v6   ;;  %v2402_v54 = vpack.c.bf16 %v1988_v42, %v1987_v3  ;;  %v1934_v53 = vmul.f32 0.5, %v3165_v30  ;;  %v1951_v40 = vadd.f32 0.5, %v1931_v26  ;;  %v1860_v62 = vadd.f32 %v1859_v51, %v1747_v27 }
 0x1d7   : > { %v3169_v12 = vpop.eup %3168  ;;  %3182 = vtanh.f32 %v1899_v55  ;;  %v1902_v9 = vmul.f32 0.5, %v1868_v33  ;;  %v2846_v7 = vpop.f32.mrf.mxu1  ;;  %v2715_v63 = vadd.f32 %v2714_v23, %v2713_v45  ;;  %v1419_v46 = vmul.f32 0.5, %v3163_v38 }
 0x1d8   : > { %v2716_v21 = vpop.f32.mrf.mxu0  ;;  %v4134_v61 = vpop.eup %3170  ;;  %2403 = vst [vmem:[%s4125_s28] sm:$0xff] %v2402_v54   ;;  %v1954_v5 = vadd.f32 0.5, %v1934_v53  ;;  %v1932_v52 = vmul.f32 0.5, %v3169_v12  ;;  %v1993_v20 = vmul.f32 %v4071_v50, %v1953_v39  ;;  %v1900_v57 = vmul.f32 0.5, %v1860_v62 }
 0x1d9   : > { %v3173_v1 = vpop.eup %3172  ;;  %3184 = vtanh.f32 %v1902_v9  ;;  %v1872_v0 = vpop.f32.mrf.mxu1  ;;  %v1438_v44 = vadd.f32 0.5, %v1418_v13  ;;  %v1991_v10 = vmul.f32 %v4077_v31, %v1951_v40  ;;  %v1763_v48 = vadd.f32 %v2715_v63, %v4037_v22 }
 0x1da   : > { %v2717_v32 = vpop.f32.mrf.mxu0  ;;  %v1994_v58 = vmul.f32 %v4082_v25, %v1954_v5  ;;  %v1952_v47 = vadd.f32 0.5, %v1932_v52  ;;  %v1937_v18 = vmul.f32 0.5, %v3173_v1  ;;  %v1873_v37 = vadd.f32 %v1872_v0, %v1760_v36 }
 0x1db   : > { %v3175_v2 = vpop.eup %3174  ;;  %3186 = vtanh.f32 %v1900_v57  ;;  %v2718_v17 = vadd.f32 %v2717_v32, %v2716_v21  ;;  %v2847_v34 = vpop.f32.mrf.mxu1  ;;  %v1420_v25 = vmul.f32 0.5, %v4099_v49  ;;  %v1439_v42 = vadd.f32 0.5, %v1419_v46 }
 0x1dc   : > { %v2719_v19 = vpop.f32.mrf.mxu0  ;;  %v2417_v3 = vpack.c.bf16 %v1994_v58, %v1993_v20  ;;  %v1992_v50 = vmul.f32 %v4084_v35, %v1952_v47  ;;  %v1935_v29 = vmul.f32 0.5, %v3175_v2  ;;  %3188 = vtanh.f32 %v1455_v59 }
 0x1dd   : > { %v1903_v45 = vmul.f32 0.5, %v1873_v37  ;;  %v1768_v27 = vadd.f32 %v2718_v17, %v4037_v22  ;;  %v1875_v38 = vpop.f32.mrf.mxu1  ;;  %v1957_v16 = vadd.f32 0.5, %v1937_v18  ;;  %v1458_v51 = vmul.f32 %v4024_v28, %v1438_v44 }
 0x1de   : > { %v2720_v31 = vpop.f32.mrf.mxu0  ;;  %v3177_v6 = vpop.eup %3176  ;;  %2451 = vst [vmem:[%s4125_s28 + $0x18] sm:$0xff] %v2417_v3   ;;  %v2412_v26 = vpack.c.bf16 %v1992_v50, %v1991_v10  ;;  %v1876_v30 = vadd.f32 %v1875_v38, %v1763_v48  ;;  %v1421_v49 = vmul.f32 0.5, %v4113_v8  ;;  %v1955_v23 = vadd.f32 0.5, %v1935_v29 }
 0x1df   : > { %v1938_v39 = vmul.f32 0.5, %v3177_v6  ;;  %3190 = vtanh.f32 %v1903_v45  ;;  %v1881_v35 = vadd.f32 %v2846_v7, %v1768_v27  ;;  %v2721_v55 = vadd.f32 %v2720_v31, %v2719_v19 }
 0x1e0   : > { %v3179_v33 = vpop.eup %3178  ;;  %2450 = vst [vmem:[%s4125_s28 + $0x10] sm:$0xff] %v2412_v26   ;;  %v1904_v59 = vmul.f32 0.5, %v1876_v30  ;;  %v1440_v9 = vadd.f32 0.5, %v1420_v25  ;;  %v1459_v62 = vmul.f32 %v4030_v24, %v1439_v42  ;;  %v1997_v7 = vmul.f32 %v4087_v11, %v1957_v16 }
 0x1e1   : > { %v1958_v13 = vadd.f32 0.5, %v1938_v39  ;;  %v1936_v54 = vmul.f32 0.5, %v3179_v33  ;;  %v1905_v53 = vmul.f32 0.5, %v1881_v35  ;;  %v1771_v12 = vadd.f32 %v2721_v55, %v4037_v22 }
 0x1e2   : > { %v3181_v40 = vpop.eup %3180  ;;  %3192 = vtanh.f32 %v1904_v59  ;;  %v1441_v52 = vadd.f32 0.5, %v1421_v49  ;;  %v1995_v22 = vmul.f32 %v4091_v43, %v1955_v23 }
 0x1e3   : > { %v1998_v21 = vmul.f32 %v4094_v56, %v1958_v13  ;;  %v1956_v28 = vadd.f32 0.5, %v1936_v54  ;;  %v1941_v8 = vmul.f32 0.5, %v3181_v40  ;;  %3194 = vtanh.f32 %v1905_v53 }
 0x1e4   : > { %v3183_v5 = vpop.eup %3182  ;;  %3196 = vtanh.f32 %v1458_v51  ;;  %v1884_v63 = vadd.f32 %v2847_v34, %v1771_v12  ;;  %v1460_v56 = vmul.f32 %v4042_v60, %v1440_v9  ;;  %v1461_v58 = vmul.f32 %v4046_v4, %v1441_v52 }
 0x1e5   : > { %v2427_v36 = vpack.c.bf16 %v1998_v21, %v1997_v7  ;;  %v1996_v1 = vmul.f32 %v4110_v15, %v1956_v28  ;;  %v1939_v24 = vmul.f32 0.5, %v3183_v5  ;;  %3198 = vtanh.f32 %v1459_v62 }
 0x1e6   : > { %v3185_v46 = vpop.eup %3184  ;;  %v1906_v11 = vmul.f32 0.5, %v1884_v63  ;;  %v1961_v57 = vadd.f32 0.5, %v1941_v8 }
 0x1e7   : > { %2453 = vst [vmem:[%s4125_s28 + $0x28] sm:$0xff] %v2427_v36   ;;  %v2422_v20 = vpack.c.bf16 %v1996_v1, %v1995_v22  ;;  %v1942_v0 = vmul.f32 0.5, %v3185_v46  ;;  %v1959_v43 = vadd.f32 0.5, %v1939_v24 }
 0x1e8   : > { %v3187_v32 = vpop.eup %3186  ;;  %3200 = vtanh.f32 %v1906_v11  ;;  %v2001_v37 = vmul.f32 %v4118_v41, %v1961_v57 }
 0x1e9   : > { %2452 = vst [vmem:[%s4125_s28 + $0x20] sm:$0xff] %v2422_v20   ;;  %v1962_v47 = vadd.f32 0.5, %v1942_v0  ;;  %v1940_v18 = vmul.f32 0.5, %v3187_v32  ;;  %v3189_v15 = vpop.eup %3188  ;;  %3202 = vtanh.f32 %v1460_v56  ;;  %v1999_v10 = vmul.f32 %v4129_v14, %v1959_v43 }
 0x1ea   : > { %3204 = vtanh.f32 %v1461_v58 }
 0x1eb   : > { %v2002_v60 = vmul.f32 %v4134_v61, %v1962_v47  ;;  %v1960_v2 = vadd.f32 0.5, %v1940_v18 }
 0x1ec   : > { %v3191_v44 = vpop.eup %3190 }
 0x1ed   : > { %v2437_v17 = vpack.c.bf16 %v2002_v60, %v2001_v37  ;;  %v2000_v4 = vmul.f32 %v3189_v15, %v1960_v2  ;;  %v1943_v34 = vmul.f32 0.5, %v3191_v44 }
 0x1ef   : > { %v3193_v19 = vpop.eup %3192  ;;  %2455 = vst [vmem:[%s4125_s28 + $0x38] sm:$0xff] %v2437_v17   ;;  %v2432_v3 = vpack.c.bf16 %v2000_v4, %v1999_v10  ;;  %v1963_v29 = vadd.f32 0.5, %v1943_v34 }
 0x1f0   : > { %v3195_v50 = vpop.eup %3194  ;;  %v1944_v48 = vmul.f32 0.5, %v3193_v19 }
 0x1f1   : > { %v3197_v25 = vpop.eup %3196  ;;  %2454 = vst [vmem:[%s4125_s28 + $0x30] sm:$0xff] %v2432_v3   ;;  %v1945_v41 = vmul.f32 0.5, %v3195_v50 }
 0x1f2   : > { %v1964_v61 = vadd.f32 0.5, %v1944_v48  ;;  %v3199_v45 = vpop.eup %3198  ;;  %v2003_v27 = vmul.f32 %v3197_v25, %v1963_v29 }
 0x1f3   : > { %v1965_v14 = vadd.f32 0.5, %v1945_v41 }
 0x1f4   : > { %v2004_v38 = vmul.f32 %v3199_v45, %v1964_v61 }
 0x1f5   : > { %v3201_v31 = vpop.eup %3200 }
 0x1f6   : > { %v2442_v6 = vpack.c.bf16 %v2004_v38, %v2003_v27  ;;  %v1946_v42 = vmul.f32 0.5, %v3201_v31  ;;  %v3203_v26 = vpop.eup %3202 }
 0x1f7   : > { %v3205_v30 = vpop.eup %3204  ;;  %v2005_v39 = vmul.f32 %v3203_v26, %v1965_v14 }
 0x1f8   : > { %2456 = vst [vmem:[%s4125_s28 + $0x40] sm:$0xff] %v2442_v6   ;;  %v1966_v16 = vadd.f32 0.5, %v1946_v42 }
 0x1fa   : > { %v2006_v35 = vmul.f32 %v3205_v30, %v1966_v16 }
 0x1fc   : > { %v2447_v55 = vpack.c.bf16 %v2006_v35, %v2005_v39 }
 0x1fe   : > { %2457 = vst [vmem:[%s4125_s28 + $0x48] sm:$0xff] %v2447_v55  }
 0x1ff PF: > { %s19_s17 = sadd.s32 1, %s3316_s17   ;;  %s4195_s12 = smov %s3300_s13 }
 0x200   : > { %p16_p7 = scmp.ge.s32.totalorder %s19_s17, 4   ;;  %s4196_s13 = smov %s3304_s14 }
 0x201   : > { %s4197_s14 = smov %s3387_s23  ;;  %s4198_s15 = smov %s3312_s16 }
 0x202   : > { %s4199_s16 = smov %s4201_s19  ;;  %18 = sbr.rel (!%p16_p7) target bundleno = 6 (0x6), region = 88 }
 0x207   :  { %2137 = vsyncpa [#allocation3], 1 }
 0x208   :  { %2139 = vsyncpa [#allocation3 + $0x1], 1 }
 0x209   :  { %2140 = vsyncpa [#allocation5], 1 }
 0x20a   :  { %2142 = vsyncpa [#allocation5 + $0x1], 1 }

// kernel: _lambda_.5
= control target key start
LH: loop header
LB: loop body
LE: loop exit
PB: predicated region body
PF: predicated region fallthrough
CT: control target
= control target key end

     0   :  { %7 = vsyncpa [#allocation4], 0  ;;  %s664_s0 = inlined_call_operand.vmem [shape: f32[2], index: 0, kind: input, shape index: {}]   ;;  %s665_s1 = inlined_call_operand.vmem [shape: f32[2,32,32], index: 1, kind: input, shape index: {}]   ;;  %s666_s2 = inlined_call_operand.hbm [shape: f32[2,32,32], index: 2, kind: output, shape index: {}]  }
   0x1   :  { %8 = vsyncpa [#allocation3], 0 }
   0x2   :  { %10 = vsyncpa [#allocation3 + $0x1], 0  ;;  %s525_s9 = smov 0   ;;  %s527_s10 = smov 0  }
   0x3   :  { %s529_s11 = smov 0   ;;  %s531_s12 = smov 0  }
   0x4   :  { %s533_s13 = smov 0   ;;  %s535_s14 = smov 0  }
   0x5 LB: > { %s319_s15 = sadd.s32 4294967295, %s504_s14   ;;  %s320_s16 = sadd.s32 4294967294, %s504_s14   ;;  %s504_s14 = sphi %s535_s14, %s16_s14   ;;  %s500_s13 = sphi %s533_s13, %s675_s13   ;;  %s496_s12 = sphi %s531_s12, %s674_s12   ;;  %s492_s11 = sphi %s529_s11, %s673_s11   ;;  %s488_s10 = sphi %s527_s10, %s672_s10   ;;  %s484_s9 = sphi %s525_s9, %s671_s9  }
   0x6   : > { %s28_s17 = sadd.s32 1, %s500_s13  ;;  %s86_s18 = sadd.s32 1, %s492_s11 }
   0x7   : > { %p30_p0 = scmp.ge.s32.totalorder %s28_s17, 2  ;;  %p96_p1 = scmp.ne.s32.totalorder %s492_s11, %s488_s10 }
   0x8   : > { %p97_p2 = scmp.eq.s32.totalorder %s319_s15, 1  ;;  %p102_p3 = scmp.ne.s32.totalorder %s488_s10, %s484_s9 }
   0x9   : > { %s677_s17 = smov (%p30_p0, %s28_s17), 0  ;;  %p103_p5 = scmp.eq.s32.totalorder %s320_s16, 1 }
   0xa   : > { %p565_p4 = por %p97_p2, %p96_p1  ;;  %s81_s20 = ssub.s32 %s500_s13, %s677_s17 }
   0xb   : > { %p321_p6 = scmp.ge.s32.totalorder %s504_s14, 1  ;;  %p84_p7 = scmp.eq.s32.totalorder %s81_s20, 0 }
   0xc   : > { %p572_p8 = por %p103_p5, %p102_p3  ;;  %p110_p9 = scmp.lt.s32.totalorder %s504_s14, 3 }
   0xd   : > { %s578_s22 = scalar_select %p84_p7, %s492_s11, %s86_s18  }
   0xe   : > { %p580_p10 = pnand %p321_p6, %p110_p9  ;;  %p584_p11 = scmp.eq.s32.totalorder %s319_s15, 0 }
   0xf   : > { %s123_s27 = sshll.u32 %s664_s0, 4  ;;  %s124_s27 = int_to_ptr.vmem [resolvable:$true] %s123_s27 }
  0x10   : > { %p347_p12 = pneg %p580_p10  ;;  %s409_s28 = scalar_lea.vmem %s124_s27, 16 }
  0x11   : > { %p410_p0 = scmp.ne.s32.totalorder %s124_s27, %s409_s28  ;;  %p417_p5 = scmp.lt.s32.totalorder %s124_s27, %s124_s27 }
  0x12   : > { %p348_p13 = pnand %p584_p11, %p347_p12  ;;  %p418_p6 = scmp.lt.s32.totalorder %s409_s28, %s409_s28 }
  0x14   : > { %p411_p1 = pneg %p348_p13  ;;  %p419_p7 = por %p418_p6, %p417_p5 }
  0x16   : > { %p412_p2 = pnand %p411_p1, %p410_p0 }
  0x18   : > { %p413_p3 = pneg %p412_p2 }
  0x1a   : > { %p420_p9 = pnand %p419_p7, %p413_p3 }
  0x1c   : > { %423 = shalt.err (!%p420_p9)
}
  0x1d   : > { %s506_s29 = smov [#allocation2]   ;;  %149 = sbr.rel (%p580_p10) target bundleno = 66 (0x42), region = 28 }
  0x1e   : > { %350 = dma.vmem_to_smem (!%p348_p13), %s124_s27, 16, %s506_s29, [#allocation4]  }
  0x22   : > { %475 = dma.done.wait (%p584_p11), [#allocation4], 16  }
  0x23   : > { %477 = vsyncadd (%p584_p11), [#allocation4], 4294967280 }
  0x24   : > { %155 = sfence }
  0x25   : > { %s173_s30 = sand.u32 1, %s488_s10   ;;  %p177_p12 = scmp.lt.s32.totalorder %s496_s12, 1  ;;  %vm207_vm0 = vcmask 261120  }
  0x26   : > { %s187_s3 = sld [smem:[#allocation2]]  ;;  %s326_s4 = sshll.u32 %s173_s30, 5 }
  0x27   : > { %s329_s5 = sld [smem:[#allocation2 + $0x1]]  ;;  %s175_s18 = scalar_lea.vmem [#allocation5], %s326_s4 }
  0x28   : > { %s178_s6 = scalar_select %p177_p12, %s496_s12, 1 }
  0x29   : > { %s228_s20 = sshll.u32 %s175_s18, 4  ;;  %s340_s23 = sshll.u32 %s496_s12, 9  ;;  %s610_s20 = int_to_ptr.vmem [resolvable:$true] %s228_s20 }
  0x2a   : > { %s339_s7 = sshll.u32 %s178_s6, 5  ;;  %s615_s26 = scalar_lea.hbm %s666_s2, %s340_s23 }
  0x2b   : > { %s184_s16 = scalar_lea.vmem %s665_s1, %s339_s7  ;;  %s619_s12 = scalar_lea.sflag [#allocation3], %s173_s30 }
  0x2c   : > { %v189_v0 = vld [vmem:[%s184_s16] sm:$0xff]  ;;  %v193_v1 = vstv %s187_s3  ;;  %v190_v2 = vld [vmem:[%s184_s16 + $0x8] sm:$0xff]  ;;  %v191_v3 = vld [vmem:[%s184_s16 + $0x10] sm:$0xff]  ;;  %s424_s27 = scalar_lea.vmem %s610_s20, 512  ;;  %s507_s28 = smov [#allocation5]  }
  0x2d   : > { %v194_v4 = vsub.f32 %v189_v0, %v193_v1  ;;  %v198_v5 = vstv %s329_s5  ;;  %v195_v6 = vsub.f32 %v190_v2, %v193_v1  ;;  %v196_v7 = vsub.f32 %v191_v3, %v193_v1  ;;  %v192_v8 = vld [vmem:[%s184_s16 + $0x18] sm:$0xff]  ;;  %p425_p10 = scmp.ne.s32.totalorder %s610_s20, %s424_s27  ;;  %s428_s29 = sshll.u32 %s507_s28, 4  ;;  %s429_s29 = int_to_ptr.vmem [resolvable:$false] %s428_s29 }
  0x2e   : > { %v197_v9 = vsub.f32 %v192_v8, %v193_v1  ;;  %s430_s3 = scalar_lea.vmem %s429_s29, 1024  ;;  %p431_p0 = scmp.lt.s32.totalorder %s610_s20, %s429_s29 }
  0x2f   : > { %v199_v10 = vmul.f32 %v198_v5, %v194_v4  ;;  %v200_v11 = vmul.f32 %v198_v5, %v195_v6  ;;  %v201_v12 = vmul.f32 %v198_v5, %v196_v7  ;;  %p426_p11 = pnand %p425_p10, %p565_p4  ;;  %p432_p1 = scmp.lt.s32.totalorder %s430_s3, %s424_s27 }
  0x30   : > { %v202_v13 = vmul.f32 %v198_v5, %v197_v9 }
  0x31   : > { %v330_v14 = vadd.f32 -1.0, %v199_v10  ;;  %v331_v15 = vadd.f32 -1.0, %v200_v11  ;;  %v332_v16 = vadd.f32 -1.0, %v201_v12  ;;  %p427_p13 = pneg %p426_p11  ;;  %p433_p2 = por %p432_p1, %p431_p0 }
  0x32   : > { %v333_v17 = vadd.f32 -1.0, %v202_v13 }
  0x33   : > { %208 = vst.msk [vmem:[%s175_s18] sm:$0xff] %vm207_vm0, %v330_v14  ;;  %209 = vst.msk [vmem:[%s175_s18 + $0x8] sm:$0xff] %vm207_vm0, %v331_v15  ;;  %p434_p3 = pnand %p433_p2, %p427_p13 }
  0x34   : > { %210 = vst.msk [vmem:[%s175_s18 + $0x10] sm:$0xff] %vm207_vm0, %v332_v16  ;;  %211 = vst.msk [vmem:[%s175_s18 + $0x18] sm:$0xff] %vm207_vm0, %v333_v17 }
  0x35   : > { %437 = shalt.err (!%p434_p3)
}
  0x36   : > { %s438_s30 = scalar_lea.hbm %s615_s26, 512  ;;  %s442_s6 = scalar_lea.hbm %s666_s2, 1024 }
  0x37   : > { %p439_p5 = scmp.ne.s32.totalorder %s615_s26, %s438_s30  ;;  %p443_p9 = scmp.lt.s32.totalorder %s615_s26, %s666_s2 }
  0x38   : > { %p444_p12 = scmp.lt.s32.totalorder %s442_s6, %s438_s30 }
  0x39   : > { %p440_p6 = pnand %p439_p5, %p565_p4 }
  0x3a   : > { %p445_p10 = por %p444_p12, %p443_p9 }
  0x3b   : > { %p441_p7 = pneg %p440_p6 }
  0x3d   : > { %p446_p11 = pnand %p445_p10, %p441_p7 }
  0x3f   : > { %449 = shalt.err (!%p446_p11)
}
  0x40   : > { %s508_s15 = smov 128   ;;  %s509_s16 = smov 8  }
  0x41   : > { %345 = dma.vmem_to_hbm [thread:$0]  (%p565_p4), %s610_s20, 512, %s615_s26, %s619_s12, %s508_s15, %s508_s15, %s509_s16  }
  0x42 PF: > { %p357_p13 = scmp.ge.s32.totalorder %s504_s14, 2  ;;  %s243_s18 = sand.u32 1, %s484_s9  }
  0x43   : > { %s244_s23 = scalar_lea.sflag [#allocation3], %s243_s18 }
  0x44   : > { %p352_p0 = pnand %p357_p13, %p572_p8 }
  0x46   : > { %p353_p1 = pneg %p352_p0 }
  0x48   : > { %479 = dma.done.wait (%p353_p1), %s244_s23, 512  }
  0x49   : > { %481 = vsyncadd (%p353_p1), %s244_s23, 4294966784  ;;  %s16_s14 = sadd.s32 1, %s504_s14   ;;  %s671_s9 = smov %s488_s10 }
  0x4a   : > { %p13_p2 = scmp.ge.s32.totalorder %s16_s14, 4   ;;  %s672_s10 = smov %s492_s11 }
  0x4b   : > { %s673_s11 = smov %s578_s22  ;;  %s674_s12 = smov %s500_s13 }
  0x4c   : > { %s675_s13 = smov %s677_s17  ;;  %15 = sbr.rel (!%p13_p2) target bundleno = 5 (0x5), region = 68 }
  0x51   :  { %249 = vsyncpa [#allocation3], 1 }
  0x52   :  { %251 = vsyncpa [#allocation3 + $0x1], 1 }
  0x53   :  { %252 = vsyncpa [#allocation4], 1 }
  0x54   :  { %254 = vsyncpa [#allocation4 + $0x1], 1 }

// kernel: _lambda_.7
= control target key start
LH: loop header
LB: loop body
LE: loop exit
PB: predicated region body
PF: predicated region fallthrough
CT: control target
= control target key end

     0   :  { %s9852_s9 = smov 0   ;;  %s9854_s10 = smov 0   ;;  %s10700_s0 = inlined_call_operand.vmem [shape: bf16[2,2,10240], index: 0, kind: input, shape index: {}]   ;;  %s10701_s1 = inlined_call_operand.vmem [shape: bf16[2,10240,128], index: 1, kind: input, shape index: {}]   ;;  %s10702_s2 = inlined_call_operand.vmem [shape: f32[2,2,128], index: 2, kind: output, shape index: {}]  }
   0x1   :  { %s9856_s11 = smov 0  }
   0x2 LB: > { %s24_s12 = sadd.s32 1, %s9829_s10  ;;  %p7608_p0 = scmp.ge.s32.totalorder %s9833_s11, 1  ;;  %s9833_s11 = sphi %s9856_s11, %s12_s11   ;;  %s9829_s10 = sphi %s9854_s10, %s10704_s10   ;;  %s9825_s9 = sphi %s9852_s9, %s10703_s9  }
   0x3   : > { %p26_p1 = scmp.ge.s32.totalorder %s24_s12, 2  ;;  %p147_p2 = scmp.lt.s32.totalorder %s9833_s11, 3 }
   0x5   : > { %s10706_s12 = smov (%p26_p1, %s24_s12), 0  ;;  %p148_p3 = pnand %p7608_p0, %p147_p2 }
   0x6   : > { %p181_p4 = scmp.lt.s32.totalorder (!%p148_p3), %s9825_s9, 1 }
   0x7   : > { %151 = sbr.rel (%p148_p3) target bundleno = 862 (0x35e), region = 28 }
   0xc   : > { %s10708_s9 = smov (!%p181_p4, %s9825_s9), 1  ;;  %v1514_v21 = vlaneseq  ;;  %v9835_v23 = vmov 1966171168  }
   0xd   : > { %s9134_s13 = smul.u32 5120, %s10708_s9  ;;  %v1512_v24 = vunpack.c.l.s4 %v9835_v23  ;;  %s7610_s21 = sshll.u32 %s10708_s9, 1 }
   0xe   : > { %v1515_v28 = vshrl.u32 %v1514_v21, 7  ;;  %s9133_s17 = smul.u32 80, %s10708_s9  ;;  %s10686_s24 = scalar_lea.vmem %s10702_s2, %s7610_s21 }
   0xf   : > { %s9876_s16 = scalar_lea.vmem %s10701_s1, %s9134_s13  ;;  %v1513_v30 = vunpack.c.0.s8 %v1512_v24 }
  0x10   : > { %v9161_v0 = vld [vmem:[%s9876_s16 + $0x78] sm:$0xff]   ;;  %v9165_v4 = vld [vmem:[%s9876_s16 + $0x70] sm:$0xff]   ;;  %v9169_v8 = vld [vmem:[%s9876_s16 + $0x68] sm:$0xff]   ;;  %s9912_s20 = scalar_lea.vmem %s10700_s0, %s9133_s17 }
  0x11   : > { %v9162_v1 = vld [vmem:[%s9876_s16 + $0xf8] sm:$0xff]   ;;  %8253 = vmatprep.subr.bf16.mxu0 %v9161_v0  ;;  %v9166_v5 = vld [vmem:[%s9876_s16 + $0xf0] sm:$0xff]   ;;  %v9170_v9 = vld [vmem:[%s9876_s16 + $0xe8] sm:$0xff]   ;;  %v9914_v35 = vsub.s32 %v1513_v30, %v1515_v28 }
  0x12   : > { %v9163_v2 = vld [vmem:[%s9876_s16 + $0x38] sm:$0xff]   ;;  %8275 = vmatprep.subr.bf16.mxu1 %v9162_v1  ;;  %v9167_v6 = vld [vmem:[%s9876_s16 + $0x30] sm:$0xff]   ;;  %v9171_v10 = vld [vmem:[%s9876_s16 + $0x28] sm:$0xff]  }
  0x13   : > { %v9164_v3 = vld [vmem:[%s9876_s16 + $0xb8] sm:$0xff]   ;;  %8254 = vmatpush3.bf16.msra.mxu0 %v9163_v2  ;;  %v9168_v7 = vld [vmem:[%s9876_s16 + $0xb0] sm:$0xff]   ;;  %v9172_v11 = vld [vmem:[%s9876_s16 + $0xa8] sm:$0xff]  }
  0x14   : > { %8276 = vmatpush3.bf16.msra.mxu1 %v9164_v3  ;;  %8255 = vmatprep.subr.bf16.mxu0 %v9165_v4  ;;  %v9173_v12 = vld [vmem:[%s9876_s16 + $0x60] sm:$0xff]   ;;  %v9177_v16 = vld [vmem:[%s9876_s16 + $0x58] sm:$0xff]   ;;  %v9181_v20 = vld [vmem:[%s9876_s16 + $0x50] sm:$0xff]  }
  0x15   : > { %8277 = vmatprep.subr.bf16.mxu1 %v9166_v5  ;;  %v9174_v13 = vld [vmem:[%s9876_s16 + $0xe0] sm:$0xff]   ;;  %v9178_v17 = vld [vmem:[%s9876_s16 + $0xd8] sm:$0xff]   ;;  %v9182_v22 = vld [vmem:[%s9876_s16 + $0xd0] sm:$0xff]  }
  0x16   : > { %v9175_v14 = vld [vmem:[%s9876_s16 + $0x20] sm:$0xff]   ;;  %v9179_v18 = vld [vmem:[%s9876_s16 + $0x18] sm:$0xff]   ;;  %v9183_v25 = vld [vmem:[%s9876_s16 + $0x10] sm:$0xff]  }
  0x17   : > { %8256 = vmatpush3.bf16.msra.mxu0 %v9167_v6  ;;  %v9176_v15 = vld [vmem:[%s9876_s16 + $0xa0] sm:$0xff]   ;;  %v9180_v19 = vld [vmem:[%s9876_s16 + $0x98] sm:$0xff]   ;;  %v9184_v26 = vld [vmem:[%s9876_s16 + $0x90] sm:$0xff]  }
  0x18   : > { %8278 = vmatpush3.bf16.msra.mxu1 %v9168_v7  ;;  %8257 = vmatprep.subr.bf16.mxu0 %v9169_v8  ;;  %v9185_v27 = vld [vmem:[%s9876_s16 + $0x48] sm:$0xff]   ;;  %v9189_v33 = vld [vmem:[%s9876_s16 + $0x40] sm:$0xff]   ;;  %v9194_v41 = vld [vmem:[%s9876_s16 + $0x178] sm:$0xff]  }
  0x19   : > { %8279 = vmatprep.subr.bf16.mxu1 %v9170_v9  ;;  %v9186_v29 = vld [vmem:[%s9876_s16 + $0xc8] sm:$0xff]   ;;  %v9190_v34 = vld [vmem:[%s9876_s16 + $0xc0] sm:$0xff]   ;;  %v9195_v42 = vld [vmem:[%s9876_s16 + $0x1f8] sm:$0xff]  }
  0x1a   : > { %v9187_v31 = vld [vmem:[%s9876_s16 + $0x8] sm:$0xff]   ;;  %v9191_v36 = vld [vmem:[%s9876_s16] sm:$0xff]   ;;  %v9196_v46 = vld [vmem:[%s9876_s16 + $0x138] sm:$0xff]  }
  0x1b   : > { %8258 = vmatpush3.bf16.msra.mxu0 %v9171_v10  ;;  %v9188_v32 = vld [vmem:[%s9876_s16 + $0x88] sm:$0xff]   ;;  %v9192_v37 = vld [vmem:[%s9876_s16 + $0x80] sm:$0xff]   ;;  %v9197_v48 = vld [vmem:[%s9876_s16 + $0x1b8] sm:$0xff]  }
  0x1c   : > { %8280 = vmatpush3.bf16.msra.mxu1 %v9172_v11  ;;  %8259 = vmatprep.subr.bf16.mxu0 %v9173_v12  ;;  %v210_v38 = vld [vmem:[%s9912_s20] sm:$0xff]  ;;  %v9198_v51 = vld [vmem:[%s9876_s16 + $0x170] sm:$0xff]   ;;  %v9202_v58 = vld [vmem:[%s9876_s16 + $0x168] sm:$0xff]  }
  0x1d   : > { %8281 = vmatprep.subr.bf16.mxu1 %v9174_v13  ;;  %v1510_v39 = vcombine.high %v210_v38, %v210_v38  ;;  %v1517_v40 = vrot.slane %v210_v38, %v9914_v35  ;;  %v9199_v53 = vld [vmem:[%s9876_s16 + $0x1f0] sm:$0xff]   ;;  %v9203_v59 = vld [vmem:[%s9876_s16 + $0x1e8] sm:$0xff]   ;;  %v9206_v62 = vld [vmem:[%s9876_s16 + $0x160] sm:$0xff]  }
  0x1e   : > { %v9200_v55 = vld [vmem:[%s9876_s16 + $0x130] sm:$0xff]   ;;  %v9204_v60 = vld [vmem:[%s9876_s16 + $0x128] sm:$0xff]   ;;  %v9207_v63 = vld [vmem:[%s9876_s16 + $0x1e0] sm:$0xff]  }
  0x1f   : > { %8260 = vmatpush3.bf16.msra.mxu0 %v9175_v14  ;;  %v1525_v43 = vcombine.high %v1517_v40, %v1517_v40  ;;  %v1533_v44 = vrot.slane %v1517_v40, %v9914_v35  ;;  %v9924_v45 = vrot.slane %v1510_v39, %v9914_v35  ;;  %v9201_v56 = vld [vmem:[%s9876_s16 + $0x1b0] sm:$0xff]   ;;  %v9205_v61 = vld [vmem:[%s9876_s16 + $0x1a8] sm:$0xff]   ;;  %v9208_v0 = vld [vmem:[%s9876_s16 + $0x120] sm:$0xff]  }
  0x20   : > { %8282 = vmatpush3.bf16.msra.mxu1 %v9176_v15  ;;  %8261 = vmatprep.subr.bf16.mxu0 %v9177_v16  ;;  %v9209_v1 = vld [vmem:[%s9876_s16 + $0x1a0] sm:$0xff]   ;;  %v9210_v2 = vld [vmem:[%s9876_s16 + $0x158] sm:$0xff]   ;;  %v9214_v6 = vld [vmem:[%s9876_s16 + $0x150] sm:$0xff]  }
  0x21   : > { %8283 = vmatprep.subr.bf16.mxu1 %v9178_v17  ;;  %v1547_v47 = vrot.slane %v1525_v43, %v9914_v35  ;;  %v1526_v49 = vcombine.high %v9924_v45, %v9924_v45  ;;  %v1555_v50 = vcombine.high %v1533_v44, %v1533_v44  ;;  %v9211_v3 = vld [vmem:[%s9876_s16 + $0x1d8] sm:$0xff]   ;;  %v9215_v7 = vld [vmem:[%s9876_s16 + $0x1d0] sm:$0xff]   ;;  %v9218_v10 = vld [vmem:[%s9876_s16 + $0x148] sm:$0xff]  }
  0x22   : > { %v9212_v4 = vld [vmem:[%s9876_s16 + $0x118] sm:$0xff]   ;;  %v9216_v8 = vld [vmem:[%s9876_s16 + $0x110] sm:$0xff]   ;;  %v9219_v11 = vld [vmem:[%s9876_s16 + $0x1c8] sm:$0xff]  }
  0x23   : > { %8262 = vmatpush3.bf16.msra.mxu0 %v9179_v18  ;;  %5952 = vmatprep.mubr.bf16.mxu0 %v1547_v47  ;;  %v1557_v52 = vcombine.high %v1547_v47, %v1547_v47  ;;  %v1554_v54 = vrot.slane %v1526_v49, %v9914_v35  ;;  %v9213_v5 = vld [vmem:[%s9876_s16 + $0x198] sm:$0xff]   ;;  %v9217_v9 = vld [vmem:[%s9876_s16 + $0x190] sm:$0xff]   ;;  %v9220_v12 = vld [vmem:[%s9876_s16 + $0x108] sm:$0xff]   ;;  %v1540_v18 = vrot.slane %v9924_v45, %v9914_v35 }
  0x24   : > { %8284 = vmatpush3.bf16.msra.mxu1 %v9180_v19  ;;  %8263 = vmatprep.subr.bf16.mxu0 %v9181_v20  ;;  %v9221_v13 = vld [vmem:[%s9876_s16 + $0x188] sm:$0xff]   ;;  %v9222_v14 = vld [vmem:[%s9876_s16 + $0x140] sm:$0xff]   ;;  %v9226_v19 = vld [vmem:[%s9876_s16 + $0x278] sm:$0xff]  }
  0x25   : > { %8285 = vmatprep.subr.bf16.mxu1 %v9182_v22  ;;  %5992 = vmatprep.mubr.bf16.mxu1 %v1557_v52  ;;  %v1558_v57 = vcombine.high %v1554_v54, %v1554_v54  ;;  %v9223_v15 = vld [vmem:[%s9876_s16 + $0x1c0] sm:$0xff]   ;;  %v9227_v20 = vld [vmem:[%s9876_s16 + $0x2f8] sm:$0xff]   ;;  %v1556_v23 = vcombine.high %v1540_v18, %v1540_v18  ;;  %v9230_v24 = vld [vmem:[%s9876_s16 + $0x270] sm:$0xff]  }
  0x26   : > { %v9224_v16 = vld [vmem:[%s9876_s16 + $0x100] sm:$0xff]   ;;  %v9228_v21 = vld [vmem:[%s9876_s16 + $0x238] sm:$0xff]   ;;  %v9234_v28 = vld [vmem:[%s9876_s16 + $0x268] sm:$0xff]  }
  0x27   : > { %8264 = vmatpush3.bf16.msra.mxu0 %v9183_v25  ;;  %v9225_v17 = vld [vmem:[%s9876_s16 + $0x180] sm:$0xff]   ;;  %v9229_v22 = vld [vmem:[%s9876_s16 + $0x2b8] sm:$0xff]   ;;  %v9231_v25 = vld [vmem:[%s9876_s16 + $0x2f0] sm:$0xff]  }
  0x28   : > { %8286 = vmatpush3.bf16.msra.mxu1 %v9184_v26  ;;  %8265 = vmatprep.subr.bf16.mxu0 %v9185_v27  ;;  %v9232_v26 = vld [vmem:[%s9876_s16 + $0x230] sm:$0xff]   ;;  %v9236_v30 = vld [vmem:[%s9876_s16 + $0x228] sm:$0xff]   ;;  %v9243_v38 = vld [vmem:[%s9876_s16 + $0x2d8] sm:$0xff]  }
  0x29   : > { %8287 = vmatprep.subr.bf16.mxu1 %v9186_v29  ;;  %v9233_v27 = vld [vmem:[%s9876_s16 + $0x2b0] sm:$0xff]   ;;  %v9235_v29 = vld [vmem:[%s9876_s16 + $0x2e8] sm:$0xff]   ;;  %v9244_v39 = vld [vmem:[%s9876_s16 + $0x218] sm:$0xff]  }
  0x2a   : > { %v9245_v40 = vld [vmem:[%s9876_s16 + $0x298] sm:$0xff]   ;;  %v9248_v43 = vld [vmem:[%s9876_s16 + $0x210] sm:$0xff]   ;;  %v9250_v45 = vld [vmem:[%s9876_s16 + $0x248] sm:$0xff]  }
  0x2b   : > { %8266 = vmatpush3.bf16.msra.mxu0 %v9187_v31  ;;  %v9237_v31 = vld [vmem:[%s9876_s16 + $0x2a8] sm:$0xff]   ;;  %v9254_v49 = vld [vmem:[%s9876_s16 + $0x240] sm:$0xff]  }
  0x2c   : > { %8288 = vmatpush3.bf16.msra.mxu1 %v9188_v32  ;;  %8267 = vmatprep.subr.bf16.mxu0 %v9189_v33  ;;  %v9238_v32 = vld [vmem:[%s9876_s16 + $0x260] sm:$0xff]   ;;  %v9252_v47 = vld [vmem:[%s9876_s16 + $0x208] sm:$0xff]  }
  0x2d   : > { %8289 = vmatprep.subr.bf16.mxu1 %v9190_v34  ;;  %v9239_v33 = vld [vmem:[%s9876_s16 + $0x2e0] sm:$0xff]   ;;  %v211_v52 = vld [vmem:[%s9912_s20 + $0x8] sm:$0xff] }
  0x2e   : > { %v9240_v34 = vld [vmem:[%s9876_s16 + $0x220] sm:$0xff]  }
  0x2f   : > { %8268 = vmatpush3.bf16.msra.mxu0 %v9191_v36  ;;  %v9241_v36 = vld [vmem:[%s9876_s16 + $0x2a0] sm:$0xff]  }
  0x30   : > { %8290 = vmatpush3.bf16.msra.mxu1 %v9192_v37  ;;  %8297 = vmatprep.subr.bf16.mxu0 %v9194_v41  ;;  %v9242_v37 = vld [vmem:[%s9876_s16 + $0x258] sm:$0xff]   ;;  %v9246_v41 = vld [vmem:[%s9876_s16 + $0x250] sm:$0xff]  }
  0x31   : > { %8319 = vmatprep.subr.bf16.mxu1 %v9195_v42  ;;  %v9247_v42 = vld [vmem:[%s9876_s16 + $0x2d0] sm:$0xff]  }
  0x32   : > { %5953 = vmatmul.mubr.bf16.vlgmr.msra.gmra.mxu0 %v1533_v44  ;;  %v9249_v44 = vld [vmem:[%s9876_s16 + $0x290] sm:$0xff]  }
  0x33   : > { %8298 = vmatpush3.bf16.msra.mxu0 %v9196_v46  ;;  %5993 = vmatmul.mubr.bf16.vlgmr.msra.gmra.mxu1 %v1555_v50  ;;  %v9251_v46 = vld [vmem:[%s9876_s16 + $0x2c8] sm:$0xff]   ;;  %v9255_v50 = vld [vmem:[%s9876_s16 + $0x2c0] sm:$0xff]  }
  0x34   : > { %8299 = vmatprep.subr.bf16.mxu0 %v9198_v51  ;;  %8320 = vmatpush3.bf16.msra.mxu1 %v9197_v48  ;;  %v9253_v48 = vld [vmem:[%s9876_s16 + $0x288] sm:$0xff]   ;;  %v9256_v51 = vld [vmem:[%s9876_s16 + $0x200] sm:$0xff]  }
  0x35   : > { %6032 = vmatprep.mubr.bf16.mxu0 %v1554_v54  ;;  %8321 = vmatprep.subr.bf16.mxu1 %v9199_v53  ;;  %v9257_v53 = vld [vmem:[%s9876_s16 + $0x280] sm:$0xff]   ;;  %v1566_v54 = vrot.slane %v211_v52, %v9914_v35 }
  0x36   : > { %6072 = vmatprep.mubr.bf16.mxu1 %v1558_v57 }
  0x37   : > { %8300 = vmatpush3.bf16.msra.mxu0 %v9200_v55  ;;  %v1559_v55 = vcombine.high %v211_v52, %v211_v52  ;;  %v1574_v57 = vcombine.high %v1566_v54, %v1566_v54  ;;  %v9307_v52 = vld [vmem:[%s9876_s16 + $0x458] sm:$0xff]  }
  0x38   : > { %8301 = vmatprep.subr.bf16.mxu0 %v9202_v58  ;;  %8322 = vmatpush3.bf16.msra.mxu1 %v9201_v56  ;;  %v9258_v56 = vld [vmem:[%s9876_s16 + $0x378] sm:$0xff]   ;;  %v1582_v58 = vrot.slane %v1566_v54, %v9914_v35 }
  0x39   : > { %8323 = vmatprep.subr.bf16.mxu1 %v9203_v59  ;;  %v9259_v59 = vld [vmem:[%s9876_s16 + $0x3f8] sm:$0xff]  }
  0x3a   : > { %v9309_v54 = vld [vmem:[%s9876_s16 + $0x418] sm:$0xff]  }
  0x3b   : > { %8302 = vmatpush3.bf16.msra.mxu0 %v9204_v60  ;;  %v10000_v60 = vrot.slane %v1559_v55, %v9914_v35  ;;  %v9310_v55 = vld [vmem:[%s9876_s16 + $0x498] sm:$0xff]  }
  0x3c   : > { %8303 = vmatprep.subr.bf16.mxu0 %v9206_v62  ;;  %8324 = vmatpush3.bf16.msra.mxu1 %v9205_v61  ;;  %v9260_v61 = vld [vmem:[%s9876_s16 + $0x338] sm:$0xff]   ;;  %v1596_v62 = vrot.slane %v1574_v57, %v9914_v35  ;;  %v9312_v57 = vld [vmem:[%s9876_s16 + $0x4d0] sm:$0xff]  }
  0x3d   : > { %8325 = vmatprep.subr.bf16.mxu1 %v9207_v63  ;;  %v9261_v63 = vld [vmem:[%s9876_s16 + $0x3b8] sm:$0xff]  }
  0x3f   : > { %8304 = vmatpush3.bf16.msra.mxu0 %v9208_v0  ;;  %v1575_v0 = vcombine.high %v10000_v60, %v10000_v60 }
  0x40   : > { %8305 = vmatprep.subr.bf16.mxu0 %v9210_v2  ;;  %8326 = vmatpush3.bf16.msra.mxu1 %v9209_v1  ;;  %v1604_v1 = vcombine.high %v1582_v58, %v1582_v58  ;;  %v9262_v2 = vld [vmem:[%s9876_s16 + $0x370] sm:$0xff]  }
  0x41   : > { %8327 = vmatprep.subr.bf16.mxu1 %v9211_v3  ;;  %v1606_v3 = vcombine.high %v1596_v62, %v1596_v62 }
  0x43   : > { %8306 = vmatpush3.bf16.msra.mxu0 %v9212_v4  ;;  %v9263_v4 = vld [vmem:[%s9876_s16 + $0x3f0] sm:$0xff]  }
  0x44   : > { %8307 = vmatprep.subr.bf16.mxu0 %v9214_v6  ;;  %8328 = vmatpush3.bf16.msra.mxu1 %v9213_v5  ;;  %v1603_v5 = vrot.slane %v1575_v0, %v9914_v35  ;;  %v9264_v6 = vld [vmem:[%s9876_s16 + $0x330] sm:$0xff]   ;;  %v9319_v0 = vld [vmem:[%s9876_s16 + $0x440] sm:$0xff]  }
  0x45   : > { %8329 = vmatprep.subr.bf16.mxu1 %v9215_v7  ;;  %v9265_v7 = vld [vmem:[%s9876_s16 + $0x3b0] sm:$0xff]  }
  0x47   : > { %8308 = vmatpush3.bf16.msra.mxu0 %v9216_v8  ;;  %v1607_v8 = vcombine.high %v1603_v5, %v1603_v5 }
  0x48   : > { %8309 = vmatprep.subr.bf16.mxu0 %v9218_v10  ;;  %8330 = vmatpush3.bf16.msra.mxu1 %v9217_v9  ;;  %v9266_v9 = vld [vmem:[%s9876_s16 + $0x368] sm:$0xff]  }
  0x49   : > { %8331 = vmatprep.subr.bf16.mxu1 %v9219_v11  ;;  %v9267_v10 = vld [vmem:[%s9876_s16 + $0x3e8] sm:$0xff]  }
  0x4a   : > { %v9268_v11 = vld [vmem:[%s9876_s16 + $0x328] sm:$0xff]  }
  0x4b   : > { %8310 = vmatpush3.bf16.msra.mxu0 %v9220_v12  ;;  %v9269_v12 = vld [vmem:[%s9876_s16 + $0x3a8] sm:$0xff]  }
  0x4c   : > { %8311 = vmatprep.subr.bf16.mxu0 %v9222_v14  ;;  %8332 = vmatpush3.bf16.msra.mxu1 %v9221_v13  ;;  %v9270_v13 = vld [vmem:[%s9876_s16 + $0x360] sm:$0xff]  }
  0x4d   : > { %8333 = vmatprep.subr.bf16.mxu1 %v9223_v15  ;;  %v9271_v14 = vld [vmem:[%s9876_s16 + $0x3e0] sm:$0xff]  }
  0x4e   : > { %v9272_v15 = vld [vmem:[%s9876_s16 + $0x320] sm:$0xff]  }
  0x4f   : > { %8312 = vmatpush3.bf16.msra.mxu0 %v9224_v16  ;;  %v9273_v16 = vld [vmem:[%s9876_s16 + $0x3a0] sm:$0xff]  }
  0x50   : > { %8341 = vmatprep.subr.bf16.mxu0 %v9226_v19  ;;  %8334 = vmatpush3.bf16.msra.mxu1 %v9225_v17  ;;  %v9274_v17 = vld [vmem:[%s9876_s16 + $0x358] sm:$0xff]  }
  0x51   : > { %8363 = vmatprep.subr.bf16.mxu1 %v9227_v20  ;;  %v9276_v19 = vld [vmem:[%s9876_s16 + $0x318] sm:$0xff]  }
  0x52   : > { %6033 = vmatmul.mubr.bf16.vlgmr.msra.gmra.mxu0 %v1540_v18  ;;  %v9275_v18 = vld [vmem:[%s9876_s16 + $0x3d8] sm:$0xff]  }
  0x53   : > { %8342 = vmatpush3.bf16.msra.mxu0 %v9228_v21  ;;  %6073 = vmatmul.mubr.bf16.vlgmr.msra.gmra.mxu1 %v1556_v23  ;;  %v9277_v20 = vld [vmem:[%s9876_s16 + $0x398] sm:$0xff]   ;;  %v9278_v21 = vld [vmem:[%s9876_s16 + $0x350] sm:$0xff]  }
  0x54   : > { %8343 = vmatprep.subr.bf16.mxu0 %v9230_v24  ;;  %8364 = vmatpush3.bf16.msra.mxu1 %v9229_v22  ;;  %v9279_v22 = vld [vmem:[%s9876_s16 + $0x3d0] sm:$0xff]  }
  0x55   : > { %8365 = vmatprep.subr.bf16.mxu1 %v9231_v25  ;;  %6112 = vmatprep.mubr.bf16.mxu0 %v1596_v62  ;;  %v9280_v23 = vld [vmem:[%s9876_s16 + $0x310] sm:$0xff]   ;;  %v9282_v25 = vld [vmem:[%s9876_s16 + $0x348] sm:$0xff]  }
  0x56   : > { %6152 = vmatprep.mubr.bf16.mxu1 %v1606_v3  ;;  %v9281_v24 = vld [vmem:[%s9876_s16 + $0x390] sm:$0xff]   ;;  %v9317_v62 = vld [vmem:[%s9876_s16 + $0x408] sm:$0xff]  }
  0x57   : > { %8344 = vmatpush3.bf16.msra.mxu0 %v9232_v26  ;;  %v9283_v26 = vld [vmem:[%s9876_s16 + $0x3c8] sm:$0xff]   ;;  %v212_v3 = vld [vmem:[%s9912_s20 + $0x10] sm:$0xff] }
  0x58   : > { %8345 = vmatprep.subr.bf16.mxu0 %v9234_v28  ;;  %8366 = vmatpush3.bf16.msra.mxu1 %v9233_v27  ;;  %v9284_v27 = vld [vmem:[%s9876_s16 + $0x308] sm:$0xff]  }
  0x59   : > { %8367 = vmatprep.subr.bf16.mxu1 %v9235_v29  ;;  %v9285_v28 = vld [vmem:[%s9876_s16 + $0x388] sm:$0xff]   ;;  %v9286_v29 = vld [vmem:[%s9876_s16 + $0x340] sm:$0xff]  }
  0x5b   : > { %8346 = vmatpush3.bf16.msra.mxu0 %v9236_v30  ;;  %v9287_v30 = vld [vmem:[%s9876_s16 + $0x3c0] sm:$0xff]  }
  0x5c   : > { %8347 = vmatprep.subr.bf16.mxu0 %v9238_v32  ;;  %8368 = vmatpush3.bf16.msra.mxu1 %v9237_v31  ;;  %v9288_v31 = vld [vmem:[%s9876_s16 + $0x300] sm:$0xff]  }
  0x5d   : > { %8369 = vmatprep.subr.bf16.mxu1 %v9239_v33  ;;  %v9289_v32 = vld [vmem:[%s9876_s16 + $0x380] sm:$0xff]   ;;  %v1589_v33 = vrot.slane %v10000_v60, %v9914_v35  ;;  %v9315_v60 = vld [vmem:[%s9876_s16 + $0x448] sm:$0xff]  }
  0x5f   : > { %8348 = vmatpush3.bf16.msra.mxu0 %v9240_v34  ;;  %v9291_v34 = vld [vmem:[%s9876_s16 + $0x478] sm:$0xff]  }
  0x60   : > { %8349 = vmatprep.subr.bf16.mxu0 %v9242_v37  ;;  %8370 = vmatpush3.bf16.msra.mxu1 %v9241_v36  ;;  %v9292_v36 = vld [vmem:[%s9876_s16 + $0x4f8] sm:$0xff]  }
  0x61   : > { %8371 = vmatprep.subr.bf16.mxu1 %v9243_v38  ;;  %v9293_v37 = vld [vmem:[%s9876_s16 + $0x438] sm:$0xff]  }
  0x62   : > { %v9294_v38 = vld [vmem:[%s9876_s16 + $0x4b8] sm:$0xff]  }
  0x63   : > { %8350 = vmatpush3.bf16.msra.mxu0 %v9244_v39  ;;  %v1605_v39 = vcombine.high %v1589_v33, %v1589_v33 }
  0x64   : > { %8351 = vmatprep.subr.bf16.mxu0 %v9246_v41  ;;  %8372 = vmatpush3.bf16.msra.mxu1 %v9245_v40  ;;  %v9295_v40 = vld [vmem:[%s9876_s16 + $0x470] sm:$0xff]  }
  0x65   : > { %8373 = vmatprep.subr.bf16.mxu1 %v9247_v42  ;;  %v9296_v41 = vld [vmem:[%s9876_s16 + $0x4f0] sm:$0xff]  }
  0x66   : > { %v9297_v42 = vld [vmem:[%s9876_s16 + $0x430] sm:$0xff]  }
  0x67   : > { %8352 = vmatpush3.bf16.msra.mxu0 %v9248_v43  ;;  %v9298_v43 = vld [vmem:[%s9876_s16 + $0x4b0] sm:$0xff]  }
  0x68   : > { %8353 = vmatprep.subr.bf16.mxu0 %v9250_v45  ;;  %8374 = vmatpush3.bf16.msra.mxu1 %v9249_v44  ;;  %v9299_v44 = vld [vmem:[%s9876_s16 + $0x468] sm:$0xff]  }
  0x69   : > { %8375 = vmatprep.subr.bf16.mxu1 %v9251_v46  ;;  %v9300_v45 = vld [vmem:[%s9876_s16 + $0x4e8] sm:$0xff]  }
  0x6a   : > { %v9301_v46 = vld [vmem:[%s9876_s16 + $0x428] sm:$0xff]  }
  0x6b   : > { %8354 = vmatpush3.bf16.msra.mxu0 %v9252_v47  ;;  %v9302_v47 = vld [vmem:[%s9876_s16 + $0x4a8] sm:$0xff]  }
  0x6c   : > { %8355 = vmatprep.subr.bf16.mxu0 %v9254_v49  ;;  %8376 = vmatpush3.bf16.msra.mxu1 %v9253_v48  ;;  %v9303_v48 = vld [vmem:[%s9876_s16 + $0x460] sm:$0xff]  }
  0x6d   : > { %8377 = vmatprep.subr.bf16.mxu1 %v9255_v50  ;;  %v9304_v49 = vld [vmem:[%s9876_s16 + $0x4e0] sm:$0xff]  }
  0x6e   : > { %v9305_v50 = vld [vmem:[%s9876_s16 + $0x420] sm:$0xff]  }
  0x6f   : > { %8356 = vmatpush3.bf16.msra.mxu0 %v9256_v51  ;;  %v9306_v51 = vld [vmem:[%s9876_s16 + $0x4a0] sm:$0xff]  }
  0x70   : > { %8385 = vmatprep.subr.bf16.mxu0 %v9258_v56  ;;  %8378 = vmatpush3.bf16.msra.mxu1 %v9257_v53  ;;  %v9308_v53 = vld [vmem:[%s9876_s16 + $0x4d8] sm:$0xff]   ;;  %v9311_v56 = vld [vmem:[%s9876_s16 + $0x450] sm:$0xff]  }
  0x71   : > { %8407 = vmatprep.subr.bf16.mxu1 %v9259_v59  ;;  %v9314_v59 = vld [vmem:[%s9876_s16 + $0x490] sm:$0xff]  }
  0x72   : > { %6113 = vmatmul.mubr.bf16.vlgmr.msra.gmra.mxu0 %v1582_v58  ;;  %v9313_v58 = vld [vmem:[%s9876_s16 + $0x410] sm:$0xff]  }
  0x73   : > { %8386 = vmatpush3.bf16.msra.mxu0 %v9260_v61  ;;  %6153 = vmatmul.mubr.bf16.vlgmr.msra.gmra.mxu1 %v1604_v1  ;;  %v9316_v61 = vld [vmem:[%s9876_s16 + $0x4c8] sm:$0xff]   ;;  %v9320_v1 = vld [vmem:[%s9876_s16 + $0x4c0] sm:$0xff]  }
  0x74   : > { %8387 = vmatprep.subr.bf16.mxu0 %v9262_v2  ;;  %8408 = vmatpush3.bf16.msra.mxu1 %v9261_v63  ;;  %v9318_v63 = vld [vmem:[%s9876_s16 + $0x488] sm:$0xff]   ;;  %v9321_v2 = vld [vmem:[%s9876_s16 + $0x400] sm:$0xff]  }
  0x75   : > { %6192 = vmatprep.mubr.bf16.mxu0 %v1603_v5  ;;  %8409 = vmatprep.subr.bf16.mxu1 %v9263_v4  ;;  %v9322_v4 = vld [vmem:[%s9876_s16 + $0x480] sm:$0xff]   ;;  %v1615_v5 = vrot.slane %v212_v3, %v9914_v35 }
  0x76   : > { %6232 = vmatprep.mubr.bf16.mxu1 %v1607_v8 }
  0x77   : > { %8388 = vmatpush3.bf16.msra.mxu0 %v9264_v6  ;;  %v1608_v6 = vcombine.high %v212_v3, %v212_v3  ;;  %v1623_v8 = vcombine.high %v1615_v5, %v1615_v5  ;;  %v9372_v3 = vld [vmem:[%s9876_s16 + $0x658] sm:$0xff]  }
  0x78   : > { %8389 = vmatprep.subr.bf16.mxu0 %v9266_v9  ;;  %8410 = vmatpush3.bf16.msra.mxu1 %v9265_v7  ;;  %v9323_v7 = vld [vmem:[%s9876_s16 + $0x578] sm:$0xff]   ;;  %v1631_v9 = vrot.slane %v1615_v5, %v9914_v35 }
  0x79   : > { %8411 = vmatprep.subr.bf16.mxu1 %v9267_v10  ;;  %v9324_v10 = vld [vmem:[%s9876_s16 + $0x5f8] sm:$0xff]  }
  0x7a   : > { %v9374_v5 = vld [vmem:[%s9876_s16 + $0x618] sm:$0xff]  }
  0x7b   : > { %8390 = vmatpush3.bf16.msra.mxu0 %v9268_v11  ;;  %v10076_v11 = vrot.slane %v1608_v6, %v9914_v35  ;;  %v9375_v6 = vld [vmem:[%s9876_s16 + $0x698] sm:$0xff]  }
  0x7c   : > { %8391 = vmatprep.subr.bf16.mxu0 %v9270_v13  ;;  %8412 = vmatpush3.bf16.msra.mxu1 %v9269_v12  ;;  %v9325_v12 = vld [vmem:[%s9876_s16 + $0x538] sm:$0xff]   ;;  %v1645_v13 = vrot.slane %v1623_v8, %v9914_v35  ;;  %v9377_v8 = vld [vmem:[%s9876_s16 + $0x6d0] sm:$0xff]  }
  0x7d   : > { %8413 = vmatprep.subr.bf16.mxu1 %v9271_v14  ;;  %v9326_v14 = vld [vmem:[%s9876_s16 + $0x5b8] sm:$0xff]  }
  0x7f   : > { %8392 = vmatpush3.bf16.msra.mxu0 %v9272_v15  ;;  %v1624_v15 = vcombine.high %v10076_v11, %v10076_v11 }
  0x80   : > { %8393 = vmatprep.subr.bf16.mxu0 %v9274_v17  ;;  %8414 = vmatpush3.bf16.msra.mxu1 %v9273_v16  ;;  %v1653_v16 = vcombine.high %v1631_v9, %v1631_v9  ;;  %v9327_v17 = vld [vmem:[%s9876_s16 + $0x570] sm:$0xff]  }
  0x81   : > { %8415 = vmatprep.subr.bf16.mxu1 %v9275_v18  ;;  %v1655_v18 = vcombine.high %v1645_v13, %v1645_v13 }
  0x83   : > { %8394 = vmatpush3.bf16.msra.mxu0 %v9276_v19  ;;  %v9328_v19 = vld [vmem:[%s9876_s16 + $0x5f0] sm:$0xff]  }
  0x84   : > { %8395 = vmatprep.subr.bf16.mxu0 %v9278_v21  ;;  %8416 = vmatpush3.bf16.msra.mxu1 %v9277_v20  ;;  %v1652_v20 = vrot.slane %v1624_v15, %v9914_v35  ;;  %v9329_v21 = vld [vmem:[%s9876_s16 + $0x530] sm:$0xff]   ;;  %v9384_v15 = vld [vmem:[%s9876_s16 + $0x640] sm:$0xff]  }
  0x85   : > { %8417 = vmatprep.subr.bf16.mxu1 %v9279_v22  ;;  %v9330_v22 = vld [vmem:[%s9876_s16 + $0x5b0] sm:$0xff]  }
  0x87   : > { %8396 = vmatpush3.bf16.msra.mxu0 %v9280_v23  ;;  %v1656_v23 = vcombine.high %v1652_v20, %v1652_v20 }
  0x88   : > { %8397 = vmatprep.subr.bf16.mxu0 %v9282_v25  ;;  %8418 = vmatpush3.bf16.msra.mxu1 %v9281_v24  ;;  %v9331_v24 = vld [vmem:[%s9876_s16 + $0x568] sm:$0xff]  }
  0x89   : > { %8419 = vmatprep.subr.bf16.mxu1 %v9283_v26  ;;  %v9332_v25 = vld [vmem:[%s9876_s16 + $0x5e8] sm:$0xff]  }
  0x8a   : > { %v9333_v26 = vld [vmem:[%s9876_s16 + $0x528] sm:$0xff]  }
  0x8b   : > { %8398 = vmatpush3.bf16.msra.mxu0 %v9284_v27  ;;  %v9334_v27 = vld [vmem:[%s9876_s16 + $0x5a8] sm:$0xff]  }
  0x8c   : > { %8399 = vmatprep.subr.bf16.mxu0 %v9286_v29  ;;  %8420 = vmatpush3.bf16.msra.mxu1 %v9285_v28  ;;  %v9335_v28 = vld [vmem:[%s9876_s16 + $0x560] sm:$0xff]  }
  0x8d   : > { %8421 = vmatprep.subr.bf16.mxu1 %v9287_v30  ;;  %v9336_v29 = vld [vmem:[%s9876_s16 + $0x5e0] sm:$0xff]  }
  0x8e   : > { %v9337_v30 = vld [vmem:[%s9876_s16 + $0x520] sm:$0xff]  }
  0x8f   : > { %8400 = vmatpush3.bf16.msra.mxu0 %v9288_v31  ;;  %v9338_v31 = vld [vmem:[%s9876_s16 + $0x5a0] sm:$0xff]  }
  0x90   : > { %8429 = vmatprep.subr.bf16.mxu0 %v9291_v34  ;;  %8422 = vmatpush3.bf16.msra.mxu1 %v9289_v32  ;;  %v9339_v32 = vld [vmem:[%s9876_s16 + $0x558] sm:$0xff]  }
  0x91   : > { %8451 = vmatprep.subr.bf16.mxu1 %v9292_v36  ;;  %v9341_v34 = vld [vmem:[%s9876_s16 + $0x518] sm:$0xff]  }
  0x92   : > { %6193 = vmatmul.mubr.bf16.vlgmr.msra.gmra.mxu0 %v1589_v33  ;;  %v9340_v33 = vld [vmem:[%s9876_s16 + $0x5d8] sm:$0xff]  }
  0x93   : > { %8430 = vmatpush3.bf16.msra.mxu0 %v9293_v37  ;;  %6233 = vmatmul.mubr.bf16.vlgmr.msra.gmra.mxu1 %v1605_v39  ;;  %v9342_v36 = vld [vmem:[%s9876_s16 + $0x598] sm:$0xff]   ;;  %v9343_v37 = vld [vmem:[%s9876_s16 + $0x550] sm:$0xff]  }
  0x94   : > { %8431 = vmatprep.subr.bf16.mxu0 %v9295_v40  ;;  %8452 = vmatpush3.bf16.msra.mxu1 %v9294_v38  ;;  %v9344_v38 = vld [vmem:[%s9876_s16 + $0x5d0] sm:$0xff]  }
  0x95   : > { %8453 = vmatprep.subr.bf16.mxu1 %v9296_v41  ;;  %6272 = vmatprep.mubr.bf16.mxu0 %v1645_v13  ;;  %v9345_v39 = vld [vmem:[%s9876_s16 + $0x510] sm:$0xff]   ;;  %v9347_v41 = vld [vmem:[%s9876_s16 + $0x548] sm:$0xff]  }
  0x96   : > { %6312 = vmatprep.mubr.bf16.mxu1 %v1655_v18  ;;  %v9346_v40 = vld [vmem:[%s9876_s16 + $0x590] sm:$0xff]   ;;  %v9382_v13 = vld [vmem:[%s9876_s16 + $0x608] sm:$0xff]   ;;  %v213_v18 = vld [vmem:[%s9912_s20 + $0x18] sm:$0xff] }
  0x97   : > { %8432 = vmatpush3.bf16.msra.mxu0 %v9297_v42  ;;  %v9348_v42 = vld [vmem:[%s9876_s16 + $0x5c8] sm:$0xff]  }
  0x98   : > { %8433 = vmatprep.subr.bf16.mxu0 %v9299_v44  ;;  %8454 = vmatpush3.bf16.msra.mxu1 %v9298_v43  ;;  %v9349_v43 = vld [vmem:[%s9876_s16 + $0x508] sm:$0xff]  }
  0x99   : > { %8455 = vmatprep.subr.bf16.mxu1 %v9300_v45  ;;  %v9350_v44 = vld [vmem:[%s9876_s16 + $0x588] sm:$0xff]   ;;  %v9351_v45 = vld [vmem:[%s9876_s16 + $0x540] sm:$0xff]  }
  0x9b   : > { %8434 = vmatpush3.bf16.msra.mxu0 %v9301_v46  ;;  %v9352_v46 = vld [vmem:[%s9876_s16 + $0x5c0] sm:$0xff]  }
  0x9c   : > { %8435 = vmatprep.subr.bf16.mxu0 %v9303_v48  ;;  %8456 = vmatpush3.bf16.msra.mxu1 %v9302_v47  ;;  %v9353_v47 = vld [vmem:[%s9876_s16 + $0x500] sm:$0xff]  }
  0x9d   : > { %8457 = vmatprep.subr.bf16.mxu1 %v9304_v49  ;;  %v9354_v48 = vld [vmem:[%s9876_s16 + $0x580] sm:$0xff]   ;;  %v1638_v49 = vrot.slane %v10076_v11, %v9914_v35  ;;  %v9380_v11 = vld [vmem:[%s9876_s16 + $0x648] sm:$0xff]  }
  0x9f   : > { %8436 = vmatpush3.bf16.msra.mxu0 %v9305_v50  ;;  %v9356_v50 = vld [vmem:[%s9876_s16 + $0x678] sm:$0xff]  }
  0xa0   : > { %8437 = vmatprep.subr.bf16.mxu0 %v9307_v52  ;;  %8458 = vmatpush3.bf16.msra.mxu1 %v9306_v51  ;;  %v9357_v51 = vld [vmem:[%s9876_s16 + $0x6f8] sm:$0xff]  }
  0xa1   : > { %8459 = vmatprep.subr.bf16.mxu1 %v9308_v53  ;;  %v9358_v52 = vld [vmem:[%s9876_s16 + $0x638] sm:$0xff]  }
  0xa2   : > { %v9359_v53 = vld [vmem:[%s9876_s16 + $0x6b8] sm:$0xff]  }
  0xa3   : > { %8438 = vmatpush3.bf16.msra.mxu0 %v9309_v54  ;;  %v1654_v54 = vcombine.high %v1638_v49, %v1638_v49 }
  0xa4   : > { %8439 = vmatprep.subr.bf16.mxu0 %v9311_v56  ;;  %8460 = vmatpush3.bf16.msra.mxu1 %v9310_v55  ;;  %v9360_v55 = vld [vmem:[%s9876_s16 + $0x670] sm:$0xff]  }
  0xa5   : > { %8461 = vmatprep.subr.bf16.mxu1 %v9312_v57  ;;  %v9361_v56 = vld [vmem:[%s9876_s16 + $0x6f0] sm:$0xff]  }
  0xa6   : > { %v9362_v57 = vld [vmem:[%s9876_s16 + $0x630] sm:$0xff]  }
  0xa7   : > { %8440 = vmatpush3.bf16.msra.mxu0 %v9313_v58  ;;  %v9363_v58 = vld [vmem:[%s9876_s16 + $0x6b0] sm:$0xff]  }
  0xa8   : > { %8441 = vmatprep.subr.bf16.mxu0 %v9315_v60  ;;  %8462 = vmatpush3.bf16.msra.mxu1 %v9314_v59  ;;  %v9364_v59 = vld [vmem:[%s9876_s16 + $0x668] sm:$0xff]  }
  0xa9   : > { %8463 = vmatprep.subr.bf16.mxu1 %v9316_v61  ;;  %v9365_v60 = vld [vmem:[%s9876_s16 + $0x6e8] sm:$0xff]  }
  0xaa   : > { %v9366_v61 = vld [vmem:[%s9876_s16 + $0x628] sm:$0xff]  }
  0xab   : > { %8442 = vmatpush3.bf16.msra.mxu0 %v9317_v62  ;;  %v9367_v62 = vld [vmem:[%s9876_s16 + $0x6a8] sm:$0xff]  }
  0xac   : > { %8443 = vmatprep.subr.bf16.mxu0 %v9319_v0  ;;  %8464 = vmatpush3.bf16.msra.mxu1 %v9318_v63  ;;  %v9368_v63 = vld [vmem:[%s9876_s16 + $0x660] sm:$0xff]  }
  0xad   : > { %8465 = vmatprep.subr.bf16.mxu1 %v9320_v1  ;;  %v9369_v0 = vld [vmem:[%s9876_s16 + $0x6e0] sm:$0xff]  }
  0xae   : > { %v9370_v1 = vld [vmem:[%s9876_s16 + $0x620] sm:$0xff]  }
  0xaf   : > { %8444 = vmatpush3.bf16.msra.mxu0 %v9321_v2  ;;  %v9371_v2 = vld [vmem:[%s9876_s16 + $0x6a0] sm:$0xff]  }
  0xb0   : > { %8473 = vmatprep.subr.bf16.mxu0 %v9323_v7  ;;  %8466 = vmatpush3.bf16.msra.mxu1 %v9322_v4  ;;  %v9373_v4 = vld [vmem:[%s9876_s16 + $0x6d8] sm:$0xff]   ;;  %v9376_v7 = vld [vmem:[%s9876_s16 + $0x650] sm:$0xff]  }
  0xb1   : > { %8495 = vmatprep.subr.bf16.mxu1 %v9324_v10  ;;  %v9379_v10 = vld [vmem:[%s9876_s16 + $0x690] sm:$0xff]  }
  0xb2   : > { %6273 = vmatmul.mubr.bf16.vlgmr.msra.gmra.mxu0 %v1631_v9  ;;  %v9378_v9 = vld [vmem:[%s9876_s16 + $0x610] sm:$0xff]  }
  0xb3   : > { %8474 = vmatpush3.bf16.msra.mxu0 %v9325_v12  ;;  %6313 = vmatmul.mubr.bf16.vlgmr.msra.gmra.mxu1 %v1653_v16  ;;  %v9381_v12 = vld [vmem:[%s9876_s16 + $0x6c8] sm:$0xff]   ;;  %v9385_v16 = vld [vmem:[%s9876_s16 + $0x6c0] sm:$0xff]  }
  0xb4   : > { %8475 = vmatprep.subr.bf16.mxu0 %v9327_v17  ;;  %8496 = vmatpush3.bf16.msra.mxu1 %v9326_v14  ;;  %v9383_v14 = vld [vmem:[%s9876_s16 + $0x688] sm:$0xff]   ;;  %v9386_v17 = vld [vmem:[%s9876_s16 + $0x600] sm:$0xff]  }
  0xb5   : > { %6352 = vmatprep.mubr.bf16.mxu0 %v1652_v20  ;;  %8497 = vmatprep.subr.bf16.mxu1 %v9328_v19  ;;  %v1664_v19 = vrot.slane %v213_v18, %v9914_v35  ;;  %v9388_v20 = vld [vmem:[%s9876_s16 + $0x778] sm:$0xff]  }
  0xb6   : > { %6392 = vmatprep.mubr.bf16.mxu1 %v1656_v23 }
  0xb7   : > { %8476 = vmatpush3.bf16.msra.mxu0 %v9329_v21  ;;  %v1657_v21 = vcombine.high %v213_v18, %v213_v18  ;;  %v1672_v23 = vcombine.high %v1664_v19, %v1664_v19 }
  0xb8   : > { %8477 = vmatprep.subr.bf16.mxu0 %v9331_v24  ;;  %8498 = vmatpush3.bf16.msra.mxu1 %v9330_v22  ;;  %v9387_v22 = vld [vmem:[%s9876_s16 + $0x680] sm:$0xff]   ;;  %v1680_v24 = vrot.slane %v1664_v19, %v9914_v35  ;;  %v9426_v19 = vld [vmem:[%s9876_s16 + $0x8f0] sm:$0xff]  }
  0xb9   : > { %8499 = vmatprep.subr.bf16.mxu1 %v9332_v25  ;;  %v9389_v25 = vld [vmem:[%s9876_s16 + $0x7f8] sm:$0xff]  }
  0xbb   : > { %8478 = vmatpush3.bf16.msra.mxu0 %v9333_v26  ;;  %v10152_v26 = vrot.slane %v1657_v21, %v9914_v35 }
  0xbc   : > { %8479 = vmatprep.subr.bf16.mxu0 %v9335_v28  ;;  %8500 = vmatpush3.bf16.msra.mxu1 %v9334_v27  ;;  %v9390_v27 = vld [vmem:[%s9876_s16 + $0x738] sm:$0xff]   ;;  %v1694_v28 = vrot.slane %v1672_v23, %v9914_v35  ;;  %v9428_v23 = vld [vmem:[%s9876_s16 + $0x8b0] sm:$0xff]  }
  0xbd   : > { %8501 = vmatprep.subr.bf16.mxu1 %v9336_v29  ;;  %v9391_v29 = vld [vmem:[%s9876_s16 + $0x7b8] sm:$0xff]  }
  0xbf   : > { %8480 = vmatpush3.bf16.msra.mxu0 %v9337_v30  ;;  %v1673_v30 = vcombine.high %v10152_v26, %v10152_v26 }
  0xc0   : > { %8481 = vmatprep.subr.bf16.mxu0 %v9339_v32  ;;  %8502 = vmatpush3.bf16.msra.mxu1 %v9338_v31  ;;  %v1702_v31 = vcombine.high %v1680_v24, %v1680_v24  ;;  %v9392_v32 = vld [vmem:[%s9876_s16 + $0x770] sm:$0xff]  }
  0xc1   : > { %8503 = vmatprep.subr.bf16.mxu1 %v9340_v33  ;;  %v1704_v33 = vcombine.high %v1694_v28, %v1694_v28 }
  0xc3   : > { %8482 = vmatpush3.bf16.msra.mxu0 %v9341_v34 }
  0xc4   : > { %8483 = vmatprep.subr.bf16.mxu0 %v9343_v37  ;;  %8504 = vmatpush3.bf16.msra.mxu1 %v9342_v36  ;;  %v9393_v36 = vld [vmem:[%s9876_s16 + $0x7f0] sm:$0xff]   ;;  %v1701_v37 = vrot.slane %v1673_v30, %v9914_v35 }
  0xc5   : > { %8505 = vmatprep.subr.bf16.mxu1 %v9344_v38  ;;  %v9394_v38 = vld [vmem:[%s9876_s16 + $0x730] sm:$0xff]  }
  0xc7   : > { %8484 = vmatpush3.bf16.msra.mxu0 %v9345_v39 }
  0xc8   : > { %8485 = vmatprep.subr.bf16.mxu0 %v9347_v41  ;;  %8506 = vmatpush3.bf16.msra.mxu1 %v9346_v40  ;;  %v9395_v41 = vld [vmem:[%s9876_s16 + $0x7b0] sm:$0xff]  }
  0xc9   : > { %8507 = vmatprep.subr.bf16.mxu1 %v9348_v42  ;;  %v1705_v42 = vcombine.high %v1701_v37, %v1701_v37 }
  0xcb   : > { %8486 = vmatpush3.bf16.msra.mxu0 %v9349_v43 }
  0xcc   : > { %8487 = vmatprep.subr.bf16.mxu0 %v9351_v45  ;;  %8508 = vmatpush3.bf16.msra.mxu1 %v9350_v44  ;;  %v9396_v44 = vld [vmem:[%s9876_s16 + $0x768] sm:$0xff]  }
  0xcd   : > { %8509 = vmatprep.subr.bf16.mxu1 %v9352_v46 }
  0xcf   : > { %8488 = vmatpush3.bf16.msra.mxu0 %v9353_v47  ;;  %v9397_v47 = vld [vmem:[%s9876_s16 + $0x7e8] sm:$0xff]  }
  0xd0   : > { %8517 = vmatprep.subr.bf16.mxu0 %v9356_v50  ;;  %8510 = vmatpush3.bf16.msra.mxu1 %v9354_v48 }
  0xd1   : > { %8539 = vmatprep.subr.bf16.mxu1 %v9357_v51 }
  0xd2   : > { %6353 = vmatmul.mubr.bf16.vlgmr.msra.gmra.mxu0 %v1638_v49  ;;  %v9398_v49 = vld [vmem:[%s9876_s16 + $0x728] sm:$0xff]  }
  0xd3   : > { %8518 = vmatpush3.bf16.msra.mxu0 %v9358_v52  ;;  %6393 = vmatmul.mubr.bf16.vlgmr.msra.gmra.mxu1 %v1654_v54  ;;  %v9399_v52 = vld [vmem:[%s9876_s16 + $0x7a8] sm:$0xff]   ;;  %v9400_v54 = vld [vmem:[%s9876_s16 + $0x760] sm:$0xff]  }
  0xd4   : > { %8519 = vmatprep.subr.bf16.mxu0 %v9360_v55  ;;  %8540 = vmatpush3.bf16.msra.mxu1 %v9359_v53 }
  0xd5   : > { %8541 = vmatprep.subr.bf16.mxu1 %v9361_v56  ;;  %6432 = vmatprep.mubr.bf16.mxu0 %v1694_v28  ;;  %v9401_v56 = vld [vmem:[%s9876_s16 + $0x7e0] sm:$0xff]   ;;  %v9430_v28 = vld [vmem:[%s9876_s16 + $0x8e8] sm:$0xff]  }
  0xd6   : > { %6472 = vmatprep.mubr.bf16.mxu1 %v1704_v33 }
  0xd7   : > { %8520 = vmatpush3.bf16.msra.mxu0 %v9362_v57  ;;  %v9402_v57 = vld [vmem:[%s9876_s16 + $0x720] sm:$0xff]  }
  0xd8   : > { %8521 = vmatprep.subr.bf16.mxu0 %v9364_v59  ;;  %8542 = vmatpush3.bf16.msra.mxu1 %v9363_v58  ;;  %v9403_v58 = vld [vmem:[%s9876_s16 + $0x7a0] sm:$0xff]   ;;  %v9404_v59 = vld [vmem:[%s9876_s16 + $0x758] sm:$0xff]  }
  0xd9   : > { %8543 = vmatprep.subr.bf16.mxu1 %v9365_v60  ;;  %v9405_v60 = vld [vmem:[%s9876_s16 + $0x7d8] sm:$0xff]  }
  0xdb   : > { %8522 = vmatpush3.bf16.msra.mxu0 %v9366_v61  ;;  %v9406_v61 = vld [vmem:[%s9876_s16 + $0x718] sm:$0xff]  }
  0xdc   : > { %8523 = vmatprep.subr.bf16.mxu0 %v9368_v63  ;;  %8544 = vmatpush3.bf16.msra.mxu1 %v9367_v62  ;;  %v9407_v62 = vld [vmem:[%s9876_s16 + $0x798] sm:$0xff]   ;;  %v9408_v63 = vld [vmem:[%s9876_s16 + $0x750] sm:$0xff]  }
  0xdd   : > { %8545 = vmatprep.subr.bf16.mxu1 %v9369_v0  ;;  %v9409_v0 = vld [vmem:[%s9876_s16 + $0x7d0] sm:$0xff]  }
  0xdf   : > { %8524 = vmatpush3.bf16.msra.mxu0 %v9370_v1  ;;  %v9410_v1 = vld [vmem:[%s9876_s16 + $0x710] sm:$0xff]  }
  0xe0   : > { %8525 = vmatprep.subr.bf16.mxu0 %v9372_v3  ;;  %8546 = vmatpush3.bf16.msra.mxu1 %v9371_v2  ;;  %v9411_v2 = vld [vmem:[%s9876_s16 + $0x790] sm:$0xff]   ;;  %v9412_v3 = vld [vmem:[%s9876_s16 + $0x748] sm:$0xff]  }
  0xe1   : > { %8547 = vmatprep.subr.bf16.mxu1 %v9373_v4  ;;  %v9413_v4 = vld [vmem:[%s9876_s16 + $0x7c8] sm:$0xff]  }
  0xe3   : > { %8526 = vmatpush3.bf16.msra.mxu0 %v9374_v5  ;;  %v9414_v5 = vld [vmem:[%s9876_s16 + $0x708] sm:$0xff]  }
  0xe4   : > { %8527 = vmatprep.subr.bf16.mxu0 %v9376_v7  ;;  %8548 = vmatpush3.bf16.msra.mxu1 %v9375_v6  ;;  %v9415_v6 = vld [vmem:[%s9876_s16 + $0x788] sm:$0xff]   ;;  %v9416_v7 = vld [vmem:[%s9876_s16 + $0x740] sm:$0xff]  }
  0xe5   : > { %8549 = vmatprep.subr.bf16.mxu1 %v9377_v8  ;;  %v9417_v8 = vld [vmem:[%s9876_s16 + $0x7c0] sm:$0xff]  }
  0xe7   : > { %8528 = vmatpush3.bf16.msra.mxu0 %v9378_v9  ;;  %v9418_v9 = vld [vmem:[%s9876_s16 + $0x700] sm:$0xff]  }
  0xe8   : > { %8529 = vmatprep.subr.bf16.mxu0 %v9380_v11  ;;  %8550 = vmatpush3.bf16.msra.mxu1 %v9379_v10  ;;  %v9419_v10 = vld [vmem:[%s9876_s16 + $0x780] sm:$0xff]   ;;  %v1687_v11 = vrot.slane %v10152_v26, %v9914_v35 }
  0xe9   : > { %8551 = vmatprep.subr.bf16.mxu1 %v9381_v12  ;;  %v9421_v12 = vld [vmem:[%s9876_s16 + $0x878] sm:$0xff]  }
  0xeb   : > { %8530 = vmatpush3.bf16.msra.mxu0 %v9382_v13  ;;  %v9422_v13 = vld [vmem:[%s9876_s16 + $0x8f8] sm:$0xff]  }
  0xec   : > { %8531 = vmatprep.subr.bf16.mxu0 %v9384_v15  ;;  %8552 = vmatpush3.bf16.msra.mxu1 %v9383_v14  ;;  %v9423_v14 = vld [vmem:[%s9876_s16 + $0x838] sm:$0xff]  }
  0xed   : > { %8553 = vmatprep.subr.bf16.mxu1 %v9385_v16  ;;  %v9424_v15 = vld [vmem:[%s9876_s16 + $0x8b8] sm:$0xff]   ;;  %v1703_v16 = vcombine.high %v1687_v11, %v1687_v11 }
  0xef   : > { %8532 = vmatpush3.bf16.msra.mxu0 %v9386_v17  ;;  %v9425_v17 = vld [vmem:[%s9876_s16 + $0x870] sm:$0xff]  }
  0xf0   : > { %8561 = vmatprep.subr.bf16.mxu0 %v9388_v20  ;;  %8554 = vmatpush3.bf16.msra.mxu1 %v9387_v22  ;;  %v9427_v20 = vld [vmem:[%s9876_s16 + $0x830] sm:$0xff]  }
  0xf1   : > { %8583 = vmatprep.subr.bf16.mxu1 %v9389_v25  ;;  %v9429_v25 = vld [vmem:[%s9876_s16 + $0x868] sm:$0xff]  }
  0xf2   : > { %v8269_v34 = vpop.f32.mrf.mxu0  ;;  %6433 = vmatmul.mubr.bf16.vlgmr.msra.gmra.mxu0 %v1680_v24 }
  0xf3   : > { %v8291_v39 = vpop.f32.mrf.mxu1  ;;  %8562 = vmatpush3.bf16.msra.mxu0 %v9390_v27  ;;  %6473 = vmatmul.mubr.bf16.vlgmr.msra.gmra.mxu1 %v1702_v31  ;;  %v9431_v31 = vld [vmem:[%s9876_s16 + $0x828] sm:$0xff]  }
  0xf4   : > { %v8270_v40 = vpop.f32.mrf.mxu0  ;;  %8563 = vmatprep.subr.bf16.mxu0 %v9392_v32  ;;  %8584 = vmatpush3.bf16.msra.mxu1 %v9391_v29 }
  0xf5   : > { %v8271_v43 = vadd.f32 %v8270_v40, %v8269_v34  ;;  %v8292_v45 = vpop.f32.mrf.mxu1  ;;  %6512 = vmatprep.mubr.bf16.mxu0 %v1701_v37  ;;  %8585 = vmatprep.subr.bf16.mxu1 %v9393_v36  ;;  %v9432_v34 = vld [vmem:[%s9876_s16 + $0x8a8] sm:$0xff]   ;;  %v9433_v37 = vld [vmem:[%s9876_s16 + $0x860] sm:$0xff]  }
  0xf6   : > { %v8272_v46 = vpop.f32.mrf.mxu0  ;;  %v8293_v48 = vadd.f32 %v8292_v45, %v8291_v39  ;;  %6552 = vmatprep.mubr.bf16.mxu1 %v1705_v42  ;;  %v9434_v39 = vld [vmem:[%s9876_s16 + $0x8e0] sm:$0xff]   ;;  %v9437_v42 = vld [vmem:[%s9876_s16 + $0x858] sm:$0xff]  }
  0xf7   : > { %v8294_v50 = vpop.f32.mrf.mxu1  ;;  %8564 = vmatpush3.bf16.msra.mxu0 %v9394_v38  ;;  %v9435_v40 = vld [vmem:[%s9876_s16 + $0x820] sm:$0xff]   ;;  %v9440_v45 = vld [vmem:[%s9876_s16 + $0x898] sm:$0xff]   ;;  %v9441_v46 = vld [vmem:[%s9876_s16 + $0x850] sm:$0xff]  }
  0xf8   : > { %v8273_v51 = vpop.f32.mrf.mxu0  ;;  %v10168_v53 = vadd.f32 %v8293_v48, %v8271_v43  ;;  %8565 = vmatprep.subr.bf16.mxu0 %v9396_v44  ;;  %8586 = vmatpush3.bf16.msra.mxu1 %v9395_v41  ;;  %v9436_v41 = vld [vmem:[%s9876_s16 + $0x8a0] sm:$0xff]   ;;  %v9438_v43 = vld [vmem:[%s9876_s16 + $0x8d8] sm:$0xff]   ;;  %v9443_v48 = vld [vmem:[%s9876_s16 + $0x810] sm:$0xff]  }
  0xf9   : > { %v8295_v55 = vpop.f32.mrf.mxu1  ;;  %8587 = vmatprep.subr.bf16.mxu1 %v9397_v47  ;;  %v9439_v44 = vld [vmem:[%s9876_s16 + $0x818] sm:$0xff]   ;;  %v9442_v47 = vld [vmem:[%s9876_s16 + $0x8d0] sm:$0xff]   ;;  %v9445_v50 = vld [vmem:[%s9876_s16 + $0x848] sm:$0xff]  }
  0xfa   : > { %v9446_v51 = vld [vmem:[%s9876_s16 + $0x8c8] sm:$0xff]   ;;  %v9450_v55 = vld [vmem:[%s9876_s16 + $0x8c0] sm:$0xff]  }
  0xfb   : > { %8566 = vmatpush3.bf16.msra.mxu0 %v9398_v49  ;;  %v9444_v49 = vld [vmem:[%s9876_s16 + $0x890] sm:$0xff]  }
  0xfc   : > { %8567 = vmatprep.subr.bf16.mxu0 %v9400_v54  ;;  %8588 = vmatpush3.bf16.msra.mxu1 %v9399_v52  ;;  %v9447_v52 = vld [vmem:[%s9876_s16 + $0x808] sm:$0xff]   ;;  %v9449_v54 = vld [vmem:[%s9876_s16 + $0x840] sm:$0xff]  }
  0xfd   : > { %8589 = vmatprep.subr.bf16.mxu1 %v9401_v56  ;;  %v9451_v56 = vld [vmem:[%s9876_s16 + $0x800] sm:$0xff]  }
  0xff   : > { %8568 = vmatpush3.bf16.msra.mxu0 %v9402_v57  ;;  %v214_v57 = vld [vmem:[%s9912_s20 + $0x20] sm:$0xff] }
 0x100   : > { %8569 = vmatprep.subr.bf16.mxu0 %v9404_v59  ;;  %8590 = vmatpush3.bf16.msra.mxu1 %v9403_v58  ;;  %v9452_v58 = vld [vmem:[%s9876_s16 + $0x880] sm:$0xff]   ;;  %v1713_v59 = vrot.slane %v214_v57, %v9914_v35 }
 0x101   : > { %8591 = vmatprep.subr.bf16.mxu1 %v9405_v60  ;;  %v1706_v60 = vcombine.high %v214_v57, %v214_v57  ;;  %v9490_v57 = vld [vmem:[%s9876_s16 + $0xa70] sm:$0xff]  }
 0x103   : > { %8570 = vmatpush3.bf16.msra.mxu0 %v9406_v61  ;;  %v9453_v61 = vld [vmem:[%s9876_s16 + $0x978] sm:$0xff]  }
 0x104   : > { %8571 = vmatprep.subr.bf16.mxu0 %v9408_v63  ;;  %8592 = vmatpush3.bf16.msra.mxu1 %v9407_v62  ;;  %v1721_v62 = vcombine.high %v1713_v59, %v1713_v59  ;;  %v1729_v63 = vrot.slane %v1713_v59, %v9914_v35  ;;  %v9491_v59 = vld [vmem:[%s9876_s16 + $0xaf0] sm:$0xff]  }
 0x105   : > { %8593 = vmatprep.subr.bf16.mxu1 %v9409_v0  ;;  %v9454_v0 = vld [vmem:[%s9876_s16 + $0x9f8] sm:$0xff]  }
 0x107   : > { %8572 = vmatpush3.bf16.msra.mxu0 %v9410_v1  ;;  %v10233_v1 = vrot.slane %v1706_v60, %v9914_v35  ;;  %v9492_v60 = vld [vmem:[%s9876_s16 + $0xa30] sm:$0xff]  }
 0x108   : > { %8573 = vmatprep.subr.bf16.mxu0 %v9412_v3  ;;  %8594 = vmatpush3.bf16.msra.mxu1 %v9411_v2  ;;  %v9455_v2 = vld [vmem:[%s9876_s16 + $0x938] sm:$0xff]   ;;  %v1743_v3 = vrot.slane %v1721_v62, %v9914_v35 }
 0x109   : > { %8595 = vmatprep.subr.bf16.mxu1 %v9413_v4  ;;  %v9456_v4 = vld [vmem:[%s9876_s16 + $0x9b8] sm:$0xff]  }
 0x10b   : > { %8574 = vmatpush3.bf16.msra.mxu0 %v9414_v5  ;;  %v1722_v5 = vcombine.high %v10233_v1, %v10233_v1 }
 0x10c   : > { %8575 = vmatprep.subr.bf16.mxu0 %v9416_v7  ;;  %8596 = vmatpush3.bf16.msra.mxu1 %v9415_v6  ;;  %v1751_v6 = vcombine.high %v1729_v63, %v1729_v63  ;;  %v9457_v7 = vld [vmem:[%s9876_s16 + $0x970] sm:$0xff]  }
 0x10d   : > { %8597 = vmatprep.subr.bf16.mxu1 %v9417_v8  ;;  %v1753_v8 = vcombine.high %v1743_v3, %v1743_v3 }
 0x10f   : > { %8576 = vmatpush3.bf16.msra.mxu0 %v9418_v9 }
 0x110   : > { %8605 = vmatprep.subr.bf16.mxu0 %v9421_v12  ;;  %8598 = vmatpush3.bf16.msra.mxu1 %v9419_v10  ;;  %v9458_v10 = vld [vmem:[%s9876_s16 + $0x9f0] sm:$0xff]  }
 0x111   : > { %8627 = vmatprep.subr.bf16.mxu1 %v9422_v13  ;;  %v9459_v12 = vld [vmem:[%s9876_s16 + $0x930] sm:$0xff]  }
 0x112   : > { %v8313_v18 = vpop.f32.mrf.mxu0  ;;  %6513 = vmatmul.mubr.bf16.vlgmr.msra.gmra.mxu0 %v1687_v11  ;;  %v1750_v11 = vrot.slane %v1722_v5, %v9914_v35 }
 0x113   : > { %v8335_v21 = vpop.f32.mrf.mxu1  ;;  %8606 = vmatpush3.bf16.msra.mxu0 %v9423_v14  ;;  %6553 = vmatmul.mubr.bf16.vlgmr.msra.gmra.mxu1 %v1703_v16 }
 0x114   : > { %v8314_v22 = vpop.f32.mrf.mxu0  ;;  %8607 = vmatprep.subr.bf16.mxu0 %v9425_v17  ;;  %8628 = vmatpush3.bf16.msra.mxu1 %v9424_v15  ;;  %v9460_v15 = vld [vmem:[%s9876_s16 + $0x9b0] sm:$0xff]   ;;  %v1754_v16 = vcombine.high %v1750_v11, %v1750_v11 }
 0x115   : > { %v8315_v24 = vadd.f32 %v8314_v22, %v8313_v18  ;;  %v8336_v26 = vpop.f32.mrf.mxu1  ;;  %8629 = vmatprep.subr.bf16.mxu1 %v9426_v19  ;;  %6592 = vmatprep.mubr.bf16.mxu0 %v1743_v3  ;;  %v9461_v18 = vld [vmem:[%s9876_s16 + $0x968] sm:$0xff]  }
 0x116   : > { %v8316_v27 = vpop.f32.mrf.mxu0  ;;  %v8337_v30 = vadd.f32 %v8336_v26, %v8335_v21  ;;  %6632 = vmatprep.mubr.bf16.mxu1 %v1753_v8  ;;  %v9462_v21 = vld [vmem:[%s9876_s16 + $0x9e8] sm:$0xff]  }
 0x117   : > { %v6035_v29 = vadd.f32 %v8315_v24, %v10168_v53  ;;  %v8338_v32 = vpop.f32.mrf.mxu1  ;;  %8608 = vmatpush3.bf16.msra.mxu0 %v9427_v20  ;;  %v9448_v53 = vld [vmem:[%s9876_s16 + $0x888] sm:$0xff]  }
 0x118   : > { %v8317_v33 = vpop.f32.mrf.mxu0  ;;  %8609 = vmatprep.subr.bf16.mxu0 %v9429_v25  ;;  %8630 = vmatpush3.bf16.msra.mxu1 %v9428_v23  ;;  %v9463_v24 = vld [vmem:[%s9876_s16 + $0x928] sm:$0xff]   ;;  %v9467_v32 = vld [vmem:[%s9876_s16 + $0x920] sm:$0xff]  }
 0x119   : > { %v10205_v36 = vadd.f32 %v8337_v30, %v6035_v29  ;;  %v8339_v38 = vpop.f32.mrf.mxu1  ;;  %8631 = vmatprep.subr.bf16.mxu1 %v9430_v28  ;;  %v9464_v27 = vld [vmem:[%s9876_s16 + $0x9a8] sm:$0xff]   ;;  %v9465_v29 = vld [vmem:[%s9876_s16 + $0x960] sm:$0xff]  }
 0x11a   : > { %v9468_v33 = vld [vmem:[%s9876_s16 + $0x9a0] sm:$0xff]   ;;  %v9472_v38 = vld [vmem:[%s9876_s16 + $0x998] sm:$0xff]  }
 0x11b   : > { %8610 = vmatpush3.bf16.msra.mxu0 %v9431_v31  ;;  %v9466_v31 = vld [vmem:[%s9876_s16 + $0x9e0] sm:$0xff]  }
 0x11c   : > { %8611 = vmatprep.subr.bf16.mxu0 %v9433_v37  ;;  %8632 = vmatpush3.bf16.msra.mxu1 %v9432_v34  ;;  %v9469_v34 = vld [vmem:[%s9876_s16 + $0x958] sm:$0xff]  }
 0x11d   : > { %8633 = vmatprep.subr.bf16.mxu1 %v9434_v39  ;;  %v9471_v37 = vld [vmem:[%s9876_s16 + $0x918] sm:$0xff]   ;;  %v9473_v39 = vld [vmem:[%s9876_s16 + $0x950] sm:$0xff]  }
 0x11f   : > { %8612 = vmatpush3.bf16.msra.mxu0 %v9435_v40  ;;  %v9474_v40 = vld [vmem:[%s9876_s16 + $0x9d0] sm:$0xff]  }
 0x120   : > { %8613 = vmatprep.subr.bf16.mxu0 %v9437_v42  ;;  %8634 = vmatpush3.bf16.msra.mxu1 %v9436_v41  ;;  %v9475_v41 = vld [vmem:[%s9876_s16 + $0x910] sm:$0xff]  }
 0x121   : > { %8635 = vmatprep.subr.bf16.mxu1 %v9438_v43  ;;  %v9476_v42 = vld [vmem:[%s9876_s16 + $0x990] sm:$0xff]   ;;  %v9477_v43 = vld [vmem:[%s9876_s16 + $0x948] sm:$0xff]  }
 0x123   : > { %8614 = vmatpush3.bf16.msra.mxu0 %v9439_v44  ;;  %v9478_v44 = vld [vmem:[%s9876_s16 + $0x9c8] sm:$0xff]  }
 0x124   : > { %8615 = vmatprep.subr.bf16.mxu0 %v9441_v46  ;;  %8636 = vmatpush3.bf16.msra.mxu1 %v9440_v45  ;;  %v9479_v45 = vld [vmem:[%s9876_s16 + $0x908] sm:$0xff]  }
 0x125   : > { %8637 = vmatprep.subr.bf16.mxu1 %v9442_v47  ;;  %v9480_v46 = vld [vmem:[%s9876_s16 + $0x988] sm:$0xff]   ;;  %v9481_v47 = vld [vmem:[%s9876_s16 + $0x940] sm:$0xff]  }
 0x127   : > { %8616 = vmatpush3.bf16.msra.mxu0 %v9443_v48  ;;  %v9482_v48 = vld [vmem:[%s9876_s16 + $0x9c0] sm:$0xff]  }
 0x128   : > { %8617 = vmatprep.subr.bf16.mxu0 %v9445_v50  ;;  %8638 = vmatpush3.bf16.msra.mxu1 %v9444_v49  ;;  %v9483_v49 = vld [vmem:[%s9876_s16 + $0x900] sm:$0xff]  }
 0x129   : > { %8639 = vmatprep.subr.bf16.mxu1 %v9446_v51  ;;  %v9484_v50 = vld [vmem:[%s9876_s16 + $0x980] sm:$0xff]   ;;  %v1736_v51 = vrot.slane %v10233_v1, %v9914_v35  ;;  %v9494_v1 = vld [vmem:[%s9876_s16 + $0xa68] sm:$0xff]  }
 0x12b   : > { %8618 = vmatpush3.bf16.msra.mxu0 %v9447_v52  ;;  %v9486_v52 = vld [vmem:[%s9876_s16 + $0xa78] sm:$0xff]  }
 0x12c   : > { %8619 = vmatprep.subr.bf16.mxu0 %v9449_v54  ;;  %8640 = vmatpush3.bf16.msra.mxu1 %v9448_v53  ;;  %v9487_v53 = vld [vmem:[%s9876_s16 + $0xaf8] sm:$0xff]  }
 0x12d   : > { %8641 = vmatprep.subr.bf16.mxu1 %v9450_v55  ;;  %v9488_v54 = vld [vmem:[%s9876_s16 + $0xa38] sm:$0xff]  }
 0x12e   : > { %v9489_v55 = vld [vmem:[%s9876_s16 + $0xab8] sm:$0xff]  }
 0x12f   : > { %8620 = vmatpush3.bf16.msra.mxu0 %v9451_v56  ;;  %v1752_v56 = vcombine.high %v1736_v51, %v1736_v51 }
 0x130   : > { %8649 = vmatprep.subr.bf16.mxu0 %v9453_v61  ;;  %8642 = vmatpush3.bf16.msra.mxu1 %v9452_v58 }
 0x131   : > { %8671 = vmatprep.subr.bf16.mxu1 %v9454_v0 }
 0x132   : > { %v8357_v9 = vpop.f32.mrf.mxu0  ;;  %6593 = vmatmul.mubr.bf16.vlgmr.msra.gmra.mxu0 %v1729_v63  ;;  %v9493_v63 = vld [vmem:[%s9876_s16 + $0xab0] sm:$0xff]  }
 0x133   : > { %v8379_v13 = vpop.f32.mrf.mxu1  ;;  %8650 = vmatpush3.bf16.msra.mxu0 %v9455_v2  ;;  %6633 = vmatmul.mubr.bf16.vlgmr.msra.gmra.mxu1 %v1751_v6 }
 0x134   : > { %v8358_v14 = vpop.f32.mrf.mxu0  ;;  %8651 = vmatprep.subr.bf16.mxu0 %v9457_v7  ;;  %8672 = vmatpush3.bf16.msra.mxu1 %v9456_v4  ;;  %v9495_v4 = vld [vmem:[%s9876_s16 + $0xae8] sm:$0xff]  }
 0x135   : > { %v8359_v17 = vadd.f32 %v8358_v14, %v8357_v9  ;;  %v8380_v19 = vpop.f32.mrf.mxu1  ;;  %6672 = vmatprep.mubr.bf16.mxu0 %v1750_v11  ;;  %8673 = vmatprep.subr.bf16.mxu1 %v9458_v10  ;;  %v9496_v7 = vld [vmem:[%s9876_s16 + $0xa28] sm:$0xff]   ;;  %v9499_v14 = vld [vmem:[%s9876_s16 + $0xae0] sm:$0xff]  }
 0x136   : > { %v8360_v20 = vpop.f32.mrf.mxu0  ;;  %v8381_v23 = vadd.f32 %v8380_v19, %v8379_v13  ;;  %6712 = vmatprep.mubr.bf16.mxu1 %v1754_v16  ;;  %v9497_v10 = vld [vmem:[%s9876_s16 + $0xaa8] sm:$0xff]   ;;  %v9501_v16 = vld [vmem:[%s9876_s16 + $0xaa0] sm:$0xff]   ;;  %v9504_v19 = vld [vmem:[%s9876_s16 + $0xa18] sm:$0xff]  }
 0x137   : > { %v6115_v22 = vadd.f32 %v8359_v17, %v10205_v36  ;;  %v8382_v25 = vpop.f32.mrf.mxu1  ;;  %8652 = vmatpush3.bf16.msra.mxu0 %v9459_v12  ;;  %v9470_v36 = vld [vmem:[%s9876_s16 + $0x9d8] sm:$0xff]   ;;  %v9498_v12 = vld [vmem:[%s9876_s16 + $0xa60] sm:$0xff]  }
 0x138   : > { %v8361_v26 = vpop.f32.mrf.mxu0  ;;  %8653 = vmatprep.subr.bf16.mxu0 %v9461_v18  ;;  %8674 = vmatpush3.bf16.msra.mxu1 %v9460_v15  ;;  %v9500_v15 = vld [vmem:[%s9876_s16 + $0xa20] sm:$0xff]   ;;  %v9502_v17 = vld [vmem:[%s9876_s16 + $0xa58] sm:$0xff]   ;;  %v9510_v25 = vld [vmem:[%s9876_s16 + $0xa48] sm:$0xff]  }
 0x139   : > { %v10250_v28 = vadd.f32 %v8381_v23, %v6115_v22  ;;  %v8383_v30 = vpop.f32.mrf.mxu1  ;;  %8675 = vmatprep.subr.bf16.mxu1 %v9462_v21  ;;  %v9503_v18 = vld [vmem:[%s9876_s16 + $0xad8] sm:$0xff]   ;;  %v9506_v21 = vld [vmem:[%s9876_s16 + $0xa50] sm:$0xff]   ;;  %v9511_v26 = vld [vmem:[%s9876_s16 + $0xac8] sm:$0xff]  }
 0x13a   : > { %v9505_v20 = vld [vmem:[%s9876_s16 + $0xa98] sm:$0xff]   ;;  %v9507_v22 = vld [vmem:[%s9876_s16 + $0xad0] sm:$0xff]   ;;  %v9515_v30 = vld [vmem:[%s9876_s16 + $0xac0] sm:$0xff]  }
 0x13b   : > { %8654 = vmatpush3.bf16.msra.mxu0 %v9463_v24  ;;  %v9508_v23 = vld [vmem:[%s9876_s16 + $0xa10] sm:$0xff]  }
 0x13c   : > { %8655 = vmatprep.subr.bf16.mxu0 %v9465_v29  ;;  %8676 = vmatpush3.bf16.msra.mxu1 %v9464_v27  ;;  %v9509_v24 = vld [vmem:[%s9876_s16 + $0xa90] sm:$0xff]   ;;  %v9512_v27 = vld [vmem:[%s9876_s16 + $0xa08] sm:$0xff]   ;;  %v9514_v29 = vld [vmem:[%s9876_s16 + $0xa40] sm:$0xff]  }
 0x13d   : > { %8677 = vmatprep.subr.bf16.mxu1 %v9466_v31  ;;  %v9516_v31 = vld [vmem:[%s9876_s16 + $0xa00] sm:$0xff]  }
 0x13f   : > { %8656 = vmatpush3.bf16.msra.mxu0 %v9467_v32  ;;  %v215_v32 = vld [vmem:[%s9912_s20 + $0x28] sm:$0xff] }
 0x140   : > { %8657 = vmatprep.subr.bf16.mxu0 %v9469_v34  ;;  %8678 = vmatpush3.bf16.msra.mxu1 %v9468_v33  ;;  %v9517_v33 = vld [vmem:[%s9876_s16 + $0xa80] sm:$0xff]   ;;  %v1762_v34 = vrot.slane %v215_v32, %v9914_v35 }
 0x141   : > { %8679 = vmatprep.subr.bf16.mxu1 %v9470_v36  ;;  %v1755_v36 = vcombine.high %v215_v32, %v215_v32  ;;  %v9555_v32 = vld [vmem:[%s9876_s16 + $0xc70] sm:$0xff]  }
 0x143   : > { %8658 = vmatpush3.bf16.msra.mxu0 %v9471_v37  ;;  %v9518_v37 = vld [vmem:[%s9876_s16 + $0xb78] sm:$0xff]  }
 0x144   : > { %8659 = vmatprep.subr.bf16.mxu0 %v9473_v39  ;;  %8680 = vmatpush3.bf16.msra.mxu1 %v9472_v38  ;;  %v1770_v38 = vcombine.high %v1762_v34, %v1762_v34  ;;  %v1778_v39 = vrot.slane %v1762_v34, %v9914_v35  ;;  %v9556_v34 = vld [vmem:[%s9876_s16 + $0xcf0] sm:$0xff]  }
 0x145   : > { %8681 = vmatprep.subr.bf16.mxu1 %v9474_v40  ;;  %v9519_v40 = vld [vmem:[%s9876_s16 + $0xbf8] sm:$0xff]  }
 0x147   : > { %8660 = vmatpush3.bf16.msra.mxu0 %v9475_v41  ;;  %v10315_v41 = vrot.slane %v1755_v36, %v9914_v35  ;;  %v9557_v36 = vld [vmem:[%s9876_s16 + $0xc30] sm:$0xff]  }
 0x148   : > { %8661 = vmatprep.subr.bf16.mxu0 %v9477_v43  ;;  %8682 = vmatpush3.bf16.msra.mxu1 %v9476_v42  ;;  %v9520_v42 = vld [vmem:[%s9876_s16 + $0xb38] sm:$0xff]   ;;  %v1792_v43 = vrot.slane %v1770_v38, %v9914_v35 }
 0x149   : > { %8683 = vmatprep.subr.bf16.mxu1 %v9478_v44  ;;  %v9521_v44 = vld [vmem:[%s9876_s16 + $0xbb8] sm:$0xff]  }
 0x14b   : > { %8662 = vmatpush3.bf16.msra.mxu0 %v9479_v45  ;;  %v1771_v45 = vcombine.high %v10315_v41, %v10315_v41 }
 0x14c   : > { %8663 = vmatprep.subr.bf16.mxu0 %v9481_v47  ;;  %8684 = vmatpush3.bf16.msra.mxu1 %v9480_v46  ;;  %v1800_v46 = vcombine.high %v1778_v39, %v1778_v39  ;;  %v9522_v47 = vld [vmem:[%s9876_s16 + $0xb70] sm:$0xff]  }
 0x14d   : > { %8685 = vmatprep.subr.bf16.mxu1 %v9482_v48  ;;  %v1802_v48 = vcombine.high %v1792_v43, %v1792_v43 }
 0x14f   : > { %8664 = vmatpush3.bf16.msra.mxu0 %v9483_v49 }
 0x150   : > { %8693 = vmatprep.subr.bf16.mxu0 %v9486_v52  ;;  %8686 = vmatpush3.bf16.msra.mxu1 %v9484_v50  ;;  %v9523_v50 = vld [vmem:[%s9876_s16 + $0xbf0] sm:$0xff]  }
 0x151   : > { %8715 = vmatprep.subr.bf16.mxu1 %v9487_v53  ;;  %v9524_v52 = vld [vmem:[%s9876_s16 + $0xb30] sm:$0xff]  }
 0x152   : > { %v8401_v58 = vpop.f32.mrf.mxu0  ;;  %6673 = vmatmul.mubr.bf16.vlgmr.msra.gmra.mxu0 %v1736_v51  ;;  %v1799_v51 = vrot.slane %v1771_v45, %v9914_v35 }
 0x153   : > { %v8423_v61 = vpop.f32.mrf.mxu1  ;;  %8694 = vmatpush3.bf16.msra.mxu0 %v9488_v54  ;;  %6713 = vmatmul.mubr.bf16.vlgmr.msra.gmra.mxu1 %v1752_v56 }
 0x154   : > { %v8402_v62 = vpop.f32.mrf.mxu0  ;;  %8695 = vmatprep.subr.bf16.mxu0 %v9490_v57  ;;  %8716 = vmatpush3.bf16.msra.mxu1 %v9489_v55  ;;  %v9525_v55 = vld [vmem:[%s9876_s16 + $0xbb0] sm:$0xff]   ;;  %v1803_v56 = vcombine.high %v1799_v51, %v1799_v51 }
 0x155   : > { %v8403_v0 = vadd.f32 %v8402_v62, %v8401_v58  ;;  %v8424_v2 = vpop.f32.mrf.mxu1  ;;  %8717 = vmatprep.subr.bf16.mxu1 %v9491_v59  ;;  %6752 = vmatprep.mubr.bf16.mxu0 %v1792_v43  ;;  %v9526_v58 = vld [vmem:[%s9876_s16 + $0xb68] sm:$0xff]  }
 0x156   : > { %v8404_v3 = vpop.f32.mrf.mxu0  ;;  %v8425_v6 = vadd.f32 %v8424_v2, %v8423_v61  ;;  %6792 = vmatprep.mubr.bf16.mxu1 %v1802_v48  ;;  %v9527_v61 = vld [vmem:[%s9876_s16 + $0xbe8] sm:$0xff]  }
 0x157   : > { %v6195_v5 = vadd.f32 %v8403_v0, %v10250_v28  ;;  %v8426_v8 = vpop.f32.mrf.mxu1  ;;  %8696 = vmatpush3.bf16.msra.mxu0 %v9492_v60  ;;  %v9513_v28 = vld [vmem:[%s9876_s16 + $0xa88] sm:$0xff]  }
 0x158   : > { %v8405_v9 = vpop.f32.mrf.mxu0  ;;  %8697 = vmatprep.subr.bf16.mxu0 %v9494_v1  ;;  %8718 = vmatpush3.bf16.msra.mxu1 %v9493_v63  ;;  %v9528_v0 = vld [vmem:[%s9876_s16 + $0xb28] sm:$0xff]   ;;  %v9532_v8 = vld [vmem:[%s9876_s16 + $0xb20] sm:$0xff]  }
 0x159   : > { %v10287_v11 = vadd.f32 %v8425_v6, %v6195_v5  ;;  %v8427_v13 = vpop.f32.mrf.mxu1  ;;  %8719 = vmatprep.subr.bf16.mxu1 %v9495_v4  ;;  %v9529_v3 = vld [vmem:[%s9876_s16 + $0xba8] sm:$0xff]   ;;  %v9530_v5 = vld [vmem:[%s9876_s16 + $0xb60] sm:$0xff]  }
 0x15a   : > { %v9533_v9 = vld [vmem:[%s9876_s16 + $0xba0] sm:$0xff]   ;;  %v9537_v13 = vld [vmem:[%s9876_s16 + $0xb98] sm:$0xff]  }
 0x15b   : > { %8698 = vmatpush3.bf16.msra.mxu0 %v9496_v7  ;;  %v9531_v7 = vld [vmem:[%s9876_s16 + $0xbe0] sm:$0xff]  }
 0x15c   : > { %8699 = vmatprep.subr.bf16.mxu0 %v9498_v12  ;;  %8720 = vmatpush3.bf16.msra.mxu1 %v9497_v10  ;;  %v9534_v10 = vld [vmem:[%s9876_s16 + $0xb58] sm:$0xff]  }
 0x15d   : > { %8721 = vmatprep.subr.bf16.mxu1 %v9499_v14  ;;  %v9536_v12 = vld [vmem:[%s9876_s16 + $0xb18] sm:$0xff]   ;;  %v9538_v14 = vld [vmem:[%s9876_s16 + $0xb50] sm:$0xff]  }
 0x15f   : > { %8700 = vmatpush3.bf16.msra.mxu0 %v9500_v15  ;;  %v9539_v15 = vld [vmem:[%s9876_s16 + $0xbd0] sm:$0xff]  }
 0x160   : > { %8701 = vmatprep.subr.bf16.mxu0 %v9502_v17  ;;  %8722 = vmatpush3.bf16.msra.mxu1 %v9501_v16  ;;  %v9540_v16 = vld [vmem:[%s9876_s16 + $0xb10] sm:$0xff]  }
 0x161   : > { %8723 = vmatprep.subr.bf16.mxu1 %v9503_v18  ;;  %v9541_v17 = vld [vmem:[%s9876_s16 + $0xb90] sm:$0xff]   ;;  %v9542_v18 = vld [vmem:[%s9876_s16 + $0xb48] sm:$0xff]  }
 0x163   : > { %8702 = vmatpush3.bf16.msra.mxu0 %v9504_v19  ;;  %v9543_v19 = vld [vmem:[%s9876_s16 + $0xbc8] sm:$0xff]  }
 0x164   : > { %8703 = vmatprep.subr.bf16.mxu0 %v9506_v21  ;;  %8724 = vmatpush3.bf16.msra.mxu1 %v9505_v20  ;;  %v9544_v20 = vld [vmem:[%s9876_s16 + $0xb08] sm:$0xff]  }
 0x165   : > { %8725 = vmatprep.subr.bf16.mxu1 %v9507_v22  ;;  %v9545_v21 = vld [vmem:[%s9876_s16 + $0xb88] sm:$0xff]   ;;  %v9546_v22 = vld [vmem:[%s9876_s16 + $0xb40] sm:$0xff]  }
 0x167   : > { %8704 = vmatpush3.bf16.msra.mxu0 %v9508_v23  ;;  %v9547_v23 = vld [vmem:[%s9876_s16 + $0xbc0] sm:$0xff]  }
 0x168   : > { %8705 = vmatprep.subr.bf16.mxu0 %v9510_v25  ;;  %8726 = vmatpush3.bf16.msra.mxu1 %v9509_v24  ;;  %v9548_v24 = vld [vmem:[%s9876_s16 + $0xb00] sm:$0xff]  }
 0x169   : > { %8727 = vmatprep.subr.bf16.mxu1 %v9511_v26  ;;  %v9549_v25 = vld [vmem:[%s9876_s16 + $0xb80] sm:$0xff]   ;;  %v1785_v26 = vrot.slane %v10315_v41, %v9914_v35  ;;  %v9559_v41 = vld [vmem:[%s9876_s16 + $0xc68] sm:$0xff]  }
 0x16b   : > { %8706 = vmatpush3.bf16.msra.mxu0 %v9512_v27  ;;  %v9551_v27 = vld [vmem:[%s9876_s16 + $0xc78] sm:$0xff]  }
 0x16c   : > { %8707 = vmatprep.subr.bf16.mxu0 %v9514_v29  ;;  %8728 = vmatpush3.bf16.msra.mxu1 %v9513_v28  ;;  %v9552_v28 = vld [vmem:[%s9876_s16 + $0xcf8] sm:$0xff]  }
 0x16d   : > { %8729 = vmatprep.subr.bf16.mxu1 %v9515_v30  ;;  %v9553_v29 = vld [vmem:[%s9876_s16 + $0xc38] sm:$0xff]  }
 0x16e   : > { %v9554_v30 = vld [vmem:[%s9876_s16 + $0xcb8] sm:$0xff]  }
 0x16f   : > { %8708 = vmatpush3.bf16.msra.mxu0 %v9516_v31  ;;  %v1801_v31 = vcombine.high %v1785_v26, %v1785_v26 }
 0x170   : > { %8737 = vmatprep.subr.bf16.mxu0 %v9518_v37  ;;  %8730 = vmatpush3.bf16.msra.mxu1 %v9517_v33 }
 0x171   : > { %8759 = vmatprep.subr.bf16.mxu1 %v9519_v40 }
 0x172   : > { %v8445_v49 = vpop.f32.mrf.mxu0  ;;  %6753 = vmatmul.mubr.bf16.vlgmr.msra.gmra.mxu0 %v1778_v39  ;;  %v9558_v39 = vld [vmem:[%s9876_s16 + $0xcb0] sm:$0xff]  }
 0x173   : > { %v8467_v53 = vpop.f32.mrf.mxu1  ;;  %8738 = vmatpush3.bf16.msra.mxu0 %v9520_v42  ;;  %6793 = vmatmul.mubr.bf16.vlgmr.msra.gmra.mxu1 %v1800_v46 }
 0x174   : > { %v8446_v54 = vpop.f32.mrf.mxu0  ;;  %8739 = vmatprep.subr.bf16.mxu0 %v9522_v47  ;;  %8760 = vmatpush3.bf16.msra.mxu1 %v9521_v44  ;;  %v9560_v44 = vld [vmem:[%s9876_s16 + $0xce8] sm:$0xff]  }
 0x175   : > { %v8447_v57 = vadd.f32 %v8446_v54, %v8445_v49  ;;  %v8468_v59 = vpop.f32.mrf.mxu1  ;;  %6832 = vmatprep.mubr.bf16.mxu0 %v1799_v51  ;;  %8761 = vmatprep.subr.bf16.mxu1 %v9523_v50  ;;  %v9561_v47 = vld [vmem:[%s9876_s16 + $0xc28] sm:$0xff]   ;;  %v9564_v54 = vld [vmem:[%s9876_s16 + $0xce0] sm:$0xff]  }
 0x176   : > { %v8448_v60 = vpop.f32.mrf.mxu0  ;;  %v8469_v63 = vadd.f32 %v8468_v59, %v8467_v53  ;;  %6872 = vmatprep.mubr.bf16.mxu1 %v1803_v56  ;;  %v9562_v50 = vld [vmem:[%s9876_s16 + $0xca8] sm:$0xff]   ;;  %v9566_v56 = vld [vmem:[%s9876_s16 + $0xca0] sm:$0xff]   ;;  %v9569_v59 = vld [vmem:[%s9876_s16 + $0xc18] sm:$0xff]  }
 0x177   : > { %v6275_v62 = vadd.f32 %v8447_v57, %v10287_v11  ;;  %v8470_v1 = vpop.f32.mrf.mxu1  ;;  %8740 = vmatpush3.bf16.msra.mxu0 %v9524_v52  ;;  %v9535_v11 = vld [vmem:[%s9876_s16 + $0xbd8] sm:$0xff]   ;;  %v9563_v52 = vld [vmem:[%s9876_s16 + $0xc60] sm:$0xff]  }
 0x178   : > { %v8449_v2 = vpop.f32.mrf.mxu0  ;;  %8741 = vmatprep.subr.bf16.mxu0 %v9526_v58  ;;  %8762 = vmatpush3.bf16.msra.mxu1 %v9525_v55  ;;  %v9565_v55 = vld [vmem:[%s9876_s16 + $0xc20] sm:$0xff]   ;;  %v9567_v57 = vld [vmem:[%s9876_s16 + $0xc58] sm:$0xff]   ;;  %v9575_v1 = vld [vmem:[%s9876_s16 + $0xc48] sm:$0xff]  }
 0x179   : > { %v10332_v4 = vadd.f32 %v8469_v63, %v6275_v62  ;;  %v8471_v6 = vpop.f32.mrf.mxu1  ;;  %8763 = vmatprep.subr.bf16.mxu1 %v9527_v61  ;;  %v9568_v58 = vld [vmem:[%s9876_s16 + $0xcd8] sm:$0xff]   ;;  %v9571_v61 = vld [vmem:[%s9876_s16 + $0xc50] sm:$0xff]   ;;  %v9576_v2 = vld [vmem:[%s9876_s16 + $0xcc8] sm:$0xff]  }
 0x17a   : > { %v9570_v60 = vld [vmem:[%s9876_s16 + $0xc98] sm:$0xff]   ;;  %v9572_v62 = vld [vmem:[%s9876_s16 + $0xcd0] sm:$0xff]   ;;  %v9580_v6 = vld [vmem:[%s9876_s16 + $0xcc0] sm:$0xff]  }
 0x17b   : > { %8742 = vmatpush3.bf16.msra.mxu0 %v9528_v0  ;;  %v9573_v63 = vld [vmem:[%s9876_s16 + $0xc10] sm:$0xff]  }
 0x17c   : > { %8743 = vmatprep.subr.bf16.mxu0 %v9530_v5  ;;  %8764 = vmatpush3.bf16.msra.mxu1 %v9529_v3  ;;  %v9574_v0 = vld [vmem:[%s9876_s16 + $0xc90] sm:$0xff]   ;;  %v9577_v3 = vld [vmem:[%s9876_s16 + $0xc08] sm:$0xff]   ;;  %v9579_v5 = vld [vmem:[%s9876_s16 + $0xc40] sm:$0xff]  }
 0x17d   : > { %8765 = vmatprep.subr.bf16.mxu1 %v9531_v7  ;;  %v9581_v7 = vld [vmem:[%s9876_s16 + $0xc00] sm:$0xff]  }
 0x17f   : > { %8744 = vmatpush3.bf16.msra.mxu0 %v9532_v8  ;;  %v216_v8 = vld [vmem:[%s9912_s20 + $0x30] sm:$0xff] }
 0x180   : > { %8745 = vmatprep.subr.bf16.mxu0 %v9534_v10  ;;  %8766 = vmatpush3.bf16.msra.mxu1 %v9533_v9  ;;  %v1811_v9 = vrot.slane %v216_v8, %v9914_v35  ;;  %v9583_v10 = vld [vmem:[%s9876_s16 + $0xd78] sm:$0xff]  }
 0x181   : > { %8767 = vmatprep.subr.bf16.mxu1 %v9535_v11  ;;  %v1804_v11 = vcombine.high %v216_v8, %v216_v8  ;;  %v9620_v8 = vld [vmem:[%s9876_s16 + $0xe70] sm:$0xff]  }
 0x183   : > { %8746 = vmatpush3.bf16.msra.mxu0 %v9536_v12  ;;  %v9582_v12 = vld [vmem:[%s9876_s16 + $0xc80] sm:$0xff]  }
 0x184   : > { %8747 = vmatprep.subr.bf16.mxu0 %v9538_v14  ;;  %8768 = vmatpush3.bf16.msra.mxu1 %v9537_v13  ;;  %v1819_v13 = vcombine.high %v1811_v9, %v1811_v9  ;;  %v1827_v14 = vrot.slane %v1811_v9, %v9914_v35 }
 0x185   : > { %8769 = vmatprep.subr.bf16.mxu1 %v9539_v15  ;;  %v9584_v15 = vld [vmem:[%s9876_s16 + $0xdf8] sm:$0xff]  }
 0x187   : > { %8748 = vmatpush3.bf16.msra.mxu0 %v9540_v16  ;;  %v10397_v16 = vrot.slane %v1804_v11, %v9914_v35  ;;  %v9622_v11 = vld [vmem:[%s9876_s16 + $0xe30] sm:$0xff]  }
 0x188   : > { %8749 = vmatprep.subr.bf16.mxu0 %v9542_v18  ;;  %8770 = vmatpush3.bf16.msra.mxu1 %v9541_v17  ;;  %v9585_v17 = vld [vmem:[%s9876_s16 + $0xd38] sm:$0xff]   ;;  %v1841_v18 = vrot.slane %v1819_v13, %v9914_v35 }
 0x189   : > { %8771 = vmatprep.subr.bf16.mxu1 %v9543_v19  ;;  %v9586_v19 = vld [vmem:[%s9876_s16 + $0xdb8] sm:$0xff]  }
 0x18b   : > { %8750 = vmatpush3.bf16.msra.mxu0 %v9544_v20  ;;  %v1820_v20 = vcombine.high %v10397_v16, %v10397_v16 }
 0x18c   : > { %8751 = vmatprep.subr.bf16.mxu0 %v9546_v22  ;;  %8772 = vmatpush3.bf16.msra.mxu1 %v9545_v21  ;;  %v1849_v21 = vcombine.high %v1827_v14, %v1827_v14  ;;  %v9587_v22 = vld [vmem:[%s9876_s16 + $0xd70] sm:$0xff]  }
 0x18d   : > { %8773 = vmatprep.subr.bf16.mxu1 %v9547_v23  ;;  %v1851_v23 = vcombine.high %v1841_v18, %v1841_v18 }
 0x18f   : > { %8752 = vmatpush3.bf16.msra.mxu0 %v9548_v24 }
 0x190   : > { %8781 = vmatprep.subr.bf16.mxu0 %v9551_v27  ;;  %8774 = vmatpush3.bf16.msra.mxu1 %v9549_v25  ;;  %v9588_v25 = vld [vmem:[%s9876_s16 + $0xdf0] sm:$0xff]  }
 0x191   : > { %8803 = vmatprep.subr.bf16.mxu1 %v9552_v28  ;;  %v9589_v27 = vld [vmem:[%s9876_s16 + $0xd30] sm:$0xff]  }
 0x192   : > { %v8489_v33 = vpop.f32.mrf.mxu0  ;;  %6833 = vmatmul.mubr.bf16.vlgmr.msra.gmra.mxu0 %v1785_v26  ;;  %v1848_v26 = vrot.slane %v1820_v20, %v9914_v35 }
 0x193   : > { %v8511_v37 = vpop.f32.mrf.mxu1  ;;  %8782 = vmatpush3.bf16.msra.mxu0 %v9553_v29  ;;  %6873 = vmatmul.mubr.bf16.vlgmr.msra.gmra.mxu1 %v1801_v31 }
 0x194   : > { %v8490_v38 = vpop.f32.mrf.mxu0  ;;  %8783 = vmatprep.subr.bf16.mxu0 %v9555_v32  ;;  %8804 = vmatpush3.bf16.msra.mxu1 %v9554_v30  ;;  %v9590_v30 = vld [vmem:[%s9876_s16 + $0xdb0] sm:$0xff]   ;;  %v1852_v31 = vcombine.high %v1848_v26, %v1848_v26 }
 0x195   : > { %v8491_v40 = vadd.f32 %v8490_v38, %v8489_v33  ;;  %v8512_v42 = vpop.f32.mrf.mxu1  ;;  %8805 = vmatprep.subr.bf16.mxu1 %v9556_v34  ;;  %6912 = vmatprep.mubr.bf16.mxu0 %v1841_v18  ;;  %v9591_v33 = vld [vmem:[%s9876_s16 + $0xd68] sm:$0xff]  }
 0x196   : > { %v8492_v43 = vpop.f32.mrf.mxu0  ;;  %v8513_v46 = vadd.f32 %v8512_v42, %v8511_v37  ;;  %6952 = vmatprep.mubr.bf16.mxu1 %v1851_v23  ;;  %v9592_v37 = vld [vmem:[%s9876_s16 + $0xde8] sm:$0xff]  }
 0x197   : > { %v6355_v45 = vadd.f32 %v8491_v40, %v10332_v4  ;;  %v8514_v48 = vpop.f32.mrf.mxu1  ;;  %8784 = vmatpush3.bf16.msra.mxu0 %v9557_v36  ;;  %v9578_v4 = vld [vmem:[%s9876_s16 + $0xc88] sm:$0xff]  }
 0x198   : > { %v8493_v49 = vpop.f32.mrf.mxu0  ;;  %8785 = vmatprep.subr.bf16.mxu0 %v9559_v41  ;;  %8806 = vmatpush3.bf16.msra.mxu1 %v9558_v39  ;;  %v9593_v40 = vld [vmem:[%s9876_s16 + $0xd28] sm:$0xff]   ;;  %v9597_v48 = vld [vmem:[%s9876_s16 + $0xd20] sm:$0xff]  }
 0x199   : > { %v10369_v51 = vadd.f32 %v8513_v46, %v6355_v45  ;;  %v8515_v53 = vpop.f32.mrf.mxu1  ;;  %8807 = vmatprep.subr.bf16.mxu1 %v9560_v44  ;;  %v9594_v43 = vld [vmem:[%s9876_s16 + $0xda8] sm:$0xff]   ;;  %v9595_v45 = vld [vmem:[%s9876_s16 + $0xd60] sm:$0xff]  }
 0x19a   : > { %v9598_v49 = vld [vmem:[%s9876_s16 + $0xda0] sm:$0xff]   ;;  %v9602_v53 = vld [vmem:[%s9876_s16 + $0xd98] sm:$0xff]  }
 0x19b   : > { %8786 = vmatpush3.bf16.msra.mxu0 %v9561_v47  ;;  %v9596_v47 = vld [vmem:[%s9876_s16 + $0xde0] sm:$0xff]  }
 0x19c   : > { %8787 = vmatprep.subr.bf16.mxu0 %v9563_v52  ;;  %8808 = vmatpush3.bf16.msra.mxu1 %v9562_v50  ;;  %v9599_v50 = vld [vmem:[%s9876_s16 + $0xd58] sm:$0xff]  }
 0x19d   : > { %8809 = vmatprep.subr.bf16.mxu1 %v9564_v54  ;;  %v9601_v52 = vld [vmem:[%s9876_s16 + $0xd18] sm:$0xff]   ;;  %v9603_v54 = vld [vmem:[%s9876_s16 + $0xd50] sm:$0xff]  }
 0x19f   : > { %8788 = vmatpush3.bf16.msra.mxu0 %v9565_v55  ;;  %v9604_v55 = vld [vmem:[%s9876_s16 + $0xdd0] sm:$0xff]  }
 0x1a0   : > { %8789 = vmatprep.subr.bf16.mxu0 %v9567_v57  ;;  %8810 = vmatpush3.bf16.msra.mxu1 %v9566_v56  ;;  %v9605_v56 = vld [vmem:[%s9876_s16 + $0xd10] sm:$0xff]  }
 0x1a1   : > { %8811 = vmatprep.subr.bf16.mxu1 %v9568_v58  ;;  %v9606_v57 = vld [vmem:[%s9876_s16 + $0xd90] sm:$0xff]   ;;  %v9607_v58 = vld [vmem:[%s9876_s16 + $0xd48] sm:$0xff]  }
 0x1a3   : > { %8790 = vmatpush3.bf16.msra.mxu0 %v9569_v59  ;;  %v9608_v59 = vld [vmem:[%s9876_s16 + $0xdc8] sm:$0xff]  }
 0x1a4   : > { %8791 = vmatprep.subr.bf16.mxu0 %v9571_v61  ;;  %8812 = vmatpush3.bf16.msra.mxu1 %v9570_v60  ;;  %v9609_v60 = vld [vmem:[%s9876_s16 + $0xd08] sm:$0xff]  }
 0x1a5   : > { %8813 = vmatprep.subr.bf16.mxu1 %v9572_v62  ;;  %v9610_v61 = vld [vmem:[%s9876_s16 + $0xd88] sm:$0xff]   ;;  %v9611_v62 = vld [vmem:[%s9876_s16 + $0xd40] sm:$0xff]  }
 0x1a7   : > { %8792 = vmatpush3.bf16.msra.mxu0 %v9573_v63  ;;  %v9612_v63 = vld [vmem:[%s9876_s16 + $0xdc0] sm:$0xff]  }
 0x1a8   : > { %8793 = vmatprep.subr.bf16.mxu0 %v9575_v1  ;;  %8814 = vmatpush3.bf16.msra.mxu1 %v9574_v0  ;;  %v9613_v0 = vld [vmem:[%s9876_s16 + $0xd00] sm:$0xff]  }
 0x1a9   : > { %8815 = vmatprep.subr.bf16.mxu1 %v9576_v2  ;;  %v9614_v1 = vld [vmem:[%s9876_s16 + $0xd80] sm:$0xff]   ;;  %v1834_v2 = vrot.slane %v10397_v16, %v9914_v35  ;;  %v9624_v16 = vld [vmem:[%s9876_s16 + $0xe68] sm:$0xff]  }
 0x1ab   : > { %8794 = vmatpush3.bf16.msra.mxu0 %v9577_v3  ;;  %v9616_v3 = vld [vmem:[%s9876_s16 + $0xe78] sm:$0xff]  }
 0x1ac   : > { %8795 = vmatprep.subr.bf16.mxu0 %v9579_v5  ;;  %8816 = vmatpush3.bf16.msra.mxu1 %v9578_v4  ;;  %v9617_v4 = vld [vmem:[%s9876_s16 + $0xef8] sm:$0xff]  }
 0x1ad   : > { %8817 = vmatprep.subr.bf16.mxu1 %v9580_v6  ;;  %v9618_v5 = vld [vmem:[%s9876_s16 + $0xe38] sm:$0xff]  }
 0x1ae   : > { %v9619_v6 = vld [vmem:[%s9876_s16 + $0xeb8] sm:$0xff]  }
 0x1af   : > { %8796 = vmatpush3.bf16.msra.mxu0 %v9581_v7  ;;  %v1850_v7 = vcombine.high %v1834_v2, %v1834_v2 }
 0x1b0   : > { %8825 = vmatprep.subr.bf16.mxu0 %v9583_v10  ;;  %8818 = vmatpush3.bf16.msra.mxu1 %v9582_v12  ;;  %v9621_v10 = vld [vmem:[%s9876_s16 + $0xef0] sm:$0xff]  }
 0x1b1   : > { %8847 = vmatprep.subr.bf16.mxu1 %v9584_v15 }
 0x1b2   : > { %v8533_v24 = vpop.f32.mrf.mxu0  ;;  %6913 = vmatmul.mubr.bf16.vlgmr.msra.gmra.mxu0 %v1827_v14  ;;  %v9623_v14 = vld [vmem:[%s9876_s16 + $0xeb0] sm:$0xff]  }
 0x1b3   : > { %v8555_v28 = vpop.f32.mrf.mxu1  ;;  %8826 = vmatpush3.bf16.msra.mxu0 %v9585_v17  ;;  %6953 = vmatmul.mubr.bf16.vlgmr.msra.gmra.mxu1 %v1849_v21 }
 0x1b4   : > { %v8534_v29 = vpop.f32.mrf.mxu0  ;;  %8827 = vmatprep.subr.bf16.mxu0 %v9587_v22  ;;  %8848 = vmatpush3.bf16.msra.mxu1 %v9586_v19  ;;  %v9625_v19 = vld [vmem:[%s9876_s16 + $0xee8] sm:$0xff]  }
 0x1b5   : > { %v8535_v32 = vadd.f32 %v8534_v29, %v8533_v24  ;;  %v8556_v34 = vpop.f32.mrf.mxu1  ;;  %6992 = vmatprep.mubr.bf16.mxu0 %v1848_v26  ;;  %8849 = vmatprep.subr.bf16.mxu1 %v9588_v25  ;;  %v9626_v22 = vld [vmem:[%s9876_s16 + $0xe28] sm:$0xff]   ;;  %v9629_v29 = vld [vmem:[%s9876_s16 + $0xee0] sm:$0xff]  }
 0x1b6   : > { %v8536_v36 = vpop.f32.mrf.mxu0  ;;  %v8557_v39 = vadd.f32 %v8556_v34, %v8555_v28  ;;  %7032 = vmatprep.mubr.bf16.mxu1 %v1852_v31  ;;  %v9627_v25 = vld [vmem:[%s9876_s16 + $0xea8] sm:$0xff]   ;;  %v9631_v31 = vld [vmem:[%s9876_s16 + $0xea0] sm:$0xff]   ;;  %v9634_v34 = vld [vmem:[%s9876_s16 + $0xe18] sm:$0xff]  }
 0x1b7   : > { %v6435_v38 = vadd.f32 %v8535_v32, %v10369_v51  ;;  %v8558_v41 = vpop.f32.mrf.mxu1  ;;  %8828 = vmatpush3.bf16.msra.mxu0 %v9589_v27  ;;  %v9600_v51 = vld [vmem:[%s9876_s16 + $0xdd8] sm:$0xff]   ;;  %v9628_v27 = vld [vmem:[%s9876_s16 + $0xe60] sm:$0xff]  }
 0x1b8   : > { %v8537_v42 = vpop.f32.mrf.mxu0  ;;  %8829 = vmatprep.subr.bf16.mxu0 %v9591_v33  ;;  %8850 = vmatpush3.bf16.msra.mxu1 %v9590_v30  ;;  %v9630_v30 = vld [vmem:[%s9876_s16 + $0xe20] sm:$0xff]   ;;  %v9632_v32 = vld [vmem:[%s9876_s16 + $0xe58] sm:$0xff]   ;;  %v9640_v41 = vld [vmem:[%s9876_s16 + $0xe48] sm:$0xff]  }
 0x1b9   : > { %v10414_v44 = vadd.f32 %v8557_v39, %v6435_v38  ;;  %v8559_v46 = vpop.f32.mrf.mxu1  ;;  %8851 = vmatprep.subr.bf16.mxu1 %v9592_v37  ;;  %v9633_v33 = vld [vmem:[%s9876_s16 + $0xed8] sm:$0xff]   ;;  %v9636_v37 = vld [vmem:[%s9876_s16 + $0xe50] sm:$0xff]   ;;  %v9641_v42 = vld [vmem:[%s9876_s16 + $0xec8] sm:$0xff]  }
 0x1ba   : > { %v9635_v36 = vld [vmem:[%s9876_s16 + $0xe98] sm:$0xff]   ;;  %v9637_v38 = vld [vmem:[%s9876_s16 + $0xed0] sm:$0xff]   ;;  %v9645_v46 = vld [vmem:[%s9876_s16 + $0xec0] sm:$0xff]  }
 0x1bb   : > { %8830 = vmatpush3.bf16.msra.mxu0 %v9593_v40  ;;  %v9638_v39 = vld [vmem:[%s9876_s16 + $0xe10] sm:$0xff]  }
 0x1bc   : > { %8831 = vmatprep.subr.bf16.mxu0 %v9595_v45  ;;  %8852 = vmatpush3.bf16.msra.mxu1 %v9594_v43  ;;  %v9639_v40 = vld [vmem:[%s9876_s16 + $0xe90] sm:$0xff]   ;;  %v9642_v43 = vld [vmem:[%s9876_s16 + $0xe08] sm:$0xff]   ;;  %v9644_v45 = vld [vmem:[%s9876_s16 + $0xe40] sm:$0xff]  }
 0x1bd   : > { %8853 = vmatprep.subr.bf16.mxu1 %v9596_v47  ;;  %v9646_v47 = vld [vmem:[%s9876_s16 + $0xe00] sm:$0xff]  }
 0x1bf   : > { %8832 = vmatpush3.bf16.msra.mxu0 %v9597_v48  ;;  %v217_v48 = vld [vmem:[%s9912_s20 + $0x38] sm:$0xff] }
 0x1c0   : > { %8833 = vmatprep.subr.bf16.mxu0 %v9599_v50  ;;  %8854 = vmatpush3.bf16.msra.mxu1 %v9598_v49  ;;  %v9647_v49 = vld [vmem:[%s9876_s16 + $0xe80] sm:$0xff]   ;;  %v1860_v50 = vrot.slane %v217_v48, %v9914_v35 }
 0x1c1   : > { %8855 = vmatprep.subr.bf16.mxu1 %v9600_v51  ;;  %v1853_v51 = vcombine.high %v217_v48, %v217_v48  ;;  %v9685_v48 = vld [vmem:[%s9876_s16 + $0x1070] sm:$0xff]  }
 0x1c3   : > { %8834 = vmatpush3.bf16.msra.mxu0 %v9601_v52  ;;  %v9648_v52 = vld [vmem:[%s9876_s16 + $0xf78] sm:$0xff]  }
 0x1c4   : > { %8835 = vmatprep.subr.bf16.mxu0 %v9603_v54  ;;  %8856 = vmatpush3.bf16.msra.mxu1 %v9602_v53  ;;  %v1868_v53 = vcombine.high %v1860_v50, %v1860_v50  ;;  %v1876_v54 = vrot.slane %v1860_v50, %v9914_v35  ;;  %v9686_v50 = vld [vmem:[%s9876_s16 + $0x10f0] sm:$0xff]  }
 0x1c5   : > { %8857 = vmatprep.subr.bf16.mxu1 %v9604_v55  ;;  %v9649_v55 = vld [vmem:[%s9876_s16 + $0xff8] sm:$0xff]  }
 0x1c7   : > { %8836 = vmatpush3.bf16.msra.mxu0 %v9605_v56  ;;  %v10479_v56 = vrot.slane %v1853_v51, %v9914_v35  ;;  %v9687_v51 = vld [vmem:[%s9876_s16 + $0x1030] sm:$0xff]  }
 0x1c8   : > { %8837 = vmatprep.subr.bf16.mxu0 %v9607_v58  ;;  %8858 = vmatpush3.bf16.msra.mxu1 %v9606_v57  ;;  %v9650_v57 = vld [vmem:[%s9876_s16 + $0xf38] sm:$0xff]   ;;  %v1890_v58 = vrot.slane %v1868_v53, %v9914_v35 }
 0x1c9   : > { %8859 = vmatprep.subr.bf16.mxu1 %v9608_v59  ;;  %v9651_v59 = vld [vmem:[%s9876_s16 + $0xfb8] sm:$0xff]  }
 0x1cb   : > { %8838 = vmatpush3.bf16.msra.mxu0 %v9609_v60  ;;  %v1869_v60 = vcombine.high %v10479_v56, %v10479_v56 }
 0x1cc   : > { %8839 = vmatprep.subr.bf16.mxu0 %v9611_v62  ;;  %8860 = vmatpush3.bf16.msra.mxu1 %v9610_v61  ;;  %v1898_v61 = vcombine.high %v1876_v54, %v1876_v54  ;;  %v9652_v62 = vld [vmem:[%s9876_s16 + $0xf70] sm:$0xff]  }
 0x1cd   : > { %8861 = vmatprep.subr.bf16.mxu1 %v9612_v63  ;;  %v1900_v63 = vcombine.high %v1890_v58, %v1890_v58 }
 0x1cf   : > { %8840 = vmatpush3.bf16.msra.mxu0 %v9613_v0 }
 0x1d0   : > { %8869 = vmatprep.subr.bf16.mxu0 %v9616_v3  ;;  %8862 = vmatpush3.bf16.msra.mxu1 %v9614_v1  ;;  %v9653_v1 = vld [vmem:[%s9876_s16 + $0xff0] sm:$0xff]  }
 0x1d1   : > { %8891 = vmatprep.subr.bf16.mxu1 %v9617_v4  ;;  %v9654_v3 = vld [vmem:[%s9876_s16 + $0xf30] sm:$0xff]  }
 0x1d2   : > { %v8577_v9 = vpop.f32.mrf.mxu0  ;;  %6993 = vmatmul.mubr.bf16.vlgmr.msra.gmra.mxu0 %v1834_v2  ;;  %v1897_v2 = vrot.slane %v1869_v60, %v9914_v35 }
 0x1d3   : > { %v8599_v12 = vpop.f32.mrf.mxu1  ;;  %8870 = vmatpush3.bf16.msra.mxu0 %v9618_v5  ;;  %7033 = vmatmul.mubr.bf16.vlgmr.msra.gmra.mxu1 %v1850_v7 }
 0x1d4   : > { %v8578_v13 = vpop.f32.mrf.mxu0  ;;  %8871 = vmatprep.subr.bf16.mxu0 %v9620_v8  ;;  %8892 = vmatpush3.bf16.msra.mxu1 %v9619_v6  ;;  %v9655_v6 = vld [vmem:[%s9876_s16 + $0xfb0] sm:$0xff]   ;;  %v1901_v7 = vcombine.high %v1897_v2, %v1897_v2 }
 0x1d5   : > { %v8579_v15 = vadd.f32 %v8578_v13, %v8577_v9  ;;  %v8600_v17 = vpop.f32.mrf.mxu1  ;;  %8893 = vmatprep.subr.bf16.mxu1 %v9621_v10  ;;  %7072 = vmatprep.mubr.bf16.mxu0 %v1890_v58  ;;  %v9656_v9 = vld [vmem:[%s9876_s16 + $0xf68] sm:$0xff]  }
 0x1d6   : > { %v8580_v18 = vpop.f32.mrf.mxu0  ;;  %v8601_v21 = vadd.f32 %v8600_v17, %v8599_v12  ;;  %7112 = vmatprep.mubr.bf16.mxu1 %v1900_v63  ;;  %v9657_v12 = vld [vmem:[%s9876_s16 + $0xfe8] sm:$0xff]  }
 0x1d7   : > { %v6515_v20 = vadd.f32 %v8579_v15, %v10414_v44  ;;  %v8602_v23 = vpop.f32.mrf.mxu1  ;;  %8872 = vmatpush3.bf16.msra.mxu0 %v9622_v11  ;;  %v9643_v44 = vld [vmem:[%s9876_s16 + $0xe88] sm:$0xff]  }
 0x1d8   : > { %v8581_v24 = vpop.f32.mrf.mxu0  ;;  %8873 = vmatprep.subr.bf16.mxu0 %v9624_v16  ;;  %8894 = vmatpush3.bf16.msra.mxu1 %v9623_v14  ;;  %v9658_v15 = vld [vmem:[%s9876_s16 + $0xf28] sm:$0xff]   ;;  %v9662_v23 = vld [vmem:[%s9876_s16 + $0xf20] sm:$0xff]  }
 0x1d9   : > { %v10451_v26 = vadd.f32 %v8601_v21, %v6515_v20  ;;  %v8603_v28 = vpop.f32.mrf.mxu1  ;;  %8895 = vmatprep.subr.bf16.mxu1 %v9625_v19  ;;  %v9659_v18 = vld [vmem:[%s9876_s16 + $0xfa8] sm:$0xff]   ;;  %v9660_v20 = vld [vmem:[%s9876_s16 + $0xf60] sm:$0xff]  }
 0x1da   : > { %v9663_v24 = vld [vmem:[%s9876_s16 + $0xfa0] sm:$0xff]   ;;  %v9667_v28 = vld [vmem:[%s9876_s16 + $0xf98] sm:$0xff]  }
 0x1db   : > { %8874 = vmatpush3.bf16.msra.mxu0 %v9626_v22  ;;  %v9661_v22 = vld [vmem:[%s9876_s16 + $0xfe0] sm:$0xff]  }
 0x1dc   : > { %8875 = vmatprep.subr.bf16.mxu0 %v9628_v27  ;;  %8896 = vmatpush3.bf16.msra.mxu1 %v9627_v25  ;;  %v9664_v25 = vld [vmem:[%s9876_s16 + $0xf58] sm:$0xff]  }
 0x1dd   : > { %8897 = vmatprep.subr.bf16.mxu1 %v9629_v29  ;;  %v9666_v27 = vld [vmem:[%s9876_s16 + $0xf18] sm:$0xff]   ;;  %v9668_v29 = vld [vmem:[%s9876_s16 + $0xf50] sm:$0xff]  }
 0x1df   : > { %8876 = vmatpush3.bf16.msra.mxu0 %v9630_v30  ;;  %v9669_v30 = vld [vmem:[%s9876_s16 + $0xfd0] sm:$0xff]  }
 0x1e0   : > { %8877 = vmatprep.subr.bf16.mxu0 %v9632_v32  ;;  %8898 = vmatpush3.bf16.msra.mxu1 %v9631_v31  ;;  %v9670_v31 = vld [vmem:[%s9876_s16 + $0xf10] sm:$0xff]  }
 0x1e1   : > { %8899 = vmatprep.subr.bf16.mxu1 %v9633_v33  ;;  %v9671_v32 = vld [vmem:[%s9876_s16 + $0xf90] sm:$0xff]   ;;  %v9672_v33 = vld [vmem:[%s9876_s16 + $0xf48] sm:$0xff]  }
 0x1e3   : > { %8878 = vmatpush3.bf16.msra.mxu0 %v9634_v34  ;;  %v9673_v34 = vld [vmem:[%s9876_s16 + $0xfc8] sm:$0xff]  }
 0x1e4   : > { %8879 = vmatprep.subr.bf16.mxu0 %v9636_v37  ;;  %8900 = vmatpush3.bf16.msra.mxu1 %v9635_v36  ;;  %v9674_v36 = vld [vmem:[%s9876_s16 + $0xf08] sm:$0xff]  }
 0x1e5   : > { %8901 = vmatprep.subr.bf16.mxu1 %v9637_v38  ;;  %v9675_v37 = vld [vmem:[%s9876_s16 + $0xf88] sm:$0xff]   ;;  %v9676_v38 = vld [vmem:[%s9876_s16 + $0xf40] sm:$0xff]  }
 0x1e7   : > { %8880 = vmatpush3.bf16.msra.mxu0 %v9638_v39  ;;  %v9677_v39 = vld [vmem:[%s9876_s16 + $0xfc0] sm:$0xff]  }
 0x1e8   : > { %8881 = vmatprep.subr.bf16.mxu0 %v9640_v41  ;;  %8902 = vmatpush3.bf16.msra.mxu1 %v9639_v40  ;;  %v9678_v40 = vld [vmem:[%s9876_s16 + $0xf00] sm:$0xff]  }
 0x1e9   : > { %8903 = vmatprep.subr.bf16.mxu1 %v9641_v42  ;;  %v9679_v41 = vld [vmem:[%s9876_s16 + $0xf80] sm:$0xff]   ;;  %v1883_v42 = vrot.slane %v10479_v56, %v9914_v35  ;;  %v9689_v56 = vld [vmem:[%s9876_s16 + $0x1068] sm:$0xff]  }
 0x1eb   : > { %8882 = vmatpush3.bf16.msra.mxu0 %v9642_v43  ;;  %v9681_v43 = vld [vmem:[%s9876_s16 + $0x1078] sm:$0xff]  }
 0x1ec   : > { %8883 = vmatprep.subr.bf16.mxu0 %v9644_v45  ;;  %8904 = vmatpush3.bf16.msra.mxu1 %v9643_v44  ;;  %v9682_v44 = vld [vmem:[%s9876_s16 + $0x10f8] sm:$0xff]  }
 0x1ed   : > { %8905 = vmatprep.subr.bf16.mxu1 %v9645_v46  ;;  %v9683_v45 = vld [vmem:[%s9876_s16 + $0x1038] sm:$0xff]  }
 0x1ee   : > { %v9684_v46 = vld [vmem:[%s9876_s16 + $0x10b8] sm:$0xff]  }
 0x1ef   : > { %8884 = vmatpush3.bf16.msra.mxu0 %v9646_v47  ;;  %v1899_v47 = vcombine.high %v1883_v42, %v1883_v42 }
 0x1f0   : > { %8913 = vmatprep.subr.bf16.mxu0 %v9648_v52  ;;  %8906 = vmatpush3.bf16.msra.mxu1 %v9647_v49 }
 0x1f1   : > { %8935 = vmatprep.subr.bf16.mxu1 %v9649_v55 }
 0x1f2   : > { %v8621_v0 = vpop.f32.mrf.mxu0  ;;  %7073 = vmatmul.mubr.bf16.vlgmr.msra.gmra.mxu0 %v1876_v54  ;;  %v9688_v54 = vld [vmem:[%s9876_s16 + $0x10b0] sm:$0xff]  }
 0x1f3   : > { %v8643_v4 = vpop.f32.mrf.mxu1  ;;  %8914 = vmatpush3.bf16.msra.mxu0 %v9650_v57  ;;  %7113 = vmatmul.mubr.bf16.vlgmr.msra.gmra.mxu1 %v1898_v61 }
 0x1f4   : > { %v8622_v5 = vpop.f32.mrf.mxu0  ;;  %8915 = vmatprep.subr.bf16.mxu0 %v9652_v62  ;;  %8936 = vmatpush3.bf16.msra.mxu1 %v9651_v59  ;;  %v9690_v59 = vld [vmem:[%s9876_s16 + $0x10e8] sm:$0xff]  }
 0x1f5   : > { %v8623_v8 = vadd.f32 %v8622_v5, %v8621_v0  ;;  %v8644_v10 = vpop.f32.mrf.mxu1  ;;  %7152 = vmatprep.mubr.bf16.mxu0 %v1897_v2  ;;  %8937 = vmatprep.subr.bf16.mxu1 %v9653_v1  ;;  %v9691_v62 = vld [vmem:[%s9876_s16 + $0x1028] sm:$0xff]   ;;  %v9694_v5 = vld [vmem:[%s9876_s16 + $0x10e0] sm:$0xff]  }
 0x1f6   : > { %v8624_v11 = vpop.f32.mrf.mxu0  ;;  %v8645_v14 = vadd.f32 %v8644_v10, %v8643_v4  ;;  %7192 = vmatprep.mubr.bf16.mxu1 %v1901_v7  ;;  %v9692_v1 = vld [vmem:[%s9876_s16 + $0x10a8] sm:$0xff]   ;;  %v9696_v7 = vld [vmem:[%s9876_s16 + $0x10a0] sm:$0xff]   ;;  %v9699_v10 = vld [vmem:[%s9876_s16 + $0x1018] sm:$0xff]  }
 0x1f7   : > { %v6595_v13 = vadd.f32 %v8623_v8, %v10451_v26  ;;  %v8646_v16 = vpop.f32.mrf.mxu1  ;;  %8916 = vmatpush3.bf16.msra.mxu0 %v9654_v3  ;;  %v9665_v26 = vld [vmem:[%s9876_s16 + $0xfd8] sm:$0xff]   ;;  %v9693_v3 = vld [vmem:[%s9876_s16 + $0x1060] sm:$0xff]  }
 0x1f8   : > { %v8625_v17 = vpop.f32.mrf.mxu0  ;;  %8917 = vmatprep.subr.bf16.mxu0 %v9656_v9  ;;  %8938 = vmatpush3.bf16.msra.mxu1 %v9655_v6  ;;  %v9695_v6 = vld [vmem:[%s9876_s16 + $0x1020] sm:$0xff]   ;;  %v9697_v8 = vld [vmem:[%s9876_s16 + $0x1058] sm:$0xff]   ;;  %v9705_v16 = vld [vmem:[%s9876_s16 + $0x1048] sm:$0xff]  }
 0x1f9   : > { %v10496_v19 = vadd.f32 %v8645_v14, %v6595_v13  ;;  %v8647_v21 = vpop.f32.mrf.mxu1  ;;  %8939 = vmatprep.subr.bf16.mxu1 %v9657_v12  ;;  %v9698_v9 = vld [vmem:[%s9876_s16 + $0x10d8] sm:$0xff]   ;;  %v9701_v12 = vld [vmem:[%s9876_s16 + $0x1050] sm:$0xff]   ;;  %v9706_v17 = vld [vmem:[%s9876_s16 + $0x10c8] sm:$0xff]  }
 0x1fa   : > { %v9700_v11 = vld [vmem:[%s9876_s16 + $0x1098] sm:$0xff]   ;;  %v9702_v13 = vld [vmem:[%s9876_s16 + $0x10d0] sm:$0xff]   ;;  %v9710_v21 = vld [vmem:[%s9876_s16 + $0x10c0] sm:$0xff]  }
 0x1fb   : > { %8918 = vmatpush3.bf16.msra.mxu0 %v9658_v15  ;;  %v9703_v14 = vld [vmem:[%s9876_s16 + $0x1010] sm:$0xff]  }
 0x1fc   : > { %8919 = vmatprep.subr.bf16.mxu0 %v9660_v20  ;;  %8940 = vmatpush3.bf16.msra.mxu1 %v9659_v18  ;;  %v9704_v15 = vld [vmem:[%s9876_s16 + $0x1090] sm:$0xff]   ;;  %v9707_v18 = vld [vmem:[%s9876_s16 + $0x1008] sm:$0xff]   ;;  %v9709_v20 = vld [vmem:[%s9876_s16 + $0x1040] sm:$0xff]  }
 0x1fd   : > { %8941 = vmatprep.subr.bf16.mxu1 %v9661_v22  ;;  %v9711_v22 = vld [vmem:[%s9876_s16 + $0x1000] sm:$0xff]  }
 0x1ff   : > { %8920 = vmatpush3.bf16.msra.mxu0 %v9662_v23  ;;  %v218_v23 = vld [vmem:[%s9912_s20 + $0x40] sm:$0xff] }
 0x200   : > { %8921 = vmatprep.subr.bf16.mxu0 %v9664_v25  ;;  %8942 = vmatpush3.bf16.msra.mxu1 %v9663_v24  ;;  %v9712_v24 = vld [vmem:[%s9876_s16 + $0x1080] sm:$0xff]   ;;  %v1909_v25 = vrot.slane %v218_v23, %v9914_v35 }
 0x201   : > { %8943 = vmatprep.subr.bf16.mxu1 %v9665_v26  ;;  %v1902_v26 = vcombine.high %v218_v23, %v218_v23  ;;  %v9750_v23 = vld [vmem:[%s9876_s16 + $0x1270] sm:$0xff]  }
 0x203   : > { %8922 = vmatpush3.bf16.msra.mxu0 %v9666_v27  ;;  %v9713_v27 = vld [vmem:[%s9876_s16 + $0x1178] sm:$0xff]  }
 0x204   : > { %8923 = vmatprep.subr.bf16.mxu0 %v9668_v29  ;;  %8944 = vmatpush3.bf16.msra.mxu1 %v9667_v28  ;;  %v1917_v28 = vcombine.high %v1909_v25, %v1909_v25  ;;  %v1925_v29 = vrot.slane %v1909_v25, %v9914_v35  ;;  %v9751_v25 = vld [vmem:[%s9876_s16 + $0x12f0] sm:$0xff]  }
 0x205   : > { %8945 = vmatprep.subr.bf16.mxu1 %v9669_v30  ;;  %v9714_v30 = vld [vmem:[%s9876_s16 + $0x11f8] sm:$0xff]  }
 0x207   : > { %8924 = vmatpush3.bf16.msra.mxu0 %v9670_v31  ;;  %v10561_v31 = vrot.slane %v1902_v26, %v9914_v35  ;;  %v9752_v26 = vld [vmem:[%s9876_s16 + $0x1230] sm:$0xff]  }
 0x208   : > { %8925 = vmatprep.subr.bf16.mxu0 %v9672_v33  ;;  %8946 = vmatpush3.bf16.msra.mxu1 %v9671_v32  ;;  %v9715_v32 = vld [vmem:[%s9876_s16 + $0x1138] sm:$0xff]   ;;  %v1939_v33 = vrot.slane %v1917_v28, %v9914_v35 }
 0x209   : > { %8947 = vmatprep.subr.bf16.mxu1 %v9673_v34  ;;  %v9716_v34 = vld [vmem:[%s9876_s16 + $0x11b8] sm:$0xff]  }
 0x20b   : > { %8926 = vmatpush3.bf16.msra.mxu0 %v9674_v36  ;;  %v1918_v36 = vcombine.high %v10561_v31, %v10561_v31 }
 0x20c   : > { %8927 = vmatprep.subr.bf16.mxu0 %v9676_v38  ;;  %8948 = vmatpush3.bf16.msra.mxu1 %v9675_v37  ;;  %v1947_v37 = vcombine.high %v1925_v29, %v1925_v29  ;;  %v9717_v38 = vld [vmem:[%s9876_s16 + $0x1170] sm:$0xff]  }
 0x20d   : > { %8949 = vmatprep.subr.bf16.mxu1 %v9677_v39  ;;  %v1949_v39 = vcombine.high %v1939_v33, %v1939_v33 }
 0x20f   : > { %8928 = vmatpush3.bf16.msra.mxu0 %v9678_v40 }
 0x210   : > { %8957 = vmatprep.subr.bf16.mxu0 %v9681_v43  ;;  %8950 = vmatpush3.bf16.msra.mxu1 %v9679_v41  ;;  %v9718_v41 = vld [vmem:[%s9876_s16 + $0x11f0] sm:$0xff]  }
 0x211   : > { %8979 = vmatprep.subr.bf16.mxu1 %v9682_v44  ;;  %v9719_v43 = vld [vmem:[%s9876_s16 + $0x1130] sm:$0xff]  }
 0x212   : > { %v8665_v49 = vpop.f32.mrf.mxu0  ;;  %7153 = vmatmul.mubr.bf16.vlgmr.msra.gmra.mxu0 %v1883_v42  ;;  %v1946_v42 = vrot.slane %v1918_v36, %v9914_v35 }
 0x213   : > { %v8687_v52 = vpop.f32.mrf.mxu1  ;;  %8958 = vmatpush3.bf16.msra.mxu0 %v9683_v45  ;;  %7193 = vmatmul.mubr.bf16.vlgmr.msra.gmra.mxu1 %v1899_v47 }
 0x214   : > { %v8666_v53 = vpop.f32.mrf.mxu0  ;;  %8959 = vmatprep.subr.bf16.mxu0 %v9685_v48  ;;  %8980 = vmatpush3.bf16.msra.mxu1 %v9684_v46  ;;  %v9720_v46 = vld [vmem:[%s9876_s16 + $0x11b0] sm:$0xff]   ;;  %v1950_v47 = vcombine.high %v1946_v42, %v1946_v42 }
 0x215   : > { %v8667_v55 = vadd.f32 %v8666_v53, %v8665_v49  ;;  %v8688_v57 = vpop.f32.mrf.mxu1  ;;  %8981 = vmatprep.subr.bf16.mxu1 %v9686_v50  ;;  %7232 = vmatprep.mubr.bf16.mxu0 %v1939_v33  ;;  %v9721_v49 = vld [vmem:[%s9876_s16 + $0x1168] sm:$0xff]  }
 0x216   : > { %v8668_v58 = vpop.f32.mrf.mxu0  ;;  %v8689_v61 = vadd.f32 %v8688_v57, %v8687_v52  ;;  %7272 = vmatprep.mubr.bf16.mxu1 %v1949_v39  ;;  %v9722_v52 = vld [vmem:[%s9876_s16 + $0x11e8] sm:$0xff]  }
 0x217   : > { %v6675_v60 = vadd.f32 %v8667_v55, %v10496_v19  ;;  %v8690_v63 = vpop.f32.mrf.mxu1  ;;  %8960 = vmatpush3.bf16.msra.mxu0 %v9687_v51  ;;  %v9708_v19 = vld [vmem:[%s9876_s16 + $0x1088] sm:$0xff]  }
 0x218   : > { %v8669_v0 = vpop.f32.mrf.mxu0  ;;  %8961 = vmatprep.subr.bf16.mxu0 %v9689_v56  ;;  %8982 = vmatpush3.bf16.msra.mxu1 %v9688_v54  ;;  %v9723_v55 = vld [vmem:[%s9876_s16 + $0x1128] sm:$0xff]   ;;  %v9727_v63 = vld [vmem:[%s9876_s16 + $0x1120] sm:$0xff]  }
 0x219   : > { %v10533_v2 = vadd.f32 %v8689_v61, %v6675_v60  ;;  %v8691_v4 = vpop.f32.mrf.mxu1  ;;  %8983 = vmatprep.subr.bf16.mxu1 %v9690_v59  ;;  %v9724_v58 = vld [vmem:[%s9876_s16 + $0x11a8] sm:$0xff]   ;;  %v9725_v60 = vld [vmem:[%s9876_s16 + $0x1160] sm:$0xff]  }
 0x21a   : > { %v9728_v0 = vld [vmem:[%s9876_s16 + $0x11a0] sm:$0xff]   ;;  %v9732_v4 = vld [vmem:[%s9876_s16 + $0x1198] sm:$0xff]  }
 0x21b   : > { %8962 = vmatpush3.bf16.msra.mxu0 %v9691_v62  ;;  %v9726_v62 = vld [vmem:[%s9876_s16 + $0x11e0] sm:$0xff]  }
 0x21c   : > { %8963 = vmatprep.subr.bf16.mxu0 %v9693_v3  ;;  %8984 = vmatpush3.bf16.msra.mxu1 %v9692_v1  ;;  %v9729_v1 = vld [vmem:[%s9876_s16 + $0x1158] sm:$0xff]  }
 0x21d   : > { %8985 = vmatprep.subr.bf16.mxu1 %v9694_v5  ;;  %v9731_v3 = vld [vmem:[%s9876_s16 + $0x1118] sm:$0xff]   ;;  %v9733_v5 = vld [vmem:[%s9876_s16 + $0x1150] sm:$0xff]  }
 0x21f   : > { %8964 = vmatpush3.bf16.msra.mxu0 %v9695_v6  ;;  %v9734_v6 = vld [vmem:[%s9876_s16 + $0x11d0] sm:$0xff]  }
 0x220   : > { %8965 = vmatprep.subr.bf16.mxu0 %v9697_v8  ;;  %8986 = vmatpush3.bf16.msra.mxu1 %v9696_v7  ;;  %v9735_v7 = vld [vmem:[%s9876_s16 + $0x1110] sm:$0xff]  }
 0x221   : > { %8987 = vmatprep.subr.bf16.mxu1 %v9698_v9  ;;  %v9736_v8 = vld [vmem:[%s9876_s16 + $0x1190] sm:$0xff]   ;;  %v9737_v9 = vld [vmem:[%s9876_s16 + $0x1148] sm:$0xff]  }
 0x223   : > { %8966 = vmatpush3.bf16.msra.mxu0 %v9699_v10  ;;  %v9738_v10 = vld [vmem:[%s9876_s16 + $0x11c8] sm:$0xff]  }
 0x224   : > { %8967 = vmatprep.subr.bf16.mxu0 %v9701_v12  ;;  %8988 = vmatpush3.bf16.msra.mxu1 %v9700_v11  ;;  %v9739_v11 = vld [vmem:[%s9876_s16 + $0x1108] sm:$0xff]  }
 0x225   : > { %8989 = vmatprep.subr.bf16.mxu1 %v9702_v13  ;;  %v9740_v12 = vld [vmem:[%s9876_s16 + $0x1188] sm:$0xff]   ;;  %v9741_v13 = vld [vmem:[%s9876_s16 + $0x1140] sm:$0xff]  }
 0x227   : > { %8968 = vmatpush3.bf16.msra.mxu0 %v9703_v14  ;;  %v9742_v14 = vld [vmem:[%s9876_s16 + $0x11c0] sm:$0xff]  }
 0x228   : > { %8969 = vmatprep.subr.bf16.mxu0 %v9705_v16  ;;  %8990 = vmatpush3.bf16.msra.mxu1 %v9704_v15  ;;  %v9743_v15 = vld [vmem:[%s9876_s16 + $0x1100] sm:$0xff]  }
 0x229   : > { %8991 = vmatprep.subr.bf16.mxu1 %v9706_v17  ;;  %v9744_v16 = vld [vmem:[%s9876_s16 + $0x1180] sm:$0xff]   ;;  %v1932_v17 = vrot.slane %v10561_v31, %v9914_v35  ;;  %v9754_v31 = vld [vmem:[%s9876_s16 + $0x1268] sm:$0xff]  }
 0x22b   : > { %8970 = vmatpush3.bf16.msra.mxu0 %v9707_v18  ;;  %v9746_v18 = vld [vmem:[%s9876_s16 + $0x1278] sm:$0xff]  }
 0x22c   : > { %8971 = vmatprep.subr.bf16.mxu0 %v9709_v20  ;;  %8992 = vmatpush3.bf16.msra.mxu1 %v9708_v19  ;;  %v9747_v19 = vld [vmem:[%s9876_s16 + $0x12f8] sm:$0xff]  }
 0x22d   : > { %8993 = vmatprep.subr.bf16.mxu1 %v9710_v21  ;;  %v9748_v20 = vld [vmem:[%s9876_s16 + $0x1238] sm:$0xff]  }
 0x22e   : > { %v9749_v21 = vld [vmem:[%s9876_s16 + $0x12b8] sm:$0xff]  }
 0x22f   : > { %8972 = vmatpush3.bf16.msra.mxu0 %v9711_v22  ;;  %v1948_v22 = vcombine.high %v1932_v17, %v1932_v17 }
 0x230   : > { %9001 = vmatprep.subr.bf16.mxu0 %v9713_v27  ;;  %8994 = vmatpush3.bf16.msra.mxu1 %v9712_v24 }
 0x231   : > { %9023 = vmatprep.subr.bf16.mxu1 %v9714_v30 }
 0x232   : > { %v8709_v40 = vpop.f32.mrf.mxu0  ;;  %7233 = vmatmul.mubr.bf16.vlgmr.msra.gmra.mxu0 %v1925_v29  ;;  %v9753_v29 = vld [vmem:[%s9876_s16 + $0x12b0] sm:$0xff]  }
 0x233   : > { %v8731_v44 = vpop.f32.mrf.mxu1  ;;  %9002 = vmatpush3.bf16.msra.mxu0 %v9715_v32  ;;  %7273 = vmatmul.mubr.bf16.vlgmr.msra.gmra.mxu1 %v1947_v37 }
 0x234   : > { %v8710_v45 = vpop.f32.mrf.mxu0  ;;  %9003 = vmatprep.subr.bf16.mxu0 %v9717_v38  ;;  %9024 = vmatpush3.bf16.msra.mxu1 %v9716_v34  ;;  %v9755_v34 = vld [vmem:[%s9876_s16 + $0x12e8] sm:$0xff]  }
 0x235   : > { %v8711_v48 = vadd.f32 %v8710_v45, %v8709_v40  ;;  %v8732_v50 = vpop.f32.mrf.mxu1  ;;  %7312 = vmatprep.mubr.bf16.mxu0 %v1946_v42  ;;  %9025 = vmatprep.subr.bf16.mxu1 %v9718_v41  ;;  %v9756_v38 = vld [vmem:[%s9876_s16 + $0x1228] sm:$0xff]   ;;  %v9759_v45 = vld [vmem:[%s9876_s16 + $0x12e0] sm:$0xff]  }
 0x236   : > { %v8712_v51 = vpop.f32.mrf.mxu0  ;;  %v8733_v54 = vadd.f32 %v8732_v50, %v8731_v44  ;;  %7352 = vmatprep.mubr.bf16.mxu1 %v1950_v47  ;;  %v9757_v41 = vld [vmem:[%s9876_s16 + $0x12a8] sm:$0xff]   ;;  %v9761_v47 = vld [vmem:[%s9876_s16 + $0x12a0] sm:$0xff]   ;;  %v9764_v50 = vld [vmem:[%s9876_s16 + $0x1218] sm:$0xff]  }
 0x237   : > { %v6755_v53 = vadd.f32 %v8711_v48, %v10533_v2  ;;  %v8734_v56 = vpop.f32.mrf.mxu1  ;;  %9004 = vmatpush3.bf16.msra.mxu0 %v9719_v43  ;;  %v9730_v2 = vld [vmem:[%s9876_s16 + $0x11d8] sm:$0xff]   ;;  %v9758_v43 = vld [vmem:[%s9876_s16 + $0x1260] sm:$0xff]  }
 0x238   : > { %v8713_v57 = vpop.f32.mrf.mxu0  ;;  %9005 = vmatprep.subr.bf16.mxu0 %v9721_v49  ;;  %9026 = vmatpush3.bf16.msra.mxu1 %v9720_v46  ;;  %v9760_v46 = vld [vmem:[%s9876_s16 + $0x1220] sm:$0xff]   ;;  %v9762_v48 = vld [vmem:[%s9876_s16 + $0x1258] sm:$0xff]   ;;  %v9770_v56 = vld [vmem:[%s9876_s16 + $0x1248] sm:$0xff]  }
 0x239   : > { %v10578_v59 = vadd.f32 %v8733_v54, %v6755_v53  ;;  %v8735_v61 = vpop.f32.mrf.mxu1  ;;  %9027 = vmatprep.subr.bf16.mxu1 %v9722_v52  ;;  %v9763_v49 = vld [vmem:[%s9876_s16 + $0x12d8] sm:$0xff]   ;;  %v9766_v52 = vld [vmem:[%s9876_s16 + $0x1250] sm:$0xff]   ;;  %v9771_v57 = vld [vmem:[%s9876_s16 + $0x12c8] sm:$0xff]  }
 0x23a   : > { %v9765_v51 = vld [vmem:[%s9876_s16 + $0x1298] sm:$0xff]   ;;  %v9767_v53 = vld [vmem:[%s9876_s16 + $0x12d0] sm:$0xff]   ;;  %v9775_v61 = vld [vmem:[%s9876_s16 + $0x12c0] sm:$0xff]  }
 0x23b   : > { %9006 = vmatpush3.bf16.msra.mxu0 %v9723_v55  ;;  %v9768_v54 = vld [vmem:[%s9876_s16 + $0x1210] sm:$0xff]  }
 0x23c   : > { %9007 = vmatprep.subr.bf16.mxu0 %v9725_v60  ;;  %9028 = vmatpush3.bf16.msra.mxu1 %v9724_v58  ;;  %v9769_v55 = vld [vmem:[%s9876_s16 + $0x1290] sm:$0xff]   ;;  %v9772_v58 = vld [vmem:[%s9876_s16 + $0x1208] sm:$0xff]   ;;  %v9774_v60 = vld [vmem:[%s9876_s16 + $0x1240] sm:$0xff]  }
 0x23d   : > { %9029 = vmatprep.subr.bf16.mxu1 %v9726_v62  ;;  %v9776_v62 = vld [vmem:[%s9876_s16 + $0x1200] sm:$0xff]  }
 0x23f   : > { %9008 = vmatpush3.bf16.msra.mxu0 %v9727_v63  ;;  %v219_v63 = vld [vmem:[%s9912_s20 + $0x48] sm:$0xff] }
 0x240   : > { %9009 = vmatprep.subr.bf16.mxu0 %v9729_v1  ;;  %9030 = vmatpush3.bf16.msra.mxu1 %v9728_v0  ;;  %v1958_v0 = vrot.slane %v219_v63, %v9914_v35  ;;  %v9778_v1 = vld [vmem:[%s9876_s16 + $0x1378] sm:$0xff]  }
 0x241   : > { %9031 = vmatprep.subr.bf16.mxu1 %v9730_v2  ;;  %v1951_v2 = vcombine.high %v219_v63, %v219_v63 }
 0x243   : > { %9010 = vmatpush3.bf16.msra.mxu0 %v9731_v3  ;;  %v9777_v3 = vld [vmem:[%s9876_s16 + $0x1280] sm:$0xff]  }
 0x244   : > { %9011 = vmatprep.subr.bf16.mxu0 %v9733_v5  ;;  %9032 = vmatpush3.bf16.msra.mxu1 %v9732_v4  ;;  %v1966_v4 = vcombine.high %v1958_v0, %v1958_v0  ;;  %v1974_v5 = vrot.slane %v1958_v0, %v9914_v35 }
 0x245   : > { %9033 = vmatprep.subr.bf16.mxu1 %v9734_v6  ;;  %v9779_v6 = vld [vmem:[%s9876_s16 + $0x13f8] sm:$0xff]  }
 0x247   : > { %9012 = vmatpush3.bf16.msra.mxu0 %v9735_v7  ;;  %v10643_v7 = vrot.slane %v1951_v2, %v9914_v35 }
 0x248   : > { %9013 = vmatprep.subr.bf16.mxu0 %v9737_v9  ;;  %9034 = vmatpush3.bf16.msra.mxu1 %v9736_v8  ;;  %v1988_v8 = vrot.slane %v1966_v4, %v9914_v35  ;;  %v9780_v9 = vld [vmem:[%s9876_s16 + $0x1338] sm:$0xff]  }
 0x249   : > { %9035 = vmatprep.subr.bf16.mxu1 %v9738_v10  ;;  %v1967_v10 = vcombine.high %v10643_v7, %v10643_v7 }
 0x24b   : > { %9014 = vmatpush3.bf16.msra.mxu0 %v9739_v11  ;;  %v1996_v11 = vcombine.high %v1974_v5, %v1974_v5 }
 0x24c   : > { %9015 = vmatprep.subr.bf16.mxu0 %v9741_v13  ;;  %9036 = vmatpush3.bf16.msra.mxu1 %v9740_v12  ;;  %v9782_v12 = vld [vmem:[%s9876_s16 + $0x1370] sm:$0xff]   ;;  %v1998_v13 = vcombine.high %v1988_v8, %v1988_v8 }
 0x24d   : > { %9037 = vmatprep.subr.bf16.mxu1 %v9742_v14 }
 0x24f   : > { %9016 = vmatpush3.bf16.msra.mxu0 %v9743_v15  ;;  %v9781_v15 = vld [vmem:[%s9876_s16 + $0x13b8] sm:$0xff]  }
 0x250   : > { %9045 = vmatprep.subr.bf16.mxu0 %v9746_v18  ;;  %9038 = vmatpush3.bf16.msra.mxu1 %v9744_v16  ;;  %v1995_v16 = vrot.slane %v1967_v10, %v9914_v35 }
 0x251   : > { %9067 = vmatprep.subr.bf16.mxu1 %v9747_v19 }
 0x252   : > { %v8753_v24 = vpop.f32.mrf.mxu0  ;;  %7313 = vmatmul.mubr.bf16.vlgmr.msra.gmra.mxu0 %v1932_v17  ;;  %v9783_v17 = vld [vmem:[%s9876_s16 + $0x13f0] sm:$0xff]  }
 0x253   : > { %v8775_v27 = vpop.f32.mrf.mxu1  ;;  %9046 = vmatpush3.bf16.msra.mxu0 %v9748_v20  ;;  %7353 = vmatmul.mubr.bf16.vlgmr.msra.gmra.mxu1 %v1948_v22  ;;  %v9784_v20 = vld [vmem:[%s9876_s16 + $0x1330] sm:$0xff]  }
 0x254   : > { %v8754_v28 = vpop.f32.mrf.mxu0  ;;  %9047 = vmatprep.subr.bf16.mxu0 %v9750_v23  ;;  %9068 = vmatpush3.bf16.msra.mxu1 %v9749_v21  ;;  %v1999_v21 = vcombine.high %v1995_v16, %v1995_v16  ;;  %v9786_v23 = vld [vmem:[%s9876_s16 + $0x1368] sm:$0xff]  }
 0x255   : > { %v8755_v30 = vadd.f32 %v8754_v28, %v8753_v24  ;;  %v8776_v32 = vpop.f32.mrf.mxu1  ;;  %9069 = vmatprep.subr.bf16.mxu1 %v9751_v25  ;;  %7392 = vmatprep.mubr.bf16.mxu0 %v1988_v8 }
 0x256   : > { %v8756_v33 = vpop.f32.mrf.mxu0  ;;  %v8777_v37 = vadd.f32 %v8776_v32, %v8775_v27  ;;  %7432 = vmatprep.mubr.bf16.mxu1 %v1998_v13  ;;  %v9788_v32 = vld [vmem:[%s9876_s16 + $0x1328] sm:$0xff]  }
 0x257   : > { %v6835_v36 = vadd.f32 %v8755_v30, %v10578_v59  ;;  %v8778_v39 = vpop.f32.mrf.mxu1  ;;  %9048 = vmatpush3.bf16.msra.mxu0 %v9752_v26  ;;  %v9773_v59 = vld [vmem:[%s9876_s16 + $0x1288] sm:$0xff]   ;;  %v9785_v26 = vld [vmem:[%s9876_s16 + $0x13b0] sm:$0xff]  }
 0x258   : > { %v8757_v40 = vpop.f32.mrf.mxu0  ;;  %9049 = vmatprep.subr.bf16.mxu0 %v9754_v31  ;;  %9070 = vmatpush3.bf16.msra.mxu1 %v9753_v29  ;;  %v9787_v29 = vld [vmem:[%s9876_s16 + $0x13e8] sm:$0xff]   ;;  %v9792_v39 = vld [vmem:[%s9876_s16 + $0x1320] sm:$0xff]  }
 0x259   : > { %v10615_v42 = vadd.f32 %v8777_v37, %v6835_v36  ;;  %v8779_v44 = vpop.f32.mrf.mxu1  ;;  %9071 = vmatprep.subr.bf16.mxu1 %v9755_v34  ;;  %v9790_v34 = vld [vmem:[%s9876_s16 + $0x1360] sm:$0xff]   ;;  %v9789_v37 = vld [vmem:[%s9876_s16 + $0x13a8] sm:$0xff]   ;;  %v9794_v40 = vld [vmem:[%s9876_s16 + $0x1358] sm:$0xff]  }
 0x25a   : > { %v9798_v44 = vld [vmem:[%s9876_s16 + $0x1350] sm:$0xff]  }
 0x25b   : > { %9050 = vmatpush3.bf16.msra.mxu0 %v9756_v38  ;;  %v9791_v38 = vld [vmem:[%s9876_s16 + $0x13e0] sm:$0xff]  }
 0x25c   : > { %9051 = vmatprep.subr.bf16.mxu0 %v9758_v43  ;;  %9072 = vmatpush3.bf16.msra.mxu1 %v9757_v41  ;;  %v9793_v41 = vld [vmem:[%s9876_s16 + $0x13a0] sm:$0xff]   ;;  %v9796_v43 = vld [vmem:[%s9876_s16 + $0x1318] sm:$0xff]  }
 0x25d   : > { %9073 = vmatprep.subr.bf16.mxu1 %v9759_v45  ;;  %v9797_v45 = vld [vmem:[%s9876_s16 + $0x1398] sm:$0xff]  }
 0x25f   : > { %9052 = vmatpush3.bf16.msra.mxu0 %v9760_v46  ;;  %v9799_v46 = vld [vmem:[%s9876_s16 + $0x13d0] sm:$0xff]  }
 0x260   : > { %9053 = vmatprep.subr.bf16.mxu0 %v9762_v48  ;;  %9074 = vmatpush3.bf16.msra.mxu1 %v9761_v47  ;;  %v9800_v47 = vld [vmem:[%s9876_s16 + $0x1310] sm:$0xff]   ;;  %v9802_v48 = vld [vmem:[%s9876_s16 + $0x1348] sm:$0xff]  }
 0x261   : > { %9075 = vmatprep.subr.bf16.mxu1 %v9763_v49  ;;  %v9801_v49 = vld [vmem:[%s9876_s16 + $0x1390] sm:$0xff]  }
 0x263   : > { %9054 = vmatpush3.bf16.msra.mxu0 %v9764_v50  ;;  %v9803_v50 = vld [vmem:[%s9876_s16 + $0x13c8] sm:$0xff]  }
 0x264   : > { %9055 = vmatprep.subr.bf16.mxu0 %v9766_v52  ;;  %9076 = vmatpush3.bf16.msra.mxu1 %v9765_v51  ;;  %v9804_v51 = vld [vmem:[%s9876_s16 + $0x1308] sm:$0xff]   ;;  %v9806_v52 = vld [vmem:[%s9876_s16 + $0x1340] sm:$0xff]  }
 0x265   : > { %9077 = vmatprep.subr.bf16.mxu1 %v9767_v53  ;;  %v9805_v53 = vld [vmem:[%s9876_s16 + $0x1388] sm:$0xff]  }
 0x267   : > { %9056 = vmatpush3.bf16.msra.mxu0 %v9768_v54  ;;  %v9807_v54 = vld [vmem:[%s9876_s16 + $0x13c0] sm:$0xff]  }
 0x268   : > { %9057 = vmatprep.subr.bf16.mxu0 %v9770_v56  ;;  %9078 = vmatpush3.bf16.msra.mxu1 %v9769_v55  ;;  %v9808_v55 = vld [vmem:[%s9876_s16 + $0x1300] sm:$0xff]   ;;  %v1981_v56 = vrot.slane %v10643_v7, %v9914_v35 }
 0x269   : > { %9079 = vmatprep.subr.bf16.mxu1 %v9771_v57  ;;  %v9809_v57 = vld [vmem:[%s9876_s16 + $0x1380] sm:$0xff]  }
 0x26b   : > { %9058 = vmatpush3.bf16.msra.mxu0 %v9772_v58  ;;  %v1997_v58 = vcombine.high %v1981_v56, %v1981_v56 }
 0x26c   : > { %9059 = vmatprep.subr.bf16.mxu0 %v9774_v60  ;;  %9080 = vmatpush3.bf16.msra.mxu1 %v9773_v59 }
 0x26d   : > { %9081 = vmatprep.subr.bf16.mxu1 %v9775_v61 }
 0x26f   : > { %9060 = vmatpush3.bf16.msra.mxu0 %v9776_v62 }
 0x270   : > { %9089 = vmatprep.subr.bf16.mxu0 %v9778_v1  ;;  %9082 = vmatpush3.bf16.msra.mxu1 %v9777_v3 }
 0x271   : > { %9111 = vmatprep.subr.bf16.mxu1 %v9779_v6 }
 0x272   : > { %v8797_v14 = vpop.f32.mrf.mxu0  ;;  %7393 = vmatmul.mubr.bf16.vlgmr.msra.gmra.mxu0 %v1974_v5 }
 0x273   : > { %v8819_v18 = vpop.f32.mrf.mxu1  ;;  %9090 = vmatpush3.bf16.msra.mxu0 %v9780_v9  ;;  %7433 = vmatmul.mubr.bf16.vlgmr.msra.gmra.mxu1 %v1996_v11 }
 0x274   : > { %v8798_v19 = vpop.f32.mrf.mxu0  ;;  %9091 = vmatprep.subr.bf16.mxu0 %v9782_v12  ;;  %9112 = vmatpush3.bf16.msra.mxu1 %v9781_v15 }
 0x275   : > { %v8799_v22 = vadd.f32 %v8798_v19, %v8797_v14  ;;  %v8820_v24 = vpop.f32.mrf.mxu1  ;;  %7472 = vmatprep.mubr.bf16.mxu0 %v1995_v16  ;;  %9113 = vmatprep.subr.bf16.mxu1 %v9783_v17 }
 0x276   : > { %v8800_v25 = vpop.f32.mrf.mxu0  ;;  %v8821_v28 = vadd.f32 %v8820_v24, %v8819_v18  ;;  %7512 = vmatprep.mubr.bf16.mxu1 %v1999_v21  ;;  %v9836_v24 = vmov 0.0  }
 0x277   : > { %v6915_v27 = vadd.f32 %v8799_v22, %v10615_v42  ;;  %v8822_v30 = vpop.f32.mrf.mxu1  ;;  %9092 = vmatpush3.bf16.msra.mxu0 %v9784_v20  ;;  %v9795_v42 = vld [vmem:[%s9876_s16 + $0x13d8] sm:$0xff]   ;;  %208 = vst [vmem:[%s10686_s24] sm:$0x3] %v9836_v24 }
 0x278   : > { %v8801_v31 = vpop.f32.mrf.mxu0  ;;  %9093 = vmatprep.subr.bf16.mxu0 %v9786_v23  ;;  %9114 = vmatpush3.bf16.msra.mxu1 %v9785_v26 }
 0x279   : > { %v6955_v33 = vadd.f32 %v8821_v28, %v6915_v27  ;;  %v8823_v36 = vpop.f32.mrf.mxu1  ;;  %9115 = vmatprep.subr.bf16.mxu1 %v9787_v29 }
 0x27b   : > { %9094 = vmatpush3.bf16.msra.mxu0 %v9788_v32 }
 0x27c   : > { %9095 = vmatprep.subr.bf16.mxu0 %v9790_v34  ;;  %9116 = vmatpush3.bf16.msra.mxu1 %v9789_v37 }
 0x27d   : > { %9117 = vmatprep.subr.bf16.mxu1 %v9791_v38 }
 0x27f   : > { %9096 = vmatpush3.bf16.msra.mxu0 %v9792_v39 }
 0x280   : > { %9097 = vmatprep.subr.bf16.mxu0 %v9794_v40  ;;  %9118 = vmatpush3.bf16.msra.mxu1 %v9793_v41 }
 0x281   : > { %9119 = vmatprep.subr.bf16.mxu1 %v9795_v42 }
 0x283   : > { %9098 = vmatpush3.bf16.msra.mxu0 %v9796_v43 }
 0x284   : > { %9099 = vmatprep.subr.bf16.mxu0 %v9798_v44  ;;  %9120 = vmatpush3.bf16.msra.mxu1 %v9797_v45 }
 0x285   : > { %9121 = vmatprep.subr.bf16.mxu1 %v9799_v46 }
 0x287   : > { %9100 = vmatpush3.bf16.msra.mxu0 %v9800_v47 }
 0x288   : > { %9101 = vmatprep.subr.bf16.mxu0 %v9802_v48  ;;  %9122 = vmatpush3.bf16.msra.mxu1 %v9801_v49 }
 0x289   : > { %9123 = vmatprep.subr.bf16.mxu1 %v9803_v50 }
 0x28b   : > { %9102 = vmatpush3.bf16.msra.mxu0 %v9804_v51 }
 0x28c   : > { %9103 = vmatprep.subr.bf16.mxu0 %v9806_v52  ;;  %9124 = vmatpush3.bf16.msra.mxu1 %v9805_v53 }
 0x28d   : > { %9125 = vmatprep.subr.bf16.mxu1 %v9807_v54 }
 0x28f   : > { %9104 = vmatpush3.bf16.msra.mxu0 %v9808_v55 }
 0x290   : > { %9126 = vmatpush3.bf16.msra.mxu1 %v9809_v57 }
 0x292   : > { %v8841_v59 = vpop.f32.mrf.mxu0  ;;  %7473 = vmatmul.mubr.bf16.vlgmr.msra.gmra.mxu0 %v1981_v56 }
 0x293   : > { %v8863_v60 = vpop.f32.mrf.mxu1  ;;  %7513 = vmatmul.mubr.bf16.vlgmr.msra.gmra.mxu1 %v1997_v58 }
 0x294   : > { %v8842_v61 = vpop.f32.mrf.mxu0 }
 0x295   : > { %v8843_v62 = vadd.f32 %v8842_v61, %v8841_v59  ;;  %v8864_v63 = vpop.f32.mrf.mxu1 }
 0x296   : > { %v8844_v0 = vpop.f32.mrf.mxu0  ;;  %v8865_v2 = vadd.f32 %v8864_v63, %v8863_v60 }
 0x297   : > { %v6995_v1 = vadd.f32 %v8843_v62, %v6955_v33  ;;  %v8866_v3 = vpop.f32.mrf.mxu1 }
 0x298   : > { %v8845_v4 = vpop.f32.mrf.mxu0 }
 0x299   : > { %v7035_v5 = vadd.f32 %v8865_v2, %v6995_v1  ;;  %v8867_v35 = vpop.f32.mrf.mxu1 }
 0x2b2   : > { %v8885_v6 = vpop.f32.mrf.mxu0 }
 0x2b3   : > { %v8907_v7 = vpop.f32.mrf.mxu1 }
 0x2b4   : > { %v8886_v8 = vpop.f32.mrf.mxu0 }
 0x2b5   : > { %v8887_v9 = vadd.f32 %v8886_v8, %v8885_v6  ;;  %v8908_v10 = vpop.f32.mrf.mxu1 }
 0x2b6   : > { %v8888_v11 = vpop.f32.mrf.mxu0  ;;  %v8909_v13 = vadd.f32 %v8908_v10, %v8907_v7 }
 0x2b7   : > { %v7075_v12 = vadd.f32 %v8887_v9, %v7035_v5  ;;  %v8910_v14 = vpop.f32.mrf.mxu1  ;;  %v209_v11 = vld [vmem:[%s10686_s24] sm:$0x3] }
 0x2b8   : > { %v8889_v15 = vpop.f32.mrf.mxu0 }
 0x2b9   : > { %v7115_v16 = vadd.f32 %v8909_v13, %v7075_v12  ;;  %v8911_v17 = vpop.f32.mrf.mxu1 }
 0x2d2   : > { %v8929_v18 = vpop.f32.mrf.mxu0 }
 0x2d3   : > { %v8951_v19 = vpop.f32.mrf.mxu1 }
 0x2d4   : > { %v8930_v20 = vpop.f32.mrf.mxu0 }
 0x2d5   : > { %v8931_v21 = vadd.f32 %v8930_v20, %v8929_v18  ;;  %v8952_v22 = vpop.f32.mrf.mxu1 }
 0x2d6   : > { %v8932_v23 = vpop.f32.mrf.mxu0  ;;  %v8953_v26 = vadd.f32 %v8952_v22, %v8951_v19 }
 0x2d7   : > { %v7155_v25 = vadd.f32 %v8931_v21, %v7115_v16  ;;  %v8954_v27 = vpop.f32.mrf.mxu1 }
 0x2d8   : > { %v8933_v28 = vpop.f32.mrf.mxu0 }
 0x2d9   : > { %v7195_v29 = vadd.f32 %v8953_v26, %v7155_v25  ;;  %v8955_v30 = vpop.f32.mrf.mxu1 }
 0x2f2   : > { %v8973_v31 = vpop.f32.mrf.mxu0 }
 0x2f3   : > { %v8995_v32 = vpop.f32.mrf.mxu1 }
 0x2f4   : > { %v8974_v33 = vpop.f32.mrf.mxu0 }
 0x2f5   : > { %v8975_v34 = vadd.f32 %v8974_v33, %v8973_v31  ;;  %v8996_v36 = vpop.f32.mrf.mxu1 }
 0x2f6   : > { %v8976_v37 = vpop.f32.mrf.mxu0  ;;  %v8997_v39 = vadd.f32 %v8996_v36, %v8995_v32 }
 0x2f7   : > { %v7235_v38 = vadd.f32 %v8975_v34, %v7195_v29  ;;  %v8998_v40 = vpop.f32.mrf.mxu1 }
 0x2f8   : > { %v8977_v41 = vpop.f32.mrf.mxu0 }
 0x2f9   : > { %v7275_v42 = vadd.f32 %v8997_v39, %v7235_v38  ;;  %v8999_v43 = vpop.f32.mrf.mxu1 }
 0x312   : > { %v9017_v44 = vpop.f32.mrf.mxu0 }
 0x313   : > { %v9039_v45 = vpop.f32.mrf.mxu1 }
 0x314   : > { %v9018_v46 = vpop.f32.mrf.mxu0 }
 0x315   : > { %v9040_v47 = vpop.f32.mrf.mxu1  ;;  %v9019_v60 = vadd.f32 %v9018_v46, %v9017_v44 }
 0x316   : > { %v9020_v48 = vpop.f32.mrf.mxu0  ;;  %v9041_v62 = vadd.f32 %v9040_v47, %v9039_v45 }
 0x317   : > { %v9042_v49 = vpop.f32.mrf.mxu1  ;;  %v7315_v61 = vadd.f32 %v9019_v60, %v7275_v42 }
 0x318   : > { %v9021_v50 = vpop.f32.mrf.mxu0 }
 0x319   : > { %v9043_v51 = vpop.f32.mrf.mxu1  ;;  %v7355_v0 = vadd.f32 %v9041_v62, %v7315_v61 }
 0x332   : > { %v9061_v52 = vpop.f32.mrf.mxu0 }
 0x333   : > { %v9083_v53 = vpop.f32.mrf.mxu1 }
 0x334   : > { %v9062_v54 = vpop.f32.mrf.mxu0 }
 0x335   : > { %v9084_v55 = vpop.f32.mrf.mxu1  ;;  %v9063_v63 = vadd.f32 %v9062_v54, %v9061_v52 }
 0x336   : > { %v9064_v56 = vpop.f32.mrf.mxu0  ;;  %v9085_v2 = vadd.f32 %v9084_v55, %v9083_v53 }
 0x337   : > { %v9086_v57 = vpop.f32.mrf.mxu1  ;;  %v7395_v1 = vadd.f32 %v9063_v63, %v7355_v0 }
 0x338   : > { %v9065_v58 = vpop.f32.mrf.mxu0 }
 0x339   : > { %v9087_v59 = vpop.f32.mrf.mxu1  ;;  %v7435_v35 = vadd.f32 %v9085_v2, %v7395_v1 }
 0x352   : > { %v9105_v3 = vpop.f32.mrf.mxu0 }
 0x353   : > { %v9127_v4 = vpop.f32.mrf.mxu1 }
 0x354   : > { %v9106_v5 = vpop.f32.mrf.mxu0 }
 0x355   : > { %v9107_v6 = vadd.f32 %v9106_v5, %v9105_v3  ;;  %v9128_v7 = vpop.f32.mrf.mxu1 }
 0x356   : > { %v9108_v8 = vpop.f32.mrf.mxu0  ;;  %v9129_v10 = vadd.f32 %v9128_v7, %v9127_v4 }
 0x357   : > { %v7475_v9 = vadd.f32 %v9107_v6, %v7435_v35  ;;  %v9130_v12 = vpop.f32.mrf.mxu1 }
 0x358   : > { %v9109_v13 = vpop.f32.mrf.mxu0 }
 0x359   : > { %v7515_v14 = vadd.f32 %v9129_v10, %v7475_v9  ;;  %v9131_v15 = vpop.f32.mrf.mxu1 }
 0x35b   : > { %v7520_v16 = vadd.f32 %v7515_v14, %v209_v11 }
 0x35d   : > { %7521 = vst [vmem:[%s10686_s24] sm:$0x3] %v7520_v16 }
 0x35e PF: > { %s12_s11 = sadd.s32 1, %s9833_s11   ;;  %s10703_s9 = smov %s9829_s10 }
 0x35f   : > { %p9_p5 = scmp.ge.s32.totalorder %s12_s11, 4   ;;  %s10704_s10 = smov %s10706_s12 }
 0x361   :  { %11 = sbr.rel (!%p9_p5) target bundleno = 2 (0x2), region = 65 }

</bundles_post_ra>
